<compile_context>
chip_gen: v7x
topology: tpu7x:2x2x1
jax: 0.10.0
libtpu: 0.0.40
codegen_flags: <defaults>
</compile_context>

<pallas_src>
import jax
import jax.numpy as jnp
import numpy as np
from jax.experimental import pallas as pl
from jax.experimental.pallas import tpu as pltpu

EPS = 1e-5  # nn.BatchNorm3d default eps

_COMPILER_PARAMS = pltpu.CompilerParams(
    dimension_semantics=("parallel",),
    vmem_limit_bytes=32 * 1024 * 1024,
)


def _pick_tile(m, cap=512):
    """Largest bounded row tile (multiple of 8) dividing m; falls back to m."""
    for t in (cap, 256, 128, 64, 32, 16, 8):
        if t <= cap and m % t == 0:
            return t
    return m


# ---------------------------- Pallas kernels ----------------------------

def _matmul_bias_kernel(x_ref, w_ref, b_ref, o_ref):
    # ConvTranspose3d(k=2,s=2) as a matmul: (TM, Cin) @ (Cin, 8*Cout) + bias
    o_ref[...] = (jnp.dot(x_ref[...], w_ref[...],
                          preferred_element_type=jnp.float32) + b_ref[...])


def _matmul_stats_kernel(x_ref, w_ref, y_ref, stats_ref):
    # im2col conv matmul with fused BatchNorm statistics epilogue.
    acc = jnp.dot(x_ref[...], w_ref[...], preferred_element_type=jnp.float32)
    y_ref[...] = acc
    s = jnp.sum(acc, axis=0, keepdims=True)          # (1, Cout)  sum
    q = jnp.sum(acc * acc, axis=0, keepdims=True)    # (1, Cout)  sum of squares
    stats_ref[...] = jnp.concatenate([s, q], axis=0).reshape(stats_ref.shape)


def _scale_shift_relu_kernel(y_ref, sc_ref, sh_ref, o_ref):
    # Lane-dense BatchNorm(affine) + ReLU: y*scale + shift, clamp at 0.
    o_ref[...] = jnp.maximum(y_ref[...] * sc_ref[...] + sh_ref[...], 0.0)


# ---------------------------- wrappers ----------------------------

def conv_transpose3d_2x(x, wt, bias):
    """x: (N,D,H,W,Cin); wt: (Cin,Cout,2,2,2) [PyTorch layout]; bias: (Cout,)."""
    N, D, H, W, Cin = x.shape
    Cout = wt.shape[1]
    M = N * D * H * W
    Kw = 8 * Cout
    wmat = jnp.transpose(wt, (0, 2, 3, 4, 1)).reshape(Cin, Kw)   # (Cin, 8*Cout)
    bmat = jnp.tile(bias.astype(jnp.float32), 8).reshape(1, Kw)
    xf = x.reshape(M, Cin)
    TM = _pick_tile(M)
    y = pl.pallas_call(
        _matmul_bias_kernel,
        out_shape=jax.ShapeDtypeStruct((M, Kw), jnp.float32),
        grid=(M // TM,),
        in_specs=[pl.BlockSpec((TM, Cin), lambda i: (i, 0)),
                  pl.BlockSpec((Cin, Kw), lambda i: (0, 0)),
                  pl.BlockSpec((1, Kw), lambda i: (0, 0))],
        out_specs=pl.BlockSpec((TM, Kw), lambda i: (i, 0)),
        compiler_params=_COMPILER_PARAMS,
    )(xf, wmat, bmat)
    # scatter the 2x2x2 sub-voxels to the upsampled grid (pure layout glue)
    y = y.reshape(N, D, H, W, 2, 2, 2, Cout)
    y = jnp.transpose(y, (0, 1, 4, 2, 5, 3, 6, 7)).reshape(N, 2 * D, 2 * H, 2 * W, Cout)
    return y


def center_crop_like(skip, target):
    """MONAI-style CenterSpatialCrop of skip's D,H,W to target's D,H,W."""
    _, Dt, Ht, Wt_, _ = target.shape
    _, Ds, Hs, Ws, _ = skip.shape
    d0 = Ds // 2 - Dt // 2
    h0 = Hs // 2 - Ht // 2
    w0 = Ws // 2 - Wt_ // 2
    return skip[:, d0:d0 + Dt, h0:h0 + Ht, w0:w0 + Wt_, :]


def im2col_3x3x3(x):
    # glue: 3x3x3 "SAME" patches; x: (N,D,H,W,C) -> (N*D*H*W, 27*C)
    # TODO(synk): build patches in-kernel from a halo'd VMEM tile (pl.ANY +
    # manual DMA) to avoid the 27x im2col HBM inflation on large shapes.
    N, D, H, W, C = x.shape
    xp = jnp.pad(x, ((0, 0), (1, 1), (1, 1), (1, 1), (0, 0)))
    patches = []
    for kd in range(3):
        for kh in range(3):
            for kw in range(3):
                patches.append(xp[:, kd:kd + D, kh:kh + H, kw:kw + W, :])
    p = jnp.stack(patches, axis=4)          # (N, D, H, W, 27, C)
    return p.reshape(N * D * H * W, 27 * C)


def scale_shift_relu(y, scale, shift):
    """Lane-dense BN-affine + ReLU.  y: (M, C) -> (M, C)."""
    M, C = y.shape
    g = 128 // C if (128 % C == 0) else 1
    while g > 1 and M % g != 0:
        g //= 2
    L = g * C
    R = M // g
    y2 = y.reshape(R, L)                                   # free reinterpretation
    sc = jnp.tile(scale.astype(jnp.float32), g).reshape(1, L)
    sh = jnp.tile(shift.astype(jnp.float32), g).reshape(1, L)
    TR = _pick_tile(R, cap=1024)
    out = pl.pallas_call(
        _scale_shift_relu_kernel,
        out_shape=jax.ShapeDtypeStruct((R, L), jnp.float32),
        grid=(R // TR,),
        in_specs=[pl.BlockSpec((TR, L), lambda i: (i, 0)),
                  pl.BlockSpec((1, L), lambda i: (0, 0)),
                  pl.BlockSpec((1, L), lambda i: (0, 0))],
        out_specs=pl.BlockSpec((TR, L), lambda i: (i, 0)),
        compiler_params=_COMPILER_PARAMS,
    )(y2, sc, sh)
    return out.reshape(M, C)


def conv_bn_relu(x, w, gamma, beta):
    """x: (N,D,H,W,Cin); w: (3,3,3,Cin,Cout) DHWIO.  Conv+BN(train)+ReLU."""
    N, D, H, W, Cin = x.shape
    Cout = w.shape[-1]
    M = N * D * H * W
    K = 27 * Cin
    cols = im2col_3x3x3(x)
    wmat = w.reshape(K, Cout)
    TM = _pick_tile(M)
    nt = M // TM
    y, stats = pl.pallas_call(
        _matmul_stats_kernel,
        out_shape=(jax.ShapeDtypeStruct((M, Cout), jnp.float32),
                   jax.ShapeDtypeStruct((nt, 2, Cout), jnp.float32)),
        grid=(nt,),
        in_specs=[pl.BlockSpec((TM, K), lambda i: (i, 0)),
                  pl.BlockSpec((K, Cout), lambda i: (0, 0))],
        out_specs=[pl.BlockSpec((TM, Cout), lambda i: (i, 0)),
                   pl.BlockSpec((1, 2, Cout), lambda i: (i, 0, 0))],
        compiler_params=_COMPILER_PARAMS,
    )(cols, wmat)
    # finalize BN affine params from fused per-tile statistics (tiny XLA math)
    ssum = stats.sum(axis=0)                      # (2, Cout)
    mean = ssum[0] / M
    var = ssum[1] / M - mean * mean               # biased variance (train mode)
    scale = gamma.astype(jnp.float32) * jax.lax.rsqrt(var + EPS)
    shift = beta.astype(jnp.float32) - mean * scale
    y = scale_shift_relu(y, scale, shift)
    return y.reshape(N, D, H, W, Cout)


def up_forward(x_ncdhw, skip_ncdhw, params):
    x = jnp.transpose(x_ncdhw, (0, 2, 3, 4, 1))        # NCDHW -> NDHWC
    skip = jnp.transpose(skip_ncdhw, (0, 2, 3, 4, 1))
    xu = conv_transpose3d_2x(x, params["wt"], params["bt"])
    sk = center_crop_like(skip, xu)
    cat = jnp.concatenate([xu, sk], axis=-1)           # torch.cat([x, skip], dim=1)
    y = conv_bn_relu(cat, params["w1"], params["g1"], params["b1"])
    y = conv_bn_relu(y, params["w2"], params["g2"], params["b2"])
    return jnp.transpose(y, (0, 4, 1, 2, 3))           # NDHWC -> NCDHW


# ---------------------------- pure-JAX reference ----------------------------

def ref_forward(x_ncdhw, skip_ncdhw, params):
    x = jnp.transpose(x_ncdhw, (0, 2, 3, 4, 1))
    skip = jnp.transpose(skip_ncdhw, (0, 2, 3, 4, 1))

    # ConvTranspose3d(k=2, s=2): strided-scatter formulation
    N, D, H, W, Ci = x.shape
    wt = params["wt"]
    Co = wt.shape[1]
    y = jnp.zeros((N, 2 * D, 2 * H, 2 * W, Co), jnp.float32)
    for a in range(2):
        for b in range(2):
            for c in range(2):
                contrib = jnp.einsum("ndhwi,io->ndhwo", x, wt[:, :, a, b, c],
                                     precision=jax.lax.Precision.HIGHEST)
                y = y.at[:, a::2, b::2, c::2, :].set(contrib)
    y = y + params["bt"]

    sk = center_crop_like(skip, y)
    cat = jnp.concatenate([y, sk], axis=-1)

    def cbr(xx, w, g, b):
        z = jax.lax.conv_general_dilated(
            xx, w, (1, 1, 1), "SAME",
            dimension_numbers=("NDHWC", "DHWIO", "NDHWC"),
            precision=jax.lax.Precision.HIGHEST)
        mean = z.mean(axis=(0, 1, 2, 3))
        var = ((z - mean) ** 2).mean(axis=(0, 1, 2, 3))
        return jnp.maximum((z - mean) / jnp.sqrt(var + EPS) * g + b, 0.0)

    z = cbr(cat, params["w1"], params["g1"], params["b1"])
    z = cbr(z, params["w2"], params["g2"], params["b2"])
    return jnp.transpose(z, (0, 4, 1, 2, 3))


# ---------------------------- main ----------------------------

if __name__ == "__main__":
    key = jax.random.PRNGKey(0)
    kx, ks, k0, kb, k1, k2, kg1, kb1, kg2, kb2 = jax.random.split(key, 10)

    # Up(in_channels=8, out_channels=4)
    N, Cin, Cout = 2, 8, 4
    D = H = W = 8                       # low-res input spatial size
    Dsk = Hsk = Wsk = 18                # skip is slightly larger -> exercises crop

    x = jax.random.normal(kx, (N, Cin, D, H, W), dtype=jnp.float32)
    skip = jax.random.normal(ks, (N, Cin - Cout, Dsk, Hsk, Wsk), dtype=jnp.float32)

    params = {
        # ConvTranspose3d(8, 4, kernel=2, stride=2) -- PyTorch weight layout (Cin,Cout,2,2,2)
        "wt": jax.random.normal(k0, (Cin, Cout, 2, 2, 2), jnp.float32) * 0.3,
        "bt": jax.random.normal(kb, (Cout,), jnp.float32) * 0.1,
        # DoubleConvolution(8, 4): two Conv3d 3x3x3, no bias, DHWIO layout
        "w1": jax.random.normal(k1, (3, 3, 3, Cin, Cout), jnp.float32) * 0.1,
        "g1": 1.0 + 0.1 * jax.random.normal(kg1, (Cout,), jnp.float32),
        "b1": 0.1 * jax.random.normal(kb1, (Cout,), jnp.float32),
        "w2": jax.random.normal(k2, (3, 3, 3, Cout, Cout), jnp.float32) * 0.1,
        "g2": 1.0 + 0.1 * jax.random.normal(kg2, (Cout,), jnp.float32),
        "b2": 0.1 * jax.random.normal(kb2, (Cout,), jnp.float32),
    }

    out = jax.jit(up_forward)(x, skip, params)
    out = jax.block_until_ready(out)

    assert out.shape == (N, Cout, 2 * D, 2 * H, 2 * W), out.shape

    ref = ref_forward(x, skip, params)
    np.testing.assert_allclose(np.asarray(out), np.asarray(ref),
                               rtol=1e-2, atol=1e-2)

    print("KERNEL_OK")
</pallas_src>

<mosaic_0001>
module attributes {stable_mosaic.version = 11 : i64} {
  func.func @_matmul_bias_kernel(%arg0: i32, %arg1: memref<512x8xf32, #tpu.memory_space<vmem>>, %arg2: memref<8x32xf32, #tpu.memory_space<vmem>>, %arg3: memref<1x32xf32, #tpu.memory_space<vmem>>, %arg4: memref<512x32xf32, #tpu.memory_space<vmem>>) attributes {dimension_semantics = [#tpu.dimension_semantics<parallel>], iteration_bounds = array<i64: 2>, scalar_prefetch = 0 : i64, scratch_operands = 0 : i64, tpu.core_type = #tpu.core_type<tc>, window_params = [{transform_indices = @transform_0, window_bounds = array<i64: 512, 8>}, {pipeline_mode = #tpu.pipeline_mode<synchronous>, transform_indices = @transform_1, window_bounds = array<i64: 8, 32>}, {pipeline_mode = #tpu.pipeline_mode<synchronous>, transform_indices = @transform_2, window_bounds = array<i64: 1, 32>}, {transform_indices = @transform_3, window_bounds = array<i64: 512, 32>}]} {
    %c0 = arith.constant 0 : index
    %c0_0 = arith.constant 0 : index
    %0 = vector.load %arg1[%c0, %c0_0] : memref<512x8xf32, #tpu.memory_space<vmem>>, vector<512x8xf32>
    %c0_1 = arith.constant 0 : index
    %c0_2 = arith.constant 0 : index
    %1 = vector.load %arg2[%c0_1, %c0_2] : memref<8x32xf32, #tpu.memory_space<vmem>>, vector<8x32xf32>
    %cst = arith.constant dense<0.000000e+00> : vector<512x32xf32>
    %2 = tpu.matmul %0, %1, %cst {dimension_numbers = #tpu.dot_dimension_numbers<[1], [0], [0], [1], [0, 0, 1, 1], [], []>} : vector<512x8xf32>, vector<8x32xf32>, vector<512x32xf32> -> vector<512x32xf32>
    %c0_3 = arith.constant 0 : index
    %c0_4 = arith.constant 0 : index
    %3 = vector.load %arg3[%c0_3, %c0_4] : memref<1x32xf32, #tpu.memory_space<vmem>>, vector<1x32xf32>
    %4 = vector.broadcast %3 : vector<1x32xf32> to vector<512x32xf32>
    %5 = arith.addf %2, %4 : vector<512x32xf32>
    %c0_5 = arith.constant 0 : index
    %c0_6 = arith.constant 0 : index
    %6 = vector.load %arg4[%c0_5, %c0_6] : memref<512x32xf32, #tpu.memory_space<vmem>>, vector<512x32xf32>
    tpu.vector_store %arg4[%c0_5, %c0_6], %5 {strides = array<i32>} : memref<512x32xf32, #tpu.memory_space<vmem>>, vector<512x32xf32>,
    return
  }
  func.func @transform_0(%arg0: i32) -> (i32, i32) {
    %c0_i32 = arith.constant 0 : i32
    %c0_i32_0 = arith.constant 0 : i32
    return %arg0, %c0_i32 : i32, i32
  }
  func.func @transform_1(%arg0: i32) -> (i32, i32) {
    %c0_i32 = arith.constant 0 : i32
    %c0_i32_0 = arith.constant 0 : i32
    %c0_i32_1 = arith.constant 0 : i32
    return %c0_i32, %c0_i32_0 : i32, i32
  }
  func.func @transform_2(%arg0: i32) -> (i32, i32) {
    %c0_i32 = arith.constant 0 : i32
    %c0_i32_0 = arith.constant 0 : i32
    %c0_i32_1 = arith.constant 0 : i32
    return %c0_i32, %c0_i32_0 : i32, i32
  }
  func.func @transform_3(%arg0: i32) -> (i32, i32) {
    %c0_i32 = arith.constant 0 : i32
    %c0_i32_0 = arith.constant 0 : i32
    return %arg0, %c0_i32 : i32, i32
  }
}

module attributes {stable_mosaic.version = 11 : i64} {
  func.func @_matmul_stats_kernel(%arg0: i32, %arg1: memref<512x216xf32, #tpu.memory_space<vmem>>, %arg2: memref<216x4xf32, #tpu.memory_space<vmem>>, %arg3: memref<512x4xf32, #tpu.memory_space<vmem>>, %arg4: memref<1x2x4xf32, #tpu.memory_space<vmem>>) attributes {dimension_semantics = [#tpu.dimension_semantics<parallel>], iteration_bounds = array<i64: 16>, scalar_prefetch = 0 : i64, scratch_operands = 0 : i64, tpu.core_type = #tpu.core_type<tc>, window_params = [{transform_indices = @transform_0, window_bounds = array<i64: 512, 216>}, {pipeline_mode = #tpu.pipeline_mode<synchronous>, transform_indices = @transform_1, window_bounds = array<i64: 216, 4>}, {transform_indices = @transform_2, window_bounds = array<i64: 512, 4>}, {transform_indices = @transform_3, window_bounds = array<i64: 1, 2, 4>}]} {
    %c0 = arith.constant 0 : index
    %c0_0 = arith.constant 0 : index
    %0 = vector.load %arg1[%c0, %c0_0] : memref<512x216xf32, #tpu.memory_space<vmem>>, vector<512x216xf32>
    %c0_1 = arith.constant 0 : index
    %c0_2 = arith.constant 0 : index
    %1 = vector.load %arg2[%c0_1, %c0_2] : memref<216x4xf32, #tpu.memory_space<vmem>>, vector<216x4xf32>
    %cst = arith.constant dense<0.000000e+00> : vector<512x4xf32>
    %2 = tpu.matmul %0, %1, %cst {dimension_numbers = #tpu.dot_dimension_numbers<[1], [0], [0], [1], [0, 0, 1, 1], [], []>} : vector<512x216xf32>, vector<216x4xf32>, vector<512x4xf32> -> vector<512x4xf32>
    %c0_3 = arith.constant 0 : index
    %c0_4 = arith.constant 0 : index
    %3 = vector.load %arg3[%c0_3, %c0_4] : memref<512x4xf32, #tpu.memory_space<vmem>>, vector<512x4xf32>
    tpu.vector_store %arg3[%c0_3, %c0_4], %2 {strides = array<i32>} : memref<512x4xf32, #tpu.memory_space<vmem>>, vector<512x4xf32>,
    %cst_5 = arith.constant dense<0.000000e+00> : vector<4xf32>
    %4 = vector.multi_reduction <add>, %2, %cst_5 [0] : vector<512x4xf32> to vector<4xf32>
    %5 = vector.shape_cast %4 : vector<4xf32> to vector<1x4xf32>
    %6 = arith.mulf %2, %2 : vector<512x4xf32>
    %cst_6 = arith.constant dense<0.000000e+00> : vector<4xf32>
    %7 = vector.multi_reduction <add>, %6, %cst_6 [0] : vector<512x4xf32> to vector<4xf32>
    %8 = vector.shape_cast %7 : vector<4xf32> to vector<1x4xf32>
    %9 = tpu.concatenate %5, %8 in 0 : vector<1x4xf32>, vector<1x4xf32> -> vector<2x4xf32>
    %10 = vector.shape_cast %9 : vector<2x4xf32> to vector<1x2x4xf32>
    %c0_7 = arith.constant 0 : index
    %c0_8 = arith.constant 0 : index
    %c0_9 = arith.constant 0 : index
    %11 = vector.load %arg4[%c0_7, %c0_8, %c0_9] : memref<1x2x4xf32, #tpu.memory_space<vmem>>, vector<1x2x4xf32>
    tpu.vector_store %arg4[%c0_7, %c0_8, %c0_9], %10 {strides = array<i32>} : memref<1x2x4xf32, #tpu.memory_space<vmem>>, vector<1x2x4xf32>,
    return
  }
  func.func @transform_0(%arg0: i32) -> (i32, i32) {
    %c0_i32 = arith.constant 0 : i32
    %c0_i32_0 = arith.constant 0 : i32
    return %arg0, %c0_i32 : i32, i32
  }
  func.func @transform_1(%arg0: i32) -> (i32, i32) {
    %c0_i32 = arith.constant 0 : i32
    %c0_i32_0 = arith.constant 0 : i32
    %c0_i32_1 = arith.constant 0 : i32
    return %c0_i32, %c0_i32_0 : i32, i32
  }
  func.func @transform_2(%arg0: i32) -> (i32, i32) {
    %c0_i32 = arith.constant 0 : i32
    %c0_i32_0 = arith.constant 0 : i32
    return %arg0, %c0_i32 : i32, i32
  }
  func.func @transform_3(%arg0: i32) -> (i32, i32, i32) {
    %c0_i32 = arith.constant 0 : i32
    %c0_i32_0 = arith.constant 0 : i32
    %c0_i32_1 = arith.constant 0 : i32
    return %arg0, %c0_i32, %c0_i32_0 : i32, i32, i32
  }
}

module attributes {stable_mosaic.version = 11 : i64} {
  func.func @_scale_shift_relu_kernel(%arg0: i32, %arg1: memref<256x128xf32, #tpu.memory_space<vmem>>, %arg2: memref<1x128xf32, #tpu.memory_space<vmem>>, %arg3: memref<1x128xf32, #tpu.memory_space<vmem>>, %arg4: memref<256x128xf32, #tpu.memory_space<vmem>>) attributes {dimension_semantics = [#tpu.dimension_semantics<parallel>], iteration_bounds = array<i64: 1>, scalar_prefetch = 0 : i64, scratch_operands = 0 : i64, tpu.core_type = #tpu.core_type<tc>, window_params = [{transform_indices = @transform_0, window_bounds = array<i64: 256, 128>}, {pipeline_mode = #tpu.pipeline_mode<synchronous>, transform_indices = @transform_1, window_bounds = array<i64: 1, 128>}, {pipeline_mode = #tpu.pipeline_mode<synchronous>, transform_indices = @transform_2, window_bounds = array<i64: 1, 128>}, {transform_indices = @transform_3, window_bounds = array<i64: 256, 128>}]} {
    %c0 = arith.constant 0 : index
    %c0_0 = arith.constant 0 : index
    %0 = vector.load %arg1[%c0, %c0_0] : memref<256x128xf32, #tpu.memory_space<vmem>>, vector<256x128xf32>
    %c0_1 = arith.constant 0 : index
    %c0_2 = arith.constant 0 : index
    %1 = vector.load %arg2[%c0_1, %c0_2] : memref<1x128xf32, #tpu.memory_space<vmem>>, vector<1x128xf32>
    %2 = vector.broadcast %1 : vector<1x128xf32> to vector<256x128xf32>
    %3 = arith.mulf %0, %2 : vector<256x128xf32>
    %c0_3 = arith.constant 0 : index
    %c0_4 = arith.constant 0 : index
    %4 = vector.load %arg3[%c0_3, %c0_4] : memref<1x128xf32, #tpu.memory_space<vmem>>, vector<1x128xf32>
    %5 = vector.broadcast %4 : vector<1x128xf32> to vector<256x128xf32>
    %6 = arith.addf %3, %5 : vector<256x128xf32>
    %cst = arith.constant 0.000000e+00 : f32
    %7 = vector.broadcast %cst : f32 to vector<256x128xf32>
    %8 = arith.maximumf %6, %7 : vector<256x128xf32>
    %c0_5 = arith.constant 0 : index
    %c0_6 = arith.constant 0 : index
    %9 = vector.load %arg4[%c0_5, %c0_6] : memref<256x128xf32, #tpu.memory_space<vmem>>, vector<256x128xf32>
    tpu.vector_store %arg4[%c0_5, %c0_6], %8 {strides = array<i32>} : memref<256x128xf32, #tpu.memory_space<vmem>>, vector<256x128xf32>,
    return
  }
  func.func @transform_0(%arg0: i32) -> (i32, i32) {
    %c0_i32 = arith.constant 0 : i32
    %c0_i32_0 = arith.constant 0 : i32
    return %arg0, %c0_i32 : i32, i32
  }
  func.func @transform_1(%arg0: i32) -> (i32, i32) {
    %c0_i32 = arith.constant 0 : i32
    %c0_i32_0 = arith.constant 0 : i32
    %c0_i32_1 = arith.constant 0 : i32
    return %c0_i32, %c0_i32_0 : i32, i32
  }
  func.func @transform_2(%arg0: i32) -> (i32, i32) {
    %c0_i32 = arith.constant 0 : i32
    %c0_i32_0 = arith.constant 0 : i32
    %c0_i32_1 = arith.constant 0 : i32
    return %c0_i32, %c0_i32_0 : i32, i32
  }
  func.func @transform_3(%arg0: i32) -> (i32, i32) {
    %c0_i32 = arith.constant 0 : i32
    %c0_i32_0 = arith.constant 0 : i32
    return %arg0, %c0_i32 : i32, i32
  }
}

module attributes {stable_mosaic.version = 11 : i64} {
  func.func @_matmul_stats_kernel(%arg0: i32, %arg1: memref<512x108xf32, #tpu.memory_space<vmem>>, %arg2: memref<108x4xf32, #tpu.memory_space<vmem>>, %arg3: memref<512x4xf32, #tpu.memory_space<vmem>>, %arg4: memref<1x2x4xf32, #tpu.memory_space<vmem>>) attributes {dimension_semantics = [#tpu.dimension_semantics<parallel>], iteration_bounds = array<i64: 16>, scalar_prefetch = 0 : i64, scratch_operands = 0 : i64, tpu.core_type = #tpu.core_type<tc>, window_params = [{transform_indices = @transform_0, window_bounds = array<i64: 512, 108>}, {pipeline_mode = #tpu.pipeline_mode<synchronous>, transform_indices = @transform_1, window_bounds = array<i64: 108, 4>}, {transform_indices = @transform_2, window_bounds = array<i64: 512, 4>}, {transform_indices = @transform_3, window_bounds = array<i64: 1, 2, 4>}]} {
    %c0 = arith.constant 0 : index
    %c0_0 = arith.constant 0 : index
    %0 = vector.load %arg1[%c0, %c0_0] : memref<512x108xf32, #tpu.memory_space<vmem>>, vector<512x108xf32>
    %c0_1 = arith.constant 0 : index
    %c0_2 = arith.constant 0 : index
    %1 = vector.load %arg2[%c0_1, %c0_2] : memref<108x4xf32, #tpu.memory_space<vmem>>, vector<108x4xf32>
    %cst = arith.constant dense<0.000000e+00> : vector<512x4xf32>
    %2 = tpu.matmul %0, %1, %cst {dimension_numbers = #tpu.dot_dimension_numbers<[1], [0], [0], [1], [0, 0, 1, 1], [], []>} : vector<512x108xf32>, vector<108x4xf32>, vector<512x4xf32> -> vector<512x4xf32>
    %c0_3 = arith.constant 0 : index
    %c0_4 = arith.constant 0 : index
    %3 = vector.load %arg3[%c0_3, %c0_4] : memref<512x4xf32, #tpu.memory_space<vmem>>, vector<512x4xf32>
    tpu.vector_store %arg3[%c0_3, %c0_4], %2 {strides = array<i32>} : memref<512x4xf32, #tpu.memory_space<vmem>>, vector<512x4xf32>,
    %cst_5 = arith.constant dense<0.000000e+00> : vector<4xf32>
    %4 = vector.multi_reduction <add>, %2, %cst_5 [0] : vector<512x4xf32> to vector<4xf32>
    %5 = vector.shape_cast %4 : vector<4xf32> to vector<1x4xf32>
    %6 = arith.mulf %2, %2 : vector<512x4xf32>
    %cst_6 = arith.constant dense<0.000000e+00> : vector<4xf32>
    %7 = vector.multi_reduction <add>, %6, %cst_6 [0] : vector<512x4xf32> to vector<4xf32>
    %8 = vector.shape_cast %7 : vector<4xf32> to vector<1x4xf32>
    %9 = tpu.concatenate %5, %8 in 0 : vector<1x4xf32>, vector<1x4xf32> -> vector<2x4xf32>
    %10 = vector.shape_cast %9 : vector<2x4xf32> to vector<1x2x4xf32>
    %c0_7 = arith.constant 0 : index
    %c0_8 = arith.constant 0 : index
    %c0_9 = arith.constant 0 : index
    %11 = vector.load %arg4[%c0_7, %c0_8, %c0_9] : memref<1x2x4xf32, #tpu.memory_space<vmem>>, vector<1x2x4xf32>
    tpu.vector_store %arg4[%c0_7, %c0_8, %c0_9], %10 {strides = array<i32>} : memref<1x2x4xf32, #tpu.memory_space<vmem>>, vector<1x2x4xf32>,
    return
  }
  func.func @transform_0(%arg0: i32) -> (i32, i32) {
    %c0_i32 = arith.constant 0 : i32
    %c0_i32_0 = arith.constant 0 : i32
    return %arg0, %c0_i32 : i32, i32
  }
  func.func @transform_1(%arg0: i32) -> (i32, i32) {
    %c0_i32 = arith.constant 0 : i32
    %c0_i32_0 = arith.constant 0 : i32
    %c0_i32_1 = arith.constant 0 : i32
    return %c0_i32, %c0_i32_0 : i32, i32
  }
  func.func @transform_2(%arg0: i32) -> (i32, i32) {
    %c0_i32 = arith.constant 0 : i32
    %c0_i32_0 = arith.constant 0 : i32
    return %arg0, %c0_i32 : i32, i32
  }
  func.func @transform_3(%arg0: i32) -> (i32, i32, i32) {
    %c0_i32 = arith.constant 0 : i32
    %c0_i32_0 = arith.constant 0 : i32
    %c0_i32_1 = arith.constant 0 : i32
    return %arg0, %c0_i32, %c0_i32_0 : i32, i32, i32
  }
}

</mosaic_0001>

<bundles_post_ra>
// kernel: tile.28
= control target key start
LH: loop header
LB: loop body
LE: loop exit
PB: predicated region body
PF: predicated region fallthrough
CT: control target
= control target key end

     0   :  { %s22_s0 = inlined_call_operand.vmem [shape: f32[4], index: 0, kind: input, shape index: {}]   ;;  %s23_s1 = inlined_call_operand.vmem [shape: f32[8,4], index: 1, kind: output, shape index: {}]  }
   0x1   :  { %v4_v0 = vld [vmem:[%s22_s0] ss:$0 sm:$0xff] }
   0x2   :  { %5 = vst [vmem:[%s23_s1] sm:$0xff] %v4_v0 }

// kernel: tile.29
= control target key start
LH: loop header
LB: loop body
LE: loop exit
PB: predicated region body
PF: predicated region fallthrough
CT: control target
= control target key end

     0   :  { %s67_s10 = smov 28   ;;  %s68_s11 = smov 20   ;;  %vm3_vm0 = vcmask 31744   ;;  %vm9_vm1 = vcmask 261344   ;;  %vm15_vm2 = vcmask 228544   ;;  %vm21_vm3 = vcmask 195744   ;;  %s111_s0 = inlined_call_operand.vmem [shape: f32[8,4], index: 0, kind: input, shape index: {}]   ;;  %s112_s1 = inlined_call_operand.vmem [shape: f32[1,32], index: 1, kind: output, shape index: {}]  }
   0x1   :  { %v53_v0 = vld [vmem:[%s111_s0 + $0x7] sm:$0x1]   ;;  %v55_v1 = vld [vmem:[%s111_s0 + $0x5] sm:$0x1]   ;;  %v54_v2 = vld [vmem:[%s111_s0 + $0x6] sm:$0x1]  }
   0x2   :  { %7 = vrot.lane.b32.xlu0 %v53_v0, %s67_s10  ;;  %19 = vrot.lane.b32.xlu1 %v55_v1, %s68_s11  ;;  %v56_v3 = vld [vmem:[%s111_s0 + $0x4] sm:$0x1]   ;;  %v2_v4 = vld [vmem:[%s111_s0] sm:$0x1]   ;;  %s69_s18 = smov 24   ;;  %s70_s19 = smov 16  }
   0x3   :  { %4 = vst.msk [vmem:[#allocation0] sm:$0x1] %vm3_vm0, %v2_v4   ;;  %v57_v5 = vld [vmem:[%s111_s0 + $0x3] sm:$0x1]   ;;  %v58_v6 = vld [vmem:[%s111_s0 + $0x2] sm:$0x1]  }
   0x4   :  { %s71_s24 = smov 12   ;;  %s72_s25 = smov 8   ;;  %v59_v7 = vld [vmem:[%s111_s0 + $0x1] sm:$0x1]   ;;  %vm27_vm4 = vcmask 162944   ;;  %vm33_vm5 = vcmask 130144  }
   0x5   :  { %s73_s0 = smov 4   ;;  %vm39_vm6 = vcmask 97344   ;;  %vm45_vm7 = vcmask 64544  }
   0x6   :  { %13 = vrot.lane.b32.xlu0 %v54_v2, %s69_s18  ;;  %25 = vrot.lane.b32.xlu1 %v56_v3, %s70_s19 }
   0xa   :  { %31 = vrot.lane.b32.xlu0 %v57_v5, %s71_s24  ;;  %37 = vrot.lane.b32.xlu1 %v58_v6, %s72_s25 }
   0xe   :  { %43 = vrot.lane.b32.xlu0 %v59_v7, %s73_s0 }
  0x74   :  { %v8_v8 = vpop.permute.xlu0 %7   ;;  %v20_v9 = vpop.permute.xlu1 %19  }
  0x75   :  { %10 = vst.msk [vmem:[#allocation0] sm:$0x1] %vm9_vm1, %v8_v8  }
  0x78   :  { %v14_v10 = vpop.permute.xlu0 %13   ;;  %v26_v11 = vpop.permute.xlu1 %25  }
  0x79   :  { %16 = vst.msk [vmem:[#allocation0] sm:$0x1] %vm15_vm2, %v14_v10  }
  0x7a   :  { %22 = vst.msk [vmem:[#allocation0] sm:$0x1] %vm21_vm3, %v20_v9  }
  0x7b   :  { %28 = vst.msk [vmem:[#allocation0] sm:$0x1] %vm27_vm4, %v26_v11  }
  0x7c   :  { %v32_v12 = vpop.permute.xlu0 %31   ;;  %v38_v13 = vpop.permute.xlu1 %37  }
  0x7d   :  { %34 = vst.msk [vmem:[#allocation0] sm:$0x1] %vm33_vm5, %v32_v12  }
  0x7e   :  { %40 = vst.msk [vmem:[#allocation0] sm:$0x1] %vm39_vm6, %v38_v13  }
  0x80   :  { %v44_v14 = vpop.permute.xlu0 %43  }
  0x81   :  { %46 = vst.msk [vmem:[#allocation0] sm:$0x1] %vm45_vm7, %v44_v14  }
  0x88   :  { %v50_v15 = vld [vmem:[#allocation0] sm:$0x1] }
  0x89   :  { %52 = vst [vmem:[%s112_s1] sm:$0x1] %v50_v15 }

// kernel: up_forward.5
= control target key start
LH: loop header
LB: loop body
LE: loop exit
PB: predicated region body
PF: predicated region fallthrough
CT: control target
= control target key end

     0   :  { %s1222_s12 = smov 0   ;;  %s1578_s0 = inlined_call_operand.vmem [shape: f32[1024,8], index: 0, kind: input, shape index: {}]   ;;  %s1579_s1 = inlined_call_operand.vmem [shape: f32[8,32], index: 1, kind: input, shape index: {}]   ;;  %s1580_s2 = inlined_call_operand.vmem [shape: f32[1,32], index: 2, kind: input, shape index: {}]   ;;  %s1581_s3 = inlined_call_operand.vmem [shape: f32[1024,32], index: 3, kind: output, shape index: {}]  }
   0x1 LB: > { %s945_s13 = sadd.s32 4294967295, %s1200_s12   ;;  %p949_p0 = scmp.ge.s32.totalorder %s1200_s12, 1  ;;  %s1200_s12 = sphi %s1222_s12, %s13_s12  }
   0x2   : > { %p138_p1 = scmp.lt.s32.totalorder %s1200_s12, 3 }
   0x4   : > { %p139_p2 = pnand %p949_p0, %p138_p1 }
   0x5   : > { %v238_v0 = vld [vmem:[%s1579_s1] sm:$0xff] (!%p139_p2)  ;;  %s950_s16 = sshll.u32 (!%p139_p2), %s945_s13, 6  ;;  %vm246_vm0 = vcmask (!%p139_p2), 64512   ;;  %vm824_vm1 = vcmask (!%p139_p2), 261120  }
   0x6   : > { %142 = sbr.rel (%p139_p2) target bundleno = 295 (0x127), region = 32  ;;  %1086 = vmatprep.subr.mxu0 (!%p139_p2), %v238_v0  ;;  %1184 = vmatprep.subr.mxu1 (!%p139_p2), %v238_v0  ;;  %p163_p3 = scmp.lt.s32.totalorder (!%p139_p2), %s950_s16, 127 }
   0x7   : > { %1087 = vmatpush3.msra.mxu0 (!%p139_p2), %v238_v0  ;;  %1185 = vmatpush3.msra.mxu1 (!%p139_p2), %v238_v0 }
   0xd   : > { %s1583_s16 = smov (!%p163_p3, %s950_s16), 127 }
   0xe   : > { %s951_s17 = sshll.u32 %s1583_s16, 3 }
   0xf   : > { %s1241_s20 = scalar_lea.vmem %s1578_s0, %s951_s17  ;;  %s1381_s25 = scalar_lea.vmem %s1581_s3, %s951_s17 }
  0x10   : > { %v174_v1 = vld [vmem:[%s1241_s20] sm:$0xff]  ;;  %v175_v3 = vld [vmem:[%s1241_s20 + $0x8] sm:$0xff]  ;;  %v176_v5 = vld [vmem:[%s1241_s20 + $0x10] sm:$0xff] }
  0x11   : > { %v206_v2 = vld [vmem:[%s1241_s20 + $0x100] sm:$0xff]  ;;  %1088 = vmatprep.mubr.msk.f32.mxu0 %vm246_vm0, %v174_v1  ;;  %v207_v4 = vld [vmem:[%s1241_s20 + $0x108] sm:$0xff]  ;;  %v208_v6 = vld [vmem:[%s1241_s20 + $0x110] sm:$0xff] }
  0x12   : > { %1136 = vmatprep.mubr.msk.f32.mxu1 %vm246_vm0, %v206_v2  ;;  %1089 = vmatmul.mubr.msk.f32.vlgmr.msra.gmra.mrb[0].mxu0 %vm246_vm0, %v175_v3  ;;  %v177_v7 = vld [vmem:[%s1241_s20 + $0x18] sm:$0xff]  ;;  %v178_v9 = vld [vmem:[%s1241_s20 + $0x20] sm:$0xff]  ;;  %v179_v11 = vld [vmem:[%s1241_s20 + $0x28] sm:$0xff] }
  0x13   : > { %1137 = vmatmul.mubr.msk.f32.vlgmr.msra.gmra.mrb[0].mxu1 %vm246_vm0, %v207_v4  ;;  %1091 = vmatprep.mubr.msk.f32.mxu0 %vm246_vm0, %v176_v5  ;;  %v209_v8 = vld [vmem:[%s1241_s20 + $0x118] sm:$0xff]  ;;  %v210_v10 = vld [vmem:[%s1241_s20 + $0x120] sm:$0xff]  ;;  %v211_v12 = vld [vmem:[%s1241_s20 + $0x128] sm:$0xff] }
  0x14   : > { %1139 = vmatprep.mubr.msk.f32.mxu1 %vm246_vm0, %v208_v6  ;;  %v180_v13 = vld [vmem:[%s1241_s20 + $0x30] sm:$0xff]  ;;  %v181_v15 = vld [vmem:[%s1241_s20 + $0x38] sm:$0xff]  ;;  %v182_v17 = vld [vmem:[%s1241_s20 + $0x40] sm:$0xff] }
  0x15   : > { %v212_v14 = vld [vmem:[%s1241_s20 + $0x130] sm:$0xff]  ;;  %v213_v16 = vld [vmem:[%s1241_s20 + $0x138] sm:$0xff]  ;;  %v214_v18 = vld [vmem:[%s1241_s20 + $0x140] sm:$0xff] }
  0x16   : > { %1092 = vmatmul.mubr.msk.f32.gmra.mrb[2].mxu0 %vm246_vm0, %v177_v7  ;;  %v183_v19 = vld [vmem:[%s1241_s20 + $0x48] sm:$0xff]  ;;  %v184_v21 = vld [vmem:[%s1241_s20 + $0x50] sm:$0xff]  ;;  %v185_v23 = vld [vmem:[%s1241_s20 + $0x58] sm:$0xff] }
  0x17   : > { %1140 = vmatmul.mubr.msk.f32.gmra.mrb[2].mxu1 %vm246_vm0, %v209_v8  ;;  %1094 = vmatprep.mubr.msk.f32.mxu0 %vm246_vm0, %v178_v9  ;;  %v215_v20 = vld [vmem:[%s1241_s20 + $0x148] sm:$0xff]  ;;  %v216_v22 = vld [vmem:[%s1241_s20 + $0x150] sm:$0xff]  ;;  %v217_v24 = vld [vmem:[%s1241_s20 + $0x158] sm:$0xff] }
  0x18   : > { %1142 = vmatprep.mubr.msk.f32.mxu1 %vm246_vm0, %v210_v10  ;;  %v186_v25 = vld [vmem:[%s1241_s20 + $0x60] sm:$0xff]  ;;  %v187_v27 = vld [vmem:[%s1241_s20 + $0x68] sm:$0xff]  ;;  %v188_v29 = vld [vmem:[%s1241_s20 + $0x70] sm:$0xff] }
  0x19   : > { %v218_v26 = vld [vmem:[%s1241_s20 + $0x160] sm:$0xff]  ;;  %v219_v28 = vld [vmem:[%s1241_s20 + $0x168] sm:$0xff]  ;;  %v220_v30 = vld [vmem:[%s1241_s20 + $0x170] sm:$0xff] }
  0x1a   : > { %1095 = vmatmul.mubr.msk.f32.gmra.mrb[4].mxu0 %vm246_vm0, %v179_v11  ;;  %v189_v31 = vld [vmem:[%s1241_s20 + $0x78] sm:$0xff]  ;;  %v190_v33 = vld [vmem:[%s1241_s20 + $0x80] sm:$0xff]  ;;  %v191_v35 = vld [vmem:[%s1241_s20 + $0x88] sm:$0xff] }
  0x1b   : > { %1143 = vmatmul.mubr.msk.f32.gmra.mrb[4].mxu1 %vm246_vm0, %v211_v12  ;;  %1097 = vmatprep.mubr.msk.f32.mxu0 %vm246_vm0, %v180_v13  ;;  %v221_v32 = vld [vmem:[%s1241_s20 + $0x178] sm:$0xff]  ;;  %v222_v34 = vld [vmem:[%s1241_s20 + $0x180] sm:$0xff]  ;;  %v223_v36 = vld [vmem:[%s1241_s20 + $0x188] sm:$0xff] }
  0x1c   : > { %1145 = vmatprep.mubr.msk.f32.mxu1 %vm246_vm0, %v212_v14  ;;  %v192_v37 = vld [vmem:[%s1241_s20 + $0x90] sm:$0xff]  ;;  %v193_v39 = vld [vmem:[%s1241_s20 + $0x98] sm:$0xff]  ;;  %v194_v41 = vld [vmem:[%s1241_s20 + $0xa0] sm:$0xff] }
  0x1d   : > { %v224_v38 = vld [vmem:[%s1241_s20 + $0x190] sm:$0xff]  ;;  %v225_v40 = vld [vmem:[%s1241_s20 + $0x198] sm:$0xff]  ;;  %v226_v42 = vld [vmem:[%s1241_s20 + $0x1a0] sm:$0xff] }
  0x1e   : > { %1098 = vmatmul.mubr.msk.f32.gmra.mrb[6].mxu0 %vm246_vm0, %v181_v15  ;;  %v195_v43 = vld [vmem:[%s1241_s20 + $0xa8] sm:$0xff]  ;;  %v196_v45 = vld [vmem:[%s1241_s20 + $0xb0] sm:$0xff]  ;;  %v197_v47 = vld [vmem:[%s1241_s20 + $0xb8] sm:$0xff] }
  0x1f   : > { %1146 = vmatmul.mubr.msk.f32.gmra.mrb[6].mxu1 %vm246_vm0, %v213_v16  ;;  %1100 = vmatprep.mubr.msk.f32.mxu0 %vm246_vm0, %v182_v17  ;;  %v227_v44 = vld [vmem:[%s1241_s20 + $0x1a8] sm:$0xff]  ;;  %v228_v46 = vld [vmem:[%s1241_s20 + $0x1b0] sm:$0xff]  ;;  %v229_v48 = vld [vmem:[%s1241_s20 + $0x1b8] sm:$0xff] }
  0x20   : > { %1148 = vmatprep.mubr.msk.f32.mxu1 %vm246_vm0, %v214_v18  ;;  %v198_v49 = vld [vmem:[%s1241_s20 + $0xc0] sm:$0xff]  ;;  %v199_v51 = vld [vmem:[%s1241_s20 + $0xc8] sm:$0xff]  ;;  %v200_v53 = vld [vmem:[%s1241_s20 + $0xd0] sm:$0xff] }
  0x21   : > { %v230_v50 = vld [vmem:[%s1241_s20 + $0x1c0] sm:$0xff]  ;;  %v231_v52 = vld [vmem:[%s1241_s20 + $0x1c8] sm:$0xff]  ;;  %v232_v54 = vld [vmem:[%s1241_s20 + $0x1d0] sm:$0xff] }
  0x22   : > { %1101 = vmatmul.mubr.msk.f32.gmra.mrb[8].mxu0 %vm246_vm0, %v183_v19  ;;  %v201_v55 = vld [vmem:[%s1241_s20 + $0xd8] sm:$0xff]  ;;  %v202_v57 = vld [vmem:[%s1241_s20 + $0xe0] sm:$0xff]  ;;  %v203_v59 = vld [vmem:[%s1241_s20 + $0xe8] sm:$0xff] }
  0x23   : > { %1149 = vmatmul.mubr.msk.f32.gmra.mrb[8].mxu1 %vm246_vm0, %v215_v20  ;;  %1103 = vmatprep.mubr.msk.f32.mxu0 %vm246_vm0, %v184_v21  ;;  %v233_v56 = vld [vmem:[%s1241_s20 + $0x1d8] sm:$0xff]  ;;  %v234_v58 = vld [vmem:[%s1241_s20 + $0x1e0] sm:$0xff]  ;;  %v235_v60 = vld [vmem:[%s1241_s20 + $0x1e8] sm:$0xff] }
  0x24   : > { %1151 = vmatprep.mubr.msk.f32.mxu1 %vm246_vm0, %v216_v22  ;;  %v204_v61 = vld [vmem:[%s1241_s20 + $0xf0] sm:$0xff]  ;;  %v205_v63 = vld [vmem:[%s1241_s20 + $0xf8] sm:$0xff]  ;;  %v1374_v1 = vld [vmem:[%s1580_s2] ss:$0 sm:$0xff] }
  0x25   : > { %v236_v62 = vld [vmem:[%s1241_s20 + $0x1f0] sm:$0xff]  ;;  %v237_v0 = vld [vmem:[%s1241_s20 + $0x1f8] sm:$0xff] }
  0x26   : > { %1104 = vmatmul.mubr.msk.f32.gmra.mrb[10].mxu0 %vm246_vm0, %v185_v23 }
  0x27   : > { %1152 = vmatmul.mubr.msk.f32.gmra.mrb[10].mxu1 %vm246_vm0, %v217_v24  ;;  %1106 = vmatprep.mubr.msk.f32.mxu0 %vm246_vm0, %v186_v25 }
  0x28   : > { %1154 = vmatprep.mubr.msk.f32.mxu1 %vm246_vm0, %v218_v26 }
  0x2a   : > { %1107 = vmatmul.mubr.msk.f32.gmra.mrb[12].mxu0 %vm246_vm0, %v187_v27 }
  0x2b   : > { %1155 = vmatmul.mubr.msk.f32.gmra.mrb[12].mxu1 %vm246_vm0, %v219_v28  ;;  %1109 = vmatprep.mubr.msk.f32.mxu0 %vm246_vm0, %v188_v29 }
  0x2c   : > { %1157 = vmatprep.mubr.msk.f32.mxu1 %vm246_vm0, %v220_v30 }
  0x2e   : > { %1110 = vmatmul.mubr.msk.f32.gmra.mrb[14].mxu0 %vm246_vm0, %v189_v31 }
  0x2f   : > { %1158 = vmatmul.mubr.msk.f32.gmra.mrb[14].mxu1 %vm246_vm0, %v221_v32  ;;  %1112 = vmatprep.mubr.msk.f32.mxu0 %vm246_vm0, %v190_v33 }
  0x30   : > { %1160 = vmatprep.mubr.msk.f32.mxu1 %vm246_vm0, %v222_v34 }
  0x32   : > { %1113 = vmatmul.mubr.msk.f32.gmra.mrb[16].mxu0 %vm246_vm0, %v191_v35 }
  0x33   : > { %1161 = vmatmul.mubr.msk.f32.gmra.mrb[16].mxu1 %vm246_vm0, %v223_v36  ;;  %1115 = vmatprep.mubr.msk.f32.mxu0 %vm246_vm0, %v192_v37 }
  0x34   : > { %1163 = vmatprep.mubr.msk.f32.mxu1 %vm246_vm0, %v224_v38 }
  0x36   : > { %1116 = vmatmul.mubr.msk.f32.gmra.mrb[18].mxu0 %vm246_vm0, %v193_v39 }
  0x37   : > { %1164 = vmatmul.mubr.msk.f32.gmra.mrb[18].mxu1 %vm246_vm0, %v225_v40  ;;  %1118 = vmatprep.mubr.msk.f32.mxu0 %vm246_vm0, %v194_v41 }
  0x38   : > { %1166 = vmatprep.mubr.msk.f32.mxu1 %vm246_vm0, %v226_v42 }
  0x3a   : > { %1119 = vmatmul.mubr.msk.f32.gmra.mrb[20].mxu0 %vm246_vm0, %v195_v43 }
  0x3b   : > { %1167 = vmatmul.mubr.msk.f32.gmra.mrb[20].mxu1 %vm246_vm0, %v227_v44  ;;  %1121 = vmatprep.mubr.msk.f32.mxu0 %vm246_vm0, %v196_v45 }
  0x3c   : > { %1169 = vmatprep.mubr.msk.f32.mxu1 %vm246_vm0, %v228_v46 }
  0x3e   : > { %1122 = vmatmul.mubr.msk.f32.gmra.mrb[22].mxu0 %vm246_vm0, %v197_v47 }
  0x3f   : > { %1170 = vmatmul.mubr.msk.f32.gmra.mrb[22].mxu1 %vm246_vm0, %v229_v48  ;;  %1124 = vmatprep.mubr.msk.f32.mxu0 %vm246_vm0, %v198_v49 }
  0x40   : > { %1172 = vmatprep.mubr.msk.f32.mxu1 %vm246_vm0, %v230_v50 }
  0x42   : > { %1125 = vmatmul.mubr.msk.f32.gmra.mrb[24].mxu0 %vm246_vm0, %v199_v51 }
  0x43   : > { %1173 = vmatmul.mubr.msk.f32.gmra.mrb[24].mxu1 %vm246_vm0, %v231_v52  ;;  %1127 = vmatprep.mubr.msk.f32.mxu0 %vm246_vm0, %v200_v53 }
  0x44   : > { %1175 = vmatprep.mubr.msk.f32.mxu1 %vm246_vm0, %v232_v54 }
  0x46   : > { %1128 = vmatmul.mubr.msk.f32.gmra.mrb[26].mxu0 %vm246_vm0, %v201_v55 }
  0x47   : > { %1176 = vmatmul.mubr.msk.f32.gmra.mrb[26].mxu1 %vm246_vm0, %v233_v56  ;;  %1130 = vmatprep.mubr.msk.f32.mxu0 %vm246_vm0, %v202_v57 }
  0x48   : > { %1178 = vmatprep.mubr.msk.f32.mxu1 %vm246_vm0, %v234_v58 }
  0x4a   : > { %1131 = vmatmul.mubr.msk.f32.gmra.mrb[28].mxu0 %vm246_vm0, %v203_v59 }
  0x4b   : > { %1179 = vmatmul.mubr.msk.f32.gmra.mrb[28].mxu1 %vm246_vm0, %v235_v60  ;;  %1133 = vmatprep.mubr.msk.f32.mxu0 %vm246_vm0, %v204_v61 }
  0x4c   : > { %1181 = vmatprep.mubr.msk.f32.mxu1 %vm246_vm0, %v236_v62 }
  0x4e   : > { %1134 = vmatmul.mubr.msk.f32.gmra.mrb[30].mxu0 %vm246_vm0, %v205_v63 }
  0x4f   : > { %1182 = vmatmul.mubr.msk.f32.gmra.mrb[30].mxu1 %vm246_vm0, %v237_v0 }
  0xe5   : > { %v1090_v2 = vpop.f32.mrb[0].mxu0 }
  0xe6   : > { %v1138_v3 = vpop.f32.mrb[0].mxu1  ;;  %v511_v4 = vadd.f32 %v1090_v2, %v1374_v1  ;;  %v505_v6 = vpop.f32.mrb[1].mxu0 }
  0xe7   : > { %v671_v5 = vadd.f32 %v1138_v3, %v1374_v1  ;;  %v665_v7 = vpop.f32.mrb[1].mxu1  ;;  %v506_v8 = vadd.f32 %v1374_v1, %v505_v6 }
  0xe8   : > { %v666_v9 = vadd.f32 %v1374_v1, %v665_v7  ;;  %826 = vst.msk [vmem:[%s1381_s25 + $0x8] sm:$0xff] %vm824_vm1, %v511_v4 }
  0xe9   : > { %858 = vst.msk [vmem:[%s1381_s25 + $0x108] sm:$0xff] %vm824_vm1, %v671_v5  ;;  %825 = vst.msk [vmem:[%s1381_s25] sm:$0xff] %vm824_vm1, %v506_v8  ;;  %v1093_v10 = vpop.f32.mrb[2].mxu0 }
  0xea   : > { %857 = vst.msk [vmem:[%s1381_s25 + $0x100] sm:$0xff] %vm824_vm1, %v666_v9  ;;  %v1141_v11 = vpop.f32.mrb[2].mxu1  ;;  %v521_v12 = vadd.f32 %v1093_v10, %v1374_v1  ;;  %v515_v14 = vpop.f32.mrb[3].mxu0 }
  0xeb   : > { %v681_v13 = vadd.f32 %v1141_v11, %v1374_v1  ;;  %v675_v15 = vpop.f32.mrb[3].mxu1  ;;  %v516_v16 = vadd.f32 %v1374_v1, %v515_v14 }
  0xec   : > { %v676_v17 = vadd.f32 %v1374_v1, %v675_v15  ;;  %828 = vst.msk [vmem:[%s1381_s25 + $0x18] sm:$0xff] %vm824_vm1, %v521_v12 }
  0xed   : > { %860 = vst.msk [vmem:[%s1381_s25 + $0x118] sm:$0xff] %vm824_vm1, %v681_v13  ;;  %827 = vst.msk [vmem:[%s1381_s25 + $0x10] sm:$0xff] %vm824_vm1, %v516_v16  ;;  %v1096_v18 = vpop.f32.mrb[4].mxu0 }
  0xee   : > { %859 = vst.msk [vmem:[%s1381_s25 + $0x110] sm:$0xff] %vm824_vm1, %v676_v17  ;;  %v1144_v19 = vpop.f32.mrb[4].mxu1  ;;  %v531_v20 = vadd.f32 %v1096_v18, %v1374_v1  ;;  %v525_v22 = vpop.f32.mrb[5].mxu0 }
  0xef   : > { %v691_v21 = vadd.f32 %v1144_v19, %v1374_v1  ;;  %v685_v23 = vpop.f32.mrb[5].mxu1  ;;  %v526_v24 = vadd.f32 %v1374_v1, %v525_v22 }
  0xf0   : > { %v686_v25 = vadd.f32 %v1374_v1, %v685_v23  ;;  %830 = vst.msk [vmem:[%s1381_s25 + $0x28] sm:$0xff] %vm824_vm1, %v531_v20 }
  0xf1   : > { %862 = vst.msk [vmem:[%s1381_s25 + $0x128] sm:$0xff] %vm824_vm1, %v691_v21  ;;  %829 = vst.msk [vmem:[%s1381_s25 + $0x20] sm:$0xff] %vm824_vm1, %v526_v24  ;;  %v1099_v26 = vpop.f32.mrb[6].mxu0 }
  0xf2   : > { %861 = vst.msk [vmem:[%s1381_s25 + $0x120] sm:$0xff] %vm824_vm1, %v686_v25  ;;  %v1147_v27 = vpop.f32.mrb[6].mxu1  ;;  %v541_v28 = vadd.f32 %v1099_v26, %v1374_v1  ;;  %v535_v30 = vpop.f32.mrb[7].mxu0 }
  0xf3   : > { %v701_v29 = vadd.f32 %v1147_v27, %v1374_v1  ;;  %v695_v31 = vpop.f32.mrb[7].mxu1  ;;  %v536_v32 = vadd.f32 %v1374_v1, %v535_v30 }
  0xf4   : > { %v696_v33 = vadd.f32 %v1374_v1, %v695_v31  ;;  %832 = vst.msk [vmem:[%s1381_s25 + $0x38] sm:$0xff] %vm824_vm1, %v541_v28 }
  0xf5   : > { %864 = vst.msk [vmem:[%s1381_s25 + $0x138] sm:$0xff] %vm824_vm1, %v701_v29  ;;  %831 = vst.msk [vmem:[%s1381_s25 + $0x30] sm:$0xff] %vm824_vm1, %v536_v32  ;;  %v1102_v34 = vpop.f32.mrb[8].mxu0 }
  0xf6   : > { %863 = vst.msk [vmem:[%s1381_s25 + $0x130] sm:$0xff] %vm824_vm1, %v696_v33  ;;  %v1150_v35 = vpop.f32.mrb[8].mxu1  ;;  %v551_v36 = vadd.f32 %v1102_v34, %v1374_v1  ;;  %v545_v38 = vpop.f32.mrb[9].mxu0 }
  0xf7   : > { %v711_v37 = vadd.f32 %v1150_v35, %v1374_v1  ;;  %v705_v39 = vpop.f32.mrb[9].mxu1  ;;  %v546_v40 = vadd.f32 %v1374_v1, %v545_v38 }
  0xf8   : > { %v706_v41 = vadd.f32 %v1374_v1, %v705_v39  ;;  %834 = vst.msk [vmem:[%s1381_s25 + $0x48] sm:$0xff] %vm824_vm1, %v551_v36 }
  0xf9   : > { %866 = vst.msk [vmem:[%s1381_s25 + $0x148] sm:$0xff] %vm824_vm1, %v711_v37  ;;  %833 = vst.msk [vmem:[%s1381_s25 + $0x40] sm:$0xff] %vm824_vm1, %v546_v40  ;;  %v1105_v42 = vpop.f32.mrb[10].mxu0 }
  0xfa   : > { %865 = vst.msk [vmem:[%s1381_s25 + $0x140] sm:$0xff] %vm824_vm1, %v706_v41  ;;  %v1153_v43 = vpop.f32.mrb[10].mxu1  ;;  %v561_v44 = vadd.f32 %v1105_v42, %v1374_v1  ;;  %v555_v46 = vpop.f32.mrb[11].mxu0 }
  0xfb   : > { %v721_v45 = vadd.f32 %v1153_v43, %v1374_v1  ;;  %v715_v47 = vpop.f32.mrb[11].mxu1  ;;  %v556_v48 = vadd.f32 %v1374_v1, %v555_v46 }
  0xfc   : > { %v716_v49 = vadd.f32 %v1374_v1, %v715_v47  ;;  %836 = vst.msk [vmem:[%s1381_s25 + $0x58] sm:$0xff] %vm824_vm1, %v561_v44 }
  0xfd   : > { %868 = vst.msk [vmem:[%s1381_s25 + $0x158] sm:$0xff] %vm824_vm1, %v721_v45  ;;  %835 = vst.msk [vmem:[%s1381_s25 + $0x50] sm:$0xff] %vm824_vm1, %v556_v48  ;;  %v1108_v50 = vpop.f32.mrb[12].mxu0 }
  0xfe   : > { %867 = vst.msk [vmem:[%s1381_s25 + $0x150] sm:$0xff] %vm824_vm1, %v716_v49  ;;  %v1156_v51 = vpop.f32.mrb[12].mxu1  ;;  %v571_v52 = vadd.f32 %v1108_v50, %v1374_v1  ;;  %v565_v54 = vpop.f32.mrb[13].mxu0 }
  0xff   : > { %v731_v53 = vadd.f32 %v1156_v51, %v1374_v1  ;;  %v725_v55 = vpop.f32.mrb[13].mxu1  ;;  %v566_v56 = vadd.f32 %v1374_v1, %v565_v54 }
 0x100   : > { %v726_v57 = vadd.f32 %v1374_v1, %v725_v55  ;;  %838 = vst.msk [vmem:[%s1381_s25 + $0x68] sm:$0xff] %vm824_vm1, %v571_v52 }
 0x101   : > { %870 = vst.msk [vmem:[%s1381_s25 + $0x168] sm:$0xff] %vm824_vm1, %v731_v53  ;;  %837 = vst.msk [vmem:[%s1381_s25 + $0x60] sm:$0xff] %vm824_vm1, %v566_v56  ;;  %v1111_v58 = vpop.f32.mrb[14].mxu0 }
 0x102   : > { %869 = vst.msk [vmem:[%s1381_s25 + $0x160] sm:$0xff] %vm824_vm1, %v726_v57  ;;  %v1159_v59 = vpop.f32.mrb[14].mxu1  ;;  %v581_v60 = vadd.f32 %v1111_v58, %v1374_v1  ;;  %v575_v62 = vpop.f32.mrb[15].mxu0 }
 0x103   : > { %v741_v61 = vadd.f32 %v1159_v59, %v1374_v1  ;;  %v735_v63 = vpop.f32.mrb[15].mxu1  ;;  %v576_v0 = vadd.f32 %v1374_v1, %v575_v62 }
 0x104   : > { %v736_v2 = vadd.f32 %v1374_v1, %v735_v63  ;;  %840 = vst.msk [vmem:[%s1381_s25 + $0x78] sm:$0xff] %vm824_vm1, %v581_v60 }
 0x105   : > { %872 = vst.msk [vmem:[%s1381_s25 + $0x178] sm:$0xff] %vm824_vm1, %v741_v61  ;;  %839 = vst.msk [vmem:[%s1381_s25 + $0x70] sm:$0xff] %vm824_vm1, %v576_v0  ;;  %v1114_v3 = vpop.f32.mrb[16].mxu0 }
 0x106   : > { %871 = vst.msk [vmem:[%s1381_s25 + $0x170] sm:$0xff] %vm824_vm1, %v736_v2  ;;  %v1162_v4 = vpop.f32.mrb[16].mxu1  ;;  %v591_v5 = vadd.f32 %v1114_v3, %v1374_v1  ;;  %v585_v7 = vpop.f32.mrb[17].mxu0 }
 0x107   : > { %v751_v6 = vadd.f32 %v1162_v4, %v1374_v1  ;;  %v745_v8 = vpop.f32.mrb[17].mxu1  ;;  %v586_v9 = vadd.f32 %v1374_v1, %v585_v7 }
 0x108   : > { %v746_v10 = vadd.f32 %v1374_v1, %v745_v8  ;;  %842 = vst.msk [vmem:[%s1381_s25 + $0x88] sm:$0xff] %vm824_vm1, %v591_v5 }
 0x109   : > { %874 = vst.msk [vmem:[%s1381_s25 + $0x188] sm:$0xff] %vm824_vm1, %v751_v6  ;;  %841 = vst.msk [vmem:[%s1381_s25 + $0x80] sm:$0xff] %vm824_vm1, %v586_v9  ;;  %v1117_v11 = vpop.f32.mrb[18].mxu0 }
 0x10a   : > { %873 = vst.msk [vmem:[%s1381_s25 + $0x180] sm:$0xff] %vm824_vm1, %v746_v10  ;;  %v1165_v12 = vpop.f32.mrb[18].mxu1  ;;  %v601_v13 = vadd.f32 %v1117_v11, %v1374_v1  ;;  %v595_v15 = vpop.f32.mrb[19].mxu0 }
 0x10b   : > { %v761_v14 = vadd.f32 %v1165_v12, %v1374_v1  ;;  %v755_v16 = vpop.f32.mrb[19].mxu1  ;;  %v596_v17 = vadd.f32 %v1374_v1, %v595_v15 }
 0x10c   : > { %v756_v18 = vadd.f32 %v1374_v1, %v755_v16  ;;  %844 = vst.msk [vmem:[%s1381_s25 + $0x98] sm:$0xff] %vm824_vm1, %v601_v13 }
 0x10d   : > { %876 = vst.msk [vmem:[%s1381_s25 + $0x198] sm:$0xff] %vm824_vm1, %v761_v14  ;;  %843 = vst.msk [vmem:[%s1381_s25 + $0x90] sm:$0xff] %vm824_vm1, %v596_v17  ;;  %v1120_v19 = vpop.f32.mrb[20].mxu0 }
 0x10e   : > { %875 = vst.msk [vmem:[%s1381_s25 + $0x190] sm:$0xff] %vm824_vm1, %v756_v18  ;;  %v1168_v20 = vpop.f32.mrb[20].mxu1  ;;  %v611_v21 = vadd.f32 %v1120_v19, %v1374_v1  ;;  %v605_v23 = vpop.f32.mrb[21].mxu0 }
 0x10f   : > { %v771_v22 = vadd.f32 %v1168_v20, %v1374_v1  ;;  %v765_v24 = vpop.f32.mrb[21].mxu1  ;;  %v606_v25 = vadd.f32 %v1374_v1, %v605_v23 }
 0x110   : > { %v766_v26 = vadd.f32 %v1374_v1, %v765_v24  ;;  %846 = vst.msk [vmem:[%s1381_s25 + $0xa8] sm:$0xff] %vm824_vm1, %v611_v21 }
 0x111   : > { %878 = vst.msk [vmem:[%s1381_s25 + $0x1a8] sm:$0xff] %vm824_vm1, %v771_v22  ;;  %845 = vst.msk [vmem:[%s1381_s25 + $0xa0] sm:$0xff] %vm824_vm1, %v606_v25  ;;  %v1123_v27 = vpop.f32.mrb[22].mxu0 }
 0x112   : > { %877 = vst.msk [vmem:[%s1381_s25 + $0x1a0] sm:$0xff] %vm824_vm1, %v766_v26  ;;  %v1171_v28 = vpop.f32.mrb[22].mxu1  ;;  %v621_v29 = vadd.f32 %v1123_v27, %v1374_v1  ;;  %v615_v31 = vpop.f32.mrb[23].mxu0 }
 0x113   : > { %v781_v30 = vadd.f32 %v1171_v28, %v1374_v1  ;;  %v775_v32 = vpop.f32.mrb[23].mxu1  ;;  %v616_v33 = vadd.f32 %v1374_v1, %v615_v31 }
 0x114   : > { %v776_v34 = vadd.f32 %v1374_v1, %v775_v32  ;;  %848 = vst.msk [vmem:[%s1381_s25 + $0xb8] sm:$0xff] %vm824_vm1, %v621_v29 }
 0x115   : > { %880 = vst.msk [vmem:[%s1381_s25 + $0x1b8] sm:$0xff] %vm824_vm1, %v781_v30  ;;  %847 = vst.msk [vmem:[%s1381_s25 + $0xb0] sm:$0xff] %vm824_vm1, %v616_v33  ;;  %v1126_v35 = vpop.f32.mrb[24].mxu0 }
 0x116   : > { %879 = vst.msk [vmem:[%s1381_s25 + $0x1b0] sm:$0xff] %vm824_vm1, %v776_v34  ;;  %v1174_v36 = vpop.f32.mrb[24].mxu1  ;;  %v631_v37 = vadd.f32 %v1126_v35, %v1374_v1  ;;  %v625_v39 = vpop.f32.mrb[25].mxu0 }
 0x117   : > { %v791_v38 = vadd.f32 %v1174_v36, %v1374_v1  ;;  %v785_v40 = vpop.f32.mrb[25].mxu1  ;;  %v626_v41 = vadd.f32 %v1374_v1, %v625_v39 }
 0x118   : > { %v786_v42 = vadd.f32 %v1374_v1, %v785_v40  ;;  %850 = vst.msk [vmem:[%s1381_s25 + $0xc8] sm:$0xff] %vm824_vm1, %v631_v37 }
 0x119   : > { %882 = vst.msk [vmem:[%s1381_s25 + $0x1c8] sm:$0xff] %vm824_vm1, %v791_v38  ;;  %849 = vst.msk [vmem:[%s1381_s25 + $0xc0] sm:$0xff] %vm824_vm1, %v626_v41  ;;  %v1129_v43 = vpop.f32.mrb[26].mxu0 }
 0x11a   : > { %881 = vst.msk [vmem:[%s1381_s25 + $0x1c0] sm:$0xff] %vm824_vm1, %v786_v42  ;;  %v1177_v44 = vpop.f32.mrb[26].mxu1  ;;  %v641_v45 = vadd.f32 %v1129_v43, %v1374_v1  ;;  %v635_v47 = vpop.f32.mrb[27].mxu0 }
 0x11b   : > { %v801_v46 = vadd.f32 %v1177_v44, %v1374_v1  ;;  %v795_v48 = vpop.f32.mrb[27].mxu1  ;;  %v636_v49 = vadd.f32 %v1374_v1, %v635_v47 }
 0x11c   : > { %v796_v50 = vadd.f32 %v1374_v1, %v795_v48  ;;  %852 = vst.msk [vmem:[%s1381_s25 + $0xd8] sm:$0xff] %vm824_vm1, %v641_v45 }
 0x11d   : > { %884 = vst.msk [vmem:[%s1381_s25 + $0x1d8] sm:$0xff] %vm824_vm1, %v801_v46  ;;  %851 = vst.msk [vmem:[%s1381_s25 + $0xd0] sm:$0xff] %vm824_vm1, %v636_v49  ;;  %v1132_v51 = vpop.f32.mrb[28].mxu0 }
 0x11e   : > { %883 = vst.msk [vmem:[%s1381_s25 + $0x1d0] sm:$0xff] %vm824_vm1, %v796_v50  ;;  %v1180_v52 = vpop.f32.mrb[28].mxu1  ;;  %v651_v53 = vadd.f32 %v1132_v51, %v1374_v1  ;;  %v645_v55 = vpop.f32.mrb[29].mxu0 }
 0x11f   : > { %v811_v54 = vadd.f32 %v1180_v52, %v1374_v1  ;;  %v805_v56 = vpop.f32.mrb[29].mxu1  ;;  %v646_v57 = vadd.f32 %v1374_v1, %v645_v55 }
 0x120   : > { %v806_v58 = vadd.f32 %v1374_v1, %v805_v56  ;;  %854 = vst.msk [vmem:[%s1381_s25 + $0xe8] sm:$0xff] %vm824_vm1, %v651_v53 }
 0x121   : > { %886 = vst.msk [vmem:[%s1381_s25 + $0x1e8] sm:$0xff] %vm824_vm1, %v811_v54  ;;  %853 = vst.msk [vmem:[%s1381_s25 + $0xe0] sm:$0xff] %vm824_vm1, %v646_v57  ;;  %v1135_v59 = vpop.f32.mrb[30].mxu0 }
 0x122   : > { %885 = vst.msk [vmem:[%s1381_s25 + $0x1e0] sm:$0xff] %vm824_vm1, %v806_v58  ;;  %v1183_v60 = vpop.f32.mrb[30].mxu1  ;;  %v661_v61 = vadd.f32 %v1135_v59, %v1374_v1  ;;  %v655_v63 = vpop.f32.mrb[31].mxu0 }
 0x123   : > { %v821_v62 = vadd.f32 %v1183_v60, %v1374_v1  ;;  %v815_v0 = vpop.f32.mrb[31].mxu1  ;;  %v656_v2 = vadd.f32 %v1374_v1, %v655_v63 }
 0x124   : > { %v816_v3 = vadd.f32 %v1374_v1, %v815_v0  ;;  %856 = vst.msk [vmem:[%s1381_s25 + $0xf8] sm:$0xff] %vm824_vm1, %v661_v61 }
 0x125   : > { %888 = vst.msk [vmem:[%s1381_s25 + $0x1f8] sm:$0xff] %vm824_vm1, %v821_v62  ;;  %855 = vst.msk [vmem:[%s1381_s25 + $0xf0] sm:$0xff] %vm824_vm1, %v656_v2 }
 0x126   : > { %887 = vst.msk [vmem:[%s1381_s25 + $0x1f0] sm:$0xff] %vm824_vm1, %v816_v3 }
 0x127 PF: > { %s13_s12 = sadd.s32 1, %s1200_s12  }
 0x128   : > { %p10_p4 = scmp.ge.s32.totalorder %s13_s12, 4  }
 0x12a   :  { %12 = sbr.rel (!%p10_p4) target bundleno = 1 (0x1), region = 62 }

// kernel: up_forward.6
= control target key start
LH: loop header
LB: loop body
LE: loop exit
PB: predicated region body
PF: predicated region fallthrough
CT: control target
= control target key end

     0   :  { %s1592_s12 = smov 0   ;;  %s2372_s0 = inlined_call_operand.vmem [shape: f32[8192,216], index: 0, kind: input, shape index: {}]   ;;  %s2373_s1 = inlined_call_operand.vmem [shape: f32[216,4], index: 1, kind: input, shape index: {}]   ;;  %s2374_s2 = inlined_call_operand.vmem [shape: f32[8192,4], index: 2, kind: output, shape index: {0}]   ;;  %s2375_s3 = inlined_call_operand.vmem [shape: f32[16,2,4], index: 3, kind: output, shape index: {1}]  }
   0x1 LB: > { %s1598_s13 = sadd.s32 4294967295, %s1568_s12   ;;  %p1411_p0 = scmp.ge.s32.totalorder %s1568_s12, 1  ;;  %s1568_s12 = sphi %s1592_s12, %s14_s12  }
   0x2   : > { %p142_p1 = scmp.lt.s32.totalorder %s1568_s12, 17 }
   0x4   : > { %p143_p2 = pnand %p1411_p0, %p142_p1 }
   0x5   : > { %v316_v0 = vld [vmem:[%s2373_s1] sm:$0xff] (!%p143_p2)  ;;  %v317_v1 = vld [vmem:[%s2373_s1 + $0x8] sm:$0xff] (!%p143_p2)  ;;  %v318_v2 = vld [vmem:[%s2373_s1 + $0x10] sm:$0xff] (!%p143_p2)  ;;  %s1412_s20 = sshll.u32 (!%p143_p2), %s1598_s13, 6  ;;  %v1570_v3 = vmov (!%p143_p2), 0.0|0.0   ;;  %vm343_vm0 = vcmask (!%p143_p2), 719872  }
   0x6   : > { %146 = sbr.rel (%p143_p2) target bundleno = 480 (0x1e0), region = 28  ;;  %1485 = vmatprep.subr.bf16.mxu0 (!%p143_p2), %v1570_v3  ;;  %v1486_v4 = vpack.c.bf16 (!%p143_p2), %v317_v1, %v316_v0  ;;  %v319_v5 = vld [vmem:[%s2373_s1 + $0x18] sm:$0xff] (!%p143_p2)  ;;  %p172_p3 = scmp.lt.s32.totalorder (!%p143_p2), %s1412_s20, 1023  ;;  %1524 = vmatprep.subr.bf16.mxu1 (!%p143_p2), %v1570_v3  ;;  %v320_v7 = vld [vmem:[%s2373_s1 + $0x20] sm:$0xff] (!%p143_p2)  ;;  %v321_v8 = vld [vmem:[%s2373_s1 + $0x28] sm:$0xff] (!%p143_p2)  ;;  %v1571_v42 = vmov (!%p143_p2), 0.0  }
   0x7   : > { %v1489_v6 = vpack.c.bf16 (!%p143_p2), %v319_v5, %v318_v2  ;;  %v1492_v9 = vpack.c.bf16 (!%p143_p2), %v321_v8, %v320_v7  ;;  %v322_v10 = vld [vmem:[%s2373_s1 + $0x30] sm:$0xff] (!%p143_p2)  ;;  %v323_v11 = vld [vmem:[%s2373_s1 + $0x38] sm:$0xff] (!%p143_p2)  ;;  %v324_v14 = vld [vmem:[%s2373_s1 + $0x40] sm:$0xff] (!%p143_p2)  ;;  %vm921_vm1 = vcmask (!%p143_p2), 31744   ;;  %p184_p4 = scmp.lt.s32.totalorder (!%p143_p2), %s1598_s13, 15  ;;  %vm1316_vm2 = vcmask (!%p143_p2), 1040384  }
   0x8   : > { %1487 = vmatpush1.bf16.msra.mxu0 (!%p143_p2), %v1486_v4  ;;  %1538 = vmatpush1.bf16.msra.mxu1 (!%p143_p2), %v1486_v4  ;;  %v1495_v13 = vpack.c.bf16 (!%p143_p2), %v323_v11, %v322_v10  ;;  %v325_v15 = vld [vmem:[%s2373_s1 + $0x48] sm:$0xff] (!%p143_p2)  ;;  %v326_v17 = vld [vmem:[%s2373_s1 + $0x50] sm:$0xff] (!%p143_p2)  ;;  %v327_v18 = vld [vmem:[%s2373_s1 + $0x58] sm:$0xff] (!%p143_p2)  ;;  %vm1318_vm3 = vcmask (!%p143_p2), 25600  }
   0x9   : > { %1488 = vmatprep.subr.bf16.mxu0 (!%p143_p2), %v1570_v3  ;;  %1525 = vmatprep.subr.bf16.mxu1 (!%p143_p2), %v1570_v3  ;;  %v1498_v16 = vpack.c.bf16 (!%p143_p2), %v325_v15, %v324_v14  ;;  %v1501_v19 = vpack.c.bf16 (!%p143_p2), %v327_v18, %v326_v17  ;;  %v328_v21 = vld [vmem:[%s2373_s1 + $0x60] sm:$0xff] (!%p143_p2)  ;;  %v329_v22 = vld [vmem:[%s2373_s1 + $0x68] sm:$0xff] (!%p143_p2)  ;;  %v330_v24 = vld [vmem:[%s2373_s1 + $0x70] sm:$0xff] (!%p143_p2) }
   0xa   : > { %v1504_v23 = vpack.c.bf16 (!%p143_p2), %v329_v22, %v328_v21  ;;  %v331_v25 = vld [vmem:[%s2373_s1 + $0x78] sm:$0xff] (!%p143_p2)  ;;  %v332_v27 = vld [vmem:[%s2373_s1 + $0x80] sm:$0xff] (!%p143_p2)  ;;  %v333_v28 = vld [vmem:[%s2373_s1 + $0x88] sm:$0xff] (!%p143_p2) }
   0xb   : > { %v1507_v26 = vpack.c.bf16 (!%p143_p2), %v331_v25, %v330_v24  ;;  %v1510_v29 = vpack.c.bf16 (!%p143_p2), %v333_v28, %v332_v27  ;;  %v334_v30 = vld [vmem:[%s2373_s1 + $0x90] sm:$0xff] (!%p143_p2)  ;;  %v335_v31 = vld [vmem:[%s2373_s1 + $0x98] sm:$0xff] (!%p143_p2)  ;;  %v336_v33 = vld [vmem:[%s2373_s1 + $0xa0] sm:$0xff] (!%p143_p2) }
   0xc   : > { %1490 = vmatpush1.bf16.msra.mxu0 (!%p143_p2), %v1489_v6  ;;  %1539 = vmatpush1.bf16.msra.mxu1 (!%p143_p2), %v1489_v6  ;;  %v1513_v32 = vpack.c.bf16 (!%p143_p2), %v335_v31, %v334_v30  ;;  %v337_v34 = vld [vmem:[%s2373_s1 + $0xa8] sm:$0xff] (!%p143_p2)  ;;  %v338_v36 = vld [vmem:[%s2373_s1 + $0xb0] sm:$0xff] (!%p143_p2)  ;;  %v339_v37 = vld [vmem:[%s2373_s1 + $0xb8] sm:$0xff] (!%p143_p2) }
   0xd   : > { %s2377_s20 = smov (!%p172_p3, %s1412_s20), 1023  ;;  %1491 = vmatprep.subr.bf16.mxu0 %v1570_v3  ;;  %1526 = vmatprep.subr.bf16.mxu1 %v1570_v3  ;;  %v1516_v35 = vpack.c.bf16 %v337_v34, %v336_v33  ;;  %v1519_v38 = vpack.c.bf16 %v339_v37, %v338_v36  ;;  %v340_v39 = vld [vmem:[%s2373_s1 + $0xc0] sm:$0xff]  ;;  %v341_v40 = vld [vmem:[%s2373_s1 + $0xc8] sm:$0xff]  ;;  %v342_v43 = vld [vmem:[%s2373_s1 + $0xd0] sm:$0xff]  ;;  %s2379_s13 = smov (!%p184_p4, %s1598_s13), 15 }
   0xe   : > { %s1484_s27 = sshll.u32 %s2377_s20, 4  ;;  %v1522_v41 = vpack.c.bf16 %v341_v40, %v340_v39  ;;  %s1416_s26 = sshll.u32 %s2377_s20, 3 }
   0xf   : > { %s1631_s30 = scalar_lea.vmem %s2372_s0, %s1484_s27  ;;  %s1914_s29 = scalar_lea.vmem %s2374_s2, %s1416_s26 }
  0x10   : > { %v189_v12 = vld [vmem:[%s1631_s30 + $0x8] sm:$0xff]  ;;  %1493 = vmatpush1.bf16.msra.mxu0 %v1492_v9  ;;  %1540 = vmatpush1.bf16.msra.mxu1 %v1492_v9  ;;  %v188_v44 = vld [vmem:[%s1631_s30] sm:$0xff]  ;;  %v191_v46 = vld [vmem:[%s1631_s30 + $0x18] sm:$0xff]  ;;  %s1417_s20 = sshll.u32 %s2379_s13, 1 }
  0x11   : > { %1418 = vmatprep.mubr.msk.f32.mxu0 %vm343_vm0, %v189_v12  ;;  %1494 = vmatprep.subr.bf16.mxu0 %v1570_v3  ;;  %v253_v20 = vld [vmem:[%s1631_s30 + $0x208] sm:$0xff]  ;;  %v252_v45 = vld [vmem:[%s1631_s30 + $0x200] sm:$0xff]  ;;  %v255_v47 = vld [vmem:[%s1631_s30 + $0x218] sm:$0xff]  ;;  %s187_s5 = scalar_lea.vmem %s2375_s3, %s1417_s20 }
  0x12   : > { %1527 = vmatprep.subr.bf16.mxu1 %v1570_v3  ;;  %1450 = vmatprep.mubr.msk.f32.mxu1 %vm343_vm0, %v253_v20  ;;  %v190_v48 = vld [vmem:[%s1631_s30 + $0x10] sm:$0xff]  ;;  %v193_v50 = vld [vmem:[%s1631_s30 + $0x28] sm:$0xff]  ;;  %v192_v52 = vld [vmem:[%s1631_s30 + $0x20] sm:$0xff] }
  0x13   : > { %v254_v49 = vld [vmem:[%s1631_s30 + $0x210] sm:$0xff]  ;;  %v257_v51 = vld [vmem:[%s1631_s30 + $0x228] sm:$0xff]  ;;  %v256_v53 = vld [vmem:[%s1631_s30 + $0x220] sm:$0xff] }
  0x14   : > { %1496 = vmatpush1.bf16.msra.mxu0 %v1495_v13  ;;  %1541 = vmatpush1.bf16.msra.mxu1 %v1495_v13  ;;  %v195_v54 = vld [vmem:[%s1631_s30 + $0x38] sm:$0xff]  ;;  %v194_v56 = vld [vmem:[%s1631_s30 + $0x30] sm:$0xff]  ;;  %v197_v58 = vld [vmem:[%s1631_s30 + $0x48] sm:$0xff] }
  0x15   : > { %1497 = vmatprep.subr.bf16.mxu0 %v1570_v3  ;;  %1528 = vmatprep.subr.bf16.mxu1 %v1570_v3  ;;  %v259_v55 = vld [vmem:[%s1631_s30 + $0x238] sm:$0xff]  ;;  %v258_v57 = vld [vmem:[%s1631_s30 + $0x230] sm:$0xff]  ;;  %v261_v59 = vld [vmem:[%s1631_s30 + $0x248] sm:$0xff] }
  0x16   : > { %v196_v60 = vld [vmem:[%s1631_s30 + $0x40] sm:$0xff]  ;;  %v199_v62 = vld [vmem:[%s1631_s30 + $0x58] sm:$0xff]  ;;  %v198_v0 = vld [vmem:[%s1631_s30 + $0x50] sm:$0xff] }
  0x17   : > { %v260_v61 = vld [vmem:[%s1631_s30 + $0x240] sm:$0xff]  ;;  %v263_v63 = vld [vmem:[%s1631_s30 + $0x258] sm:$0xff]  ;;  %v262_v1 = vld [vmem:[%s1631_s30 + $0x250] sm:$0xff] }
  0x18   : > { %1499 = vmatpush1.bf16.msra.mxu0 %v1498_v16  ;;  %1542 = vmatpush1.bf16.msra.mxu1 %v1498_v16  ;;  %v201_v2 = vld [vmem:[%s1631_s30 + $0x68] sm:$0xff]  ;;  %v200_v4 = vld [vmem:[%s1631_s30 + $0x60] sm:$0xff]  ;;  %v203_v6 = vld [vmem:[%s1631_s30 + $0x78] sm:$0xff] }
  0x19   : > { %1500 = vmatprep.subr.bf16.mxu0 %v1570_v3  ;;  %1529 = vmatprep.subr.bf16.mxu1 %v1570_v3  ;;  %v264_v5 = vld [vmem:[%s1631_s30 + $0x260] sm:$0xff]  ;;  %v267_v7 = vld [vmem:[%s1631_s30 + $0x278] sm:$0xff]  ;;  %v202_v8 = vld [vmem:[%s1631_s30 + $0x70] sm:$0xff] }
  0x1a   : > { %v266_v9 = vld [vmem:[%s1631_s30 + $0x270] sm:$0xff]  ;;  %v205_v10 = vld [vmem:[%s1631_s30 + $0x88] sm:$0xff]  ;;  %v204_v12 = vld [vmem:[%s1631_s30 + $0x80] sm:$0xff] }
  0x1b   : > { %v269_v11 = vld [vmem:[%s1631_s30 + $0x288] sm:$0xff]  ;;  %v268_v13 = vld [vmem:[%s1631_s30 + $0x280] sm:$0xff]  ;;  %v207_v14 = vld [vmem:[%s1631_s30 + $0x98] sm:$0xff] }
  0x1c   : > { %1502 = vmatpush1.bf16.msra.mxu0 %v1501_v19  ;;  %1543 = vmatpush1.bf16.msra.mxu1 %v1501_v19  ;;  %v271_v15 = vld [vmem:[%s1631_s30 + $0x298] sm:$0xff]  ;;  %v206_v16 = vld [vmem:[%s1631_s30 + $0x90] sm:$0xff]  ;;  %v209_v18 = vld [vmem:[%s1631_s30 + $0xa8] sm:$0xff] }
  0x1d   : > { %1503 = vmatprep.subr.bf16.mxu0 %v1570_v3  ;;  %1530 = vmatprep.subr.bf16.mxu1 %v1570_v3  ;;  %v270_v17 = vld [vmem:[%s1631_s30 + $0x290] sm:$0xff]  ;;  %v273_v19 = vld [vmem:[%s1631_s30 + $0x2a8] sm:$0xff]  ;;  %v208_v20 = vld [vmem:[%s1631_s30 + $0xa0] sm:$0xff] }
  0x1e   : > { %v272_v21 = vld [vmem:[%s1631_s30 + $0x2a0] sm:$0xff]  ;;  %v211_v22 = vld [vmem:[%s1631_s30 + $0xb8] sm:$0xff]  ;;  %v210_v24 = vld [vmem:[%s1631_s30 + $0xb0] sm:$0xff] }
  0x1f   : > { %v274_v25 = vld [vmem:[%s1631_s30 + $0x2b0] sm:$0xff]  ;;  %v277_v27 = vld [vmem:[%s1631_s30 + $0x2c8] sm:$0xff]  ;;  %v212_v28 = vld [vmem:[%s1631_s30 + $0xc0] sm:$0xff] }
  0x20   : > { %1505 = vmatpush1.bf16.msra.mxu0 %v1504_v23  ;;  %1544 = vmatpush1.bf16.msra.mxu1 %v1504_v23  ;;  %v275_v23 = vld [vmem:[%s1631_s30 + $0x2b8] sm:$0xff]  ;;  %v278_v33 = vld [vmem:[%s1631_s30 + $0x2d0] sm:$0xff]  ;;  %v217_v34 = vld [vmem:[%s1631_s30 + $0xe8] sm:$0xff] }
  0x21   : > { %1506 = vmatprep.subr.bf16.mxu0 %v1570_v3  ;;  %1531 = vmatprep.subr.bf16.mxu1 %v1570_v3  ;;  %v215_v30 = vld [vmem:[%s1631_s30 + $0xd8] sm:$0xff]  ;;  %v216_v36 = vld [vmem:[%s1631_s30 + $0xe0] sm:$0xff]  ;;  %v218_v40 = vld [vmem:[%s1631_s30 + $0xf0] sm:$0xff] }
  0x22   : > { %v279_v31 = vld [vmem:[%s1631_s30 + $0x2d8] sm:$0xff]  ;;  %v280_v37 = vld [vmem:[%s1631_s30 + $0x2e0] sm:$0xff] }
  0x23   : > { %v283_v39 = vld [vmem:[%s1631_s30 + $0x2f8] sm:$0xff] }
  0x24   : > { %1508 = vmatpush1.bf16.msra.mxu0 %v1507_v26  ;;  %1545 = vmatpush1.bf16.msra.mxu1 %v1507_v26  ;;  %v213_v26 = vld [vmem:[%s1631_s30 + $0xc8] sm:$0xff] }
  0x25   : > { %1509 = vmatprep.subr.bf16.mxu0 %v1570_v3  ;;  %1532 = vmatprep.subr.bf16.mxu1 %v1570_v3 }
  0x28   : > { %1511 = vmatpush1.bf16.msra.mxu0 %v1510_v29  ;;  %1546 = vmatpush1.bf16.msra.mxu1 %v1510_v29  ;;  %v276_v29 = vld [vmem:[%s1631_s30 + $0x2c0] sm:$0xff] }
  0x29   : > { %1512 = vmatprep.subr.bf16.mxu0 %v1570_v3  ;;  %1533 = vmatprep.subr.bf16.mxu1 %v1570_v3 }
  0x2c   : > { %1514 = vmatpush1.bf16.msra.mxu0 %v1513_v32  ;;  %1547 = vmatpush1.bf16.msra.mxu1 %v1513_v32  ;;  %v214_v32 = vld [vmem:[%s1631_s30 + $0xd0] sm:$0xff] }
  0x2d   : > { %1515 = vmatprep.subr.bf16.mxu0 %v1570_v3  ;;  %1534 = vmatprep.subr.bf16.mxu1 %v1570_v3 }
  0x30   : > { %1517 = vmatpush1.bf16.msra.mxu0 %v1516_v35  ;;  %1548 = vmatpush1.bf16.msra.mxu1 %v1516_v35  ;;  %v281_v35 = vld [vmem:[%s1631_s30 + $0x2e8] sm:$0xff] }
  0x31   : > { %1518 = vmatprep.subr.bf16.mxu0 %v1570_v3  ;;  %1535 = vmatprep.subr.bf16.mxu1 %v1570_v3 }
  0x34   : > { %1520 = vmatpush1.bf16.msra.mxu0 %v1519_v38  ;;  %1549 = vmatpush1.bf16.msra.mxu1 %v1519_v38  ;;  %v219_v38 = vld [vmem:[%s1631_s30 + $0xf8] sm:$0xff] }
  0x35   : > { %1521 = vmatprep.subr.bf16.mxu0 %v1570_v3  ;;  %1536 = vmatprep.subr.bf16.mxu1 %v1570_v3  ;;  %v265_v3 = vld [vmem:[%s1631_s30 + $0x268] sm:$0xff] }
  0x38   : > { %1523 = vmatpush1.bf16.msra.mxu0 %v1522_v41  ;;  %1550 = vmatpush1.bf16.msra.mxu1 %v1522_v41  ;;  %v282_v41 = vld [vmem:[%s1631_s30 + $0x2f0] sm:$0xff] }
  0x39   : > { %588 = vmatprep.subr.mxu0 %v1571_v42  ;;  %1537 = vmatprep.subr.mxu1 %v1571_v42  ;;  %v221_v42 = vld [vmem:[%s1631_s30 + $0x108] sm:$0xff] }
  0x3c   : > { %589 = vmatpush1.msra.mxu0 %v342_v43  ;;  %1551 = vmatpush1.msra.mxu1 %v342_v43  ;;  %v285_v43 = vld [vmem:[%s1631_s30 + $0x308] sm:$0xff] }
  0x3d   : > { %601 = vmatmul.mubr.f32.vlgmr.msra.gmra.mrb[0].mxu0 %v188_v44  ;;  %761 = vmatmul.mubr.f32.vlgmr.msra.gmra.mrb[0].mxu1 %v252_v45  ;;  %v220_v44 = vld [vmem:[%s1631_s30 + $0x100] sm:$0xff] }
  0x3e   : > { %1419 = vmatprep.mubr.msk.f32.mxu0 %vm343_vm0, %v191_v46  ;;  %1451 = vmatprep.mubr.msk.f32.mxu1 %vm343_vm0, %v255_v47  ;;  %v284_v45 = vld [vmem:[%s1631_s30 + $0x300] sm:$0xff]  ;;  %v223_v46 = vld [vmem:[%s1631_s30 + $0x118] sm:$0xff] }
  0x3f   : > { %v287_v47 = vld [vmem:[%s1631_s30 + $0x318] sm:$0xff] }
  0x41   : > { %606 = vmatmul.mubr.f32.gmra.mrb[2].mxu0 %v190_v48  ;;  %766 = vmatmul.mubr.f32.gmra.mrb[2].mxu1 %v254_v49  ;;  %v222_v48 = vld [vmem:[%s1631_s30 + $0x110] sm:$0xff] }
  0x42   : > { %1420 = vmatprep.mubr.msk.f32.mxu0 %vm343_vm0, %v193_v50  ;;  %1452 = vmatprep.mubr.msk.f32.mxu1 %vm343_vm0, %v257_v51  ;;  %v286_v49 = vld [vmem:[%s1631_s30 + $0x310] sm:$0xff]  ;;  %v225_v50 = vld [vmem:[%s1631_s30 + $0x128] sm:$0xff] }
  0x43   : > { %v289_v51 = vld [vmem:[%s1631_s30 + $0x328] sm:$0xff] }
  0x45   : > { %611 = vmatmul.mubr.f32.gmra.mrb[4].mxu0 %v192_v52  ;;  %771 = vmatmul.mubr.f32.gmra.mrb[4].mxu1 %v256_v53  ;;  %v224_v52 = vld [vmem:[%s1631_s30 + $0x120] sm:$0xff] }
  0x46   : > { %1421 = vmatprep.mubr.msk.f32.mxu0 %vm343_vm0, %v195_v54  ;;  %1453 = vmatprep.mubr.msk.f32.mxu1 %vm343_vm0, %v259_v55  ;;  %v288_v53 = vld [vmem:[%s1631_s30 + $0x320] sm:$0xff]  ;;  %v227_v54 = vld [vmem:[%s1631_s30 + $0x138] sm:$0xff] }
  0x47   : > { %v291_v55 = vld [vmem:[%s1631_s30 + $0x338] sm:$0xff] }
  0x49   : > { %616 = vmatmul.mubr.f32.gmra.mrb[6].mxu0 %v194_v56  ;;  %776 = vmatmul.mubr.f32.gmra.mrb[6].mxu1 %v258_v57  ;;  %v226_v56 = vld [vmem:[%s1631_s30 + $0x130] sm:$0xff] }
  0x4a   : > { %1422 = vmatprep.mubr.msk.f32.mxu0 %vm343_vm0, %v197_v58  ;;  %1454 = vmatprep.mubr.msk.f32.mxu1 %vm343_vm0, %v261_v59  ;;  %v290_v57 = vld [vmem:[%s1631_s30 + $0x330] sm:$0xff]  ;;  %v229_v58 = vld [vmem:[%s1631_s30 + $0x148] sm:$0xff] }
  0x4b   : > { %v293_v59 = vld [vmem:[%s1631_s30 + $0x348] sm:$0xff] }
  0x4d   : > { %621 = vmatmul.mubr.f32.gmra.mrb[8].mxu0 %v196_v60  ;;  %781 = vmatmul.mubr.f32.gmra.mrb[8].mxu1 %v260_v61  ;;  %v228_v60 = vld [vmem:[%s1631_s30 + $0x140] sm:$0xff] }
  0x4e   : > { %1423 = vmatprep.mubr.msk.f32.mxu0 %vm343_vm0, %v199_v62  ;;  %1455 = vmatprep.mubr.msk.f32.mxu1 %vm343_vm0, %v263_v63  ;;  %v292_v61 = vld [vmem:[%s1631_s30 + $0x340] sm:$0xff]  ;;  %v231_v62 = vld [vmem:[%s1631_s30 + $0x158] sm:$0xff] }
  0x4f   : > { %v295_v63 = vld [vmem:[%s1631_s30 + $0x358] sm:$0xff] }
  0x51   : > { %626 = vmatmul.mubr.f32.gmra.mrb[10].mxu0 %v198_v0  ;;  %786 = vmatmul.mubr.f32.gmra.mrb[10].mxu1 %v262_v1  ;;  %v230_v0 = vld [vmem:[%s1631_s30 + $0x150] sm:$0xff] }
  0x52   : > { %1424 = vmatprep.mubr.msk.f32.mxu0 %vm343_vm0, %v201_v2  ;;  %1456 = vmatprep.mubr.msk.f32.mxu1 %vm343_vm0, %v265_v3  ;;  %v294_v1 = vld [vmem:[%s1631_s30 + $0x350] sm:$0xff]  ;;  %v233_v2 = vld [vmem:[%s1631_s30 + $0x168] sm:$0xff] }
  0x53   : > { %v297_v3 = vld [vmem:[%s1631_s30 + $0x368] sm:$0xff] }
  0x55   : > { %631 = vmatmul.mubr.f32.gmra.mrb[12].mxu0 %v200_v4  ;;  %791 = vmatmul.mubr.f32.gmra.mrb[12].mxu1 %v264_v5  ;;  %v232_v4 = vld [vmem:[%s1631_s30 + $0x160] sm:$0xff] }
  0x56   : > { %1425 = vmatprep.mubr.msk.f32.mxu0 %vm343_vm0, %v203_v6  ;;  %1457 = vmatprep.mubr.msk.f32.mxu1 %vm343_vm0, %v267_v7  ;;  %v296_v5 = vld [vmem:[%s1631_s30 + $0x360] sm:$0xff]  ;;  %v235_v6 = vld [vmem:[%s1631_s30 + $0x178] sm:$0xff] }
  0x57   : > { %v299_v7 = vld [vmem:[%s1631_s30 + $0x378] sm:$0xff] }
  0x59   : > { %636 = vmatmul.mubr.f32.gmra.mrb[14].mxu0 %v202_v8  ;;  %796 = vmatmul.mubr.f32.gmra.mrb[14].mxu1 %v266_v9  ;;  %v234_v8 = vld [vmem:[%s1631_s30 + $0x170] sm:$0xff] }
  0x5a   : > { %1426 = vmatprep.mubr.msk.f32.mxu0 %vm343_vm0, %v205_v10  ;;  %1458 = vmatprep.mubr.msk.f32.mxu1 %vm343_vm0, %v269_v11  ;;  %v298_v9 = vld [vmem:[%s1631_s30 + $0x370] sm:$0xff]  ;;  %v237_v10 = vld [vmem:[%s1631_s30 + $0x188] sm:$0xff] }
  0x5b   : > { %v301_v11 = vld [vmem:[%s1631_s30 + $0x388] sm:$0xff] }
  0x5d   : > { %641 = vmatmul.mubr.f32.gmra.mrb[16].mxu0 %v204_v12  ;;  %801 = vmatmul.mubr.f32.gmra.mrb[16].mxu1 %v268_v13  ;;  %v236_v12 = vld [vmem:[%s1631_s30 + $0x180] sm:$0xff] }
  0x5e   : > { %1427 = vmatprep.mubr.msk.f32.mxu0 %vm343_vm0, %v207_v14  ;;  %1459 = vmatprep.mubr.msk.f32.mxu1 %vm343_vm0, %v271_v15  ;;  %v300_v13 = vld [vmem:[%s1631_s30 + $0x380] sm:$0xff]  ;;  %v239_v14 = vld [vmem:[%s1631_s30 + $0x198] sm:$0xff] }
  0x5f   : > { %v303_v15 = vld [vmem:[%s1631_s30 + $0x398] sm:$0xff] }
  0x61   : > { %646 = vmatmul.mubr.f32.gmra.mrb[18].mxu0 %v206_v16  ;;  %806 = vmatmul.mubr.f32.gmra.mrb[18].mxu1 %v270_v17  ;;  %v238_v16 = vld [vmem:[%s1631_s30 + $0x190] sm:$0xff] }
  0x62   : > { %1428 = vmatprep.mubr.msk.f32.mxu0 %vm343_vm0, %v209_v18  ;;  %1460 = vmatprep.mubr.msk.f32.mxu1 %vm343_vm0, %v273_v19  ;;  %v302_v17 = vld [vmem:[%s1631_s30 + $0x390] sm:$0xff]  ;;  %v241_v18 = vld [vmem:[%s1631_s30 + $0x1a8] sm:$0xff] }
  0x63   : > { %v305_v19 = vld [vmem:[%s1631_s30 + $0x3a8] sm:$0xff] }
  0x65   : > { %651 = vmatmul.mubr.f32.gmra.mrb[20].mxu0 %v208_v20  ;;  %811 = vmatmul.mubr.f32.gmra.mrb[20].mxu1 %v272_v21  ;;  %v240_v20 = vld [vmem:[%s1631_s30 + $0x1a0] sm:$0xff] }
  0x66   : > { %1429 = vmatprep.mubr.msk.f32.mxu0 %vm343_vm0, %v211_v22  ;;  %1461 = vmatprep.mubr.msk.f32.mxu1 %vm343_vm0, %v275_v23  ;;  %v304_v21 = vld [vmem:[%s1631_s30 + $0x3a0] sm:$0xff]  ;;  %v243_v22 = vld [vmem:[%s1631_s30 + $0x1b8] sm:$0xff] }
  0x67   : > { %v307_v23 = vld [vmem:[%s1631_s30 + $0x3b8] sm:$0xff] }
  0x69   : > { %656 = vmatmul.mubr.f32.gmra.mrb[22].mxu0 %v210_v24  ;;  %816 = vmatmul.mubr.f32.gmra.mrb[22].mxu1 %v274_v25  ;;  %v242_v24 = vld [vmem:[%s1631_s30 + $0x1b0] sm:$0xff] }
  0x6a   : > { %1430 = vmatprep.mubr.msk.f32.mxu0 %vm343_vm0, %v213_v26  ;;  %1462 = vmatprep.mubr.msk.f32.mxu1 %vm343_vm0, %v277_v27  ;;  %v306_v25 = vld [vmem:[%s1631_s30 + $0x3b0] sm:$0xff]  ;;  %v245_v26 = vld [vmem:[%s1631_s30 + $0x1c8] sm:$0xff] }
  0x6b   : > { %v309_v27 = vld [vmem:[%s1631_s30 + $0x3c8] sm:$0xff] }
  0x6d   : > { %661 = vmatmul.mubr.f32.gmra.mrb[24].mxu0 %v212_v28  ;;  %821 = vmatmul.mubr.f32.gmra.mrb[24].mxu1 %v276_v29  ;;  %v244_v28 = vld [vmem:[%s1631_s30 + $0x1c0] sm:$0xff] }
  0x6e   : > { %1431 = vmatprep.mubr.msk.f32.mxu0 %vm343_vm0, %v215_v30  ;;  %1463 = vmatprep.mubr.msk.f32.mxu1 %vm343_vm0, %v279_v31  ;;  %v308_v29 = vld [vmem:[%s1631_s30 + $0x3c0] sm:$0xff]  ;;  %v247_v30 = vld [vmem:[%s1631_s30 + $0x1d8] sm:$0xff] }
  0x6f   : > { %v311_v31 = vld [vmem:[%s1631_s30 + $0x3d8] sm:$0xff] }
  0x71   : > { %666 = vmatmul.mubr.f32.gmra.mrb[26].mxu0 %v214_v32  ;;  %826 = vmatmul.mubr.f32.gmra.mrb[26].mxu1 %v278_v33  ;;  %v246_v32 = vld [vmem:[%s1631_s30 + $0x1d0] sm:$0xff] }
  0x72   : > { %1432 = vmatprep.mubr.msk.f32.mxu0 %vm343_vm0, %v217_v34  ;;  %1464 = vmatprep.mubr.msk.f32.mxu1 %vm343_vm0, %v281_v35  ;;  %v310_v33 = vld [vmem:[%s1631_s30 + $0x3d0] sm:$0xff]  ;;  %v249_v34 = vld [vmem:[%s1631_s30 + $0x1e8] sm:$0xff] }
  0x73   : > { %v313_v35 = vld [vmem:[%s1631_s30 + $0x3e8] sm:$0xff] }
  0x75   : > { %671 = vmatmul.mubr.f32.gmra.mrb[28].mxu0 %v216_v36  ;;  %831 = vmatmul.mubr.f32.gmra.mrb[28].mxu1 %v280_v37  ;;  %v248_v36 = vld [vmem:[%s1631_s30 + $0x1e0] sm:$0xff] }
  0x76   : > { %1433 = vmatprep.mubr.msk.f32.mxu0 %vm343_vm0, %v219_v38  ;;  %1465 = vmatprep.mubr.msk.f32.mxu1 %vm343_vm0, %v283_v39  ;;  %v312_v37 = vld [vmem:[%s1631_s30 + $0x3e0] sm:$0xff]  ;;  %v251_v38 = vld [vmem:[%s1631_s30 + $0x1f8] sm:$0xff] }
  0x77   : > { %v315_v39 = vld [vmem:[%s1631_s30 + $0x3f8] sm:$0xff] }
  0x79   : > { %676 = vmatmul.mubr.f32.gmra.mrb[30].mxu0 %v218_v40  ;;  %836 = vmatmul.mubr.f32.gmra.mrb[30].mxu1 %v282_v41  ;;  %v250_v40 = vld [vmem:[%s1631_s30 + $0x1f0] sm:$0xff] }
  0x7a   : > { %1434 = vmatprep.mubr.msk.f32.mxu0 %vm343_vm0, %v221_v42  ;;  %1466 = vmatprep.mubr.msk.f32.mxu1 %vm343_vm0, %v285_v43  ;;  %v314_v41 = vld [vmem:[%s1631_s30 + $0x3f0] sm:$0xff] }
  0x7d   : > { %681 = vmatmul.mubr.f32.gmra.mrb[32].mxu0 %v220_v44  ;;  %841 = vmatmul.mubr.f32.gmra.mrb[32].mxu1 %v284_v45 }
  0x7e   : > { %1435 = vmatprep.mubr.msk.f32.mxu0 %vm343_vm0, %v223_v46  ;;  %1467 = vmatprep.mubr.msk.f32.mxu1 %vm343_vm0, %v287_v47 }
  0x81   : > { %686 = vmatmul.mubr.f32.gmra.mrb[34].mxu0 %v222_v48  ;;  %846 = vmatmul.mubr.f32.gmra.mrb[34].mxu1 %v286_v49 }
  0x82   : > { %1436 = vmatprep.mubr.msk.f32.mxu0 %vm343_vm0, %v225_v50  ;;  %1468 = vmatprep.mubr.msk.f32.mxu1 %vm343_vm0, %v289_v51 }
  0x85   : > { %691 = vmatmul.mubr.f32.gmra.mrb[36].mxu0 %v224_v52  ;;  %851 = vmatmul.mubr.f32.gmra.mrb[36].mxu1 %v288_v53 }
  0x86   : > { %1437 = vmatprep.mubr.msk.f32.mxu0 %vm343_vm0, %v227_v54  ;;  %1469 = vmatprep.mubr.msk.f32.mxu1 %vm343_vm0, %v291_v55 }
  0x89   : > { %696 = vmatmul.mubr.f32.gmra.mrb[38].mxu0 %v226_v56  ;;  %856 = vmatmul.mubr.f32.gmra.mrb[38].mxu1 %v290_v57 }
  0x8a   : > { %1438 = vmatprep.mubr.msk.f32.mxu0 %vm343_vm0, %v229_v58  ;;  %1470 = vmatprep.mubr.msk.f32.mxu1 %vm343_vm0, %v293_v59 }
  0x8d   : > { %701 = vmatmul.mubr.f32.gmra.mrb[40].mxu0 %v228_v60  ;;  %861 = vmatmul.mubr.f32.gmra.mrb[40].mxu1 %v292_v61 }
  0x8e   : > { %1439 = vmatprep.mubr.msk.f32.mxu0 %vm343_vm0, %v231_v62  ;;  %1471 = vmatprep.mubr.msk.f32.mxu1 %vm343_vm0, %v295_v63 }
  0x91   : > { %706 = vmatmul.mubr.f32.gmra.mrb[42].mxu0 %v230_v0  ;;  %866 = vmatmul.mubr.f32.gmra.mrb[42].mxu1 %v294_v1 }
  0x92   : > { %1440 = vmatprep.mubr.msk.f32.mxu0 %vm343_vm0, %v233_v2  ;;  %1472 = vmatprep.mubr.msk.f32.mxu1 %vm343_vm0, %v297_v3 }
  0x95   : > { %711 = vmatmul.mubr.f32.gmra.mrb[44].mxu0 %v232_v4  ;;  %871 = vmatmul.mubr.f32.gmra.mrb[44].mxu1 %v296_v5 }
  0x96   : > { %1441 = vmatprep.mubr.msk.f32.mxu0 %vm343_vm0, %v235_v6  ;;  %1473 = vmatprep.mubr.msk.f32.mxu1 %vm343_vm0, %v299_v7 }
  0x99   : > { %716 = vmatmul.mubr.f32.gmra.mrb[46].mxu0 %v234_v8  ;;  %876 = vmatmul.mubr.f32.gmra.mrb[46].mxu1 %v298_v9 }
  0x9a   : > { %1442 = vmatprep.mubr.msk.f32.mxu0 %vm343_vm0, %v237_v10  ;;  %1474 = vmatprep.mubr.msk.f32.mxu1 %vm343_vm0, %v301_v11 }
  0x9d   : > { %721 = vmatmul.mubr.f32.gmra.mrb[48].mxu0 %v236_v12  ;;  %881 = vmatmul.mubr.f32.gmra.mrb[48].mxu1 %v300_v13 }
  0x9e   : > { %1443 = vmatprep.mubr.msk.f32.mxu0 %vm343_vm0, %v239_v14  ;;  %1475 = vmatprep.mubr.msk.f32.mxu1 %vm343_vm0, %v303_v15 }
  0xa1   : > { %726 = vmatmul.mubr.f32.gmra.mrb[50].mxu0 %v238_v16  ;;  %886 = vmatmul.mubr.f32.gmra.mrb[50].mxu1 %v302_v17 }
  0xa2   : > { %1444 = vmatprep.mubr.msk.f32.mxu0 %vm343_vm0, %v241_v18  ;;  %1476 = vmatprep.mubr.msk.f32.mxu1 %vm343_vm0, %v305_v19 }
  0xa5   : > { %731 = vmatmul.mubr.f32.gmra.mrb[52].mxu0 %v240_v20  ;;  %891 = vmatmul.mubr.f32.gmra.mrb[52].mxu1 %v304_v21 }
  0xa6   : > { %1445 = vmatprep.mubr.msk.f32.mxu0 %vm343_vm0, %v243_v22  ;;  %1477 = vmatprep.mubr.msk.f32.mxu1 %vm343_vm0, %v307_v23 }
  0xa9   : > { %736 = vmatmul.mubr.f32.gmra.mrb[54].mxu0 %v242_v24  ;;  %896 = vmatmul.mubr.f32.gmra.mrb[54].mxu1 %v306_v25 }
  0xaa   : > { %1446 = vmatprep.mubr.msk.f32.mxu0 %vm343_vm0, %v245_v26  ;;  %1478 = vmatprep.mubr.msk.f32.mxu1 %vm343_vm0, %v309_v27 }
  0xad   : > { %741 = vmatmul.mubr.f32.gmra.mrb[56].mxu0 %v244_v28  ;;  %901 = vmatmul.mubr.f32.gmra.mrb[56].mxu1 %v308_v29 }
  0xae   : > { %1447 = vmatprep.mubr.msk.f32.mxu0 %vm343_vm0, %v247_v30  ;;  %1479 = vmatprep.mubr.msk.f32.mxu1 %vm343_vm0, %v311_v31 }
  0xb1   : > { %746 = vmatmul.mubr.f32.gmra.mrb[58].mxu0 %v246_v32  ;;  %906 = vmatmul.mubr.f32.gmra.mrb[58].mxu1 %v310_v33 }
  0xb2   : > { %1448 = vmatprep.mubr.msk.f32.mxu0 %vm343_vm0, %v249_v34  ;;  %1480 = vmatprep.mubr.msk.f32.mxu1 %vm343_vm0, %v313_v35 }
  0xb5   : > { %751 = vmatmul.mubr.f32.gmra.mrb[60].mxu0 %v248_v36  ;;  %911 = vmatmul.mubr.f32.gmra.mrb[60].mxu1 %v312_v37 }
  0xb6   : > { %1449 = vmatprep.mubr.msk.f32.mxu0 %vm343_vm0, %v251_v38  ;;  %1481 = vmatprep.mubr.msk.f32.mxu1 %vm343_vm0, %v315_v39 }
  0xb9   : > { %756 = vmatmul.mubr.f32.gmra.mrb[62].mxu0 %v250_v40  ;;  %916 = vmatmul.mubr.f32.gmra.mrb[62].mxu1 %v314_v41 }
 0x110   : > { %v602_v42 = vpop.f32.mrb[0].mxu0  ;;  %v1916_v43 = vpop.f32.mrb[0].mxu1 }
 0x111   : > { %922 = vst.msk [vmem:[%s1914_s29] sm:$0xff] %vm921_vm1, %v602_v42  ;;  %v604_v44 = vpop.f32.mrb[1].mxu0  ;;  %954 = vst.msk [vmem:[%s1914_s29 + $0x100] sm:$0xff] %vm921_vm1, %v1916_v43  ;;  %v764_v45 = vpop.f32.mrb[1].mxu1  ;;  %v1119_v46 = vmul.f32 %v602_v42, %v602_v42  ;;  %v986_v49 = vsel %vm921_vm1, %v602_v42, 0.0 }
 0x113   : > { %v1183_v55 = vsel %vm921_vm1, %v1119_v46, 0.0 }
 0x114   : > { %v607_v47 = vpop.f32.mrb[2].mxu0  ;;  %v1923_v48 = vpop.f32.mrb[2].mxu1 }
 0x115   : > { %923 = vst.msk [vmem:[%s1914_s29 + $0x8] sm:$0xff] %vm921_vm1, %v607_v47  ;;  %v987_v50 = vsel %vm921_vm1, %v607_v47, 0.0  ;;  %v1120_v51 = vmul.f32 %v607_v47, %v607_v47  ;;  %v609_v52 = vpop.f32.mrb[3].mxu0  ;;  %955 = vst.msk [vmem:[%s1914_s29 + $0x108] sm:$0xff] %vm921_vm1, %v1923_v48  ;;  %v769_v53 = vpop.f32.mrb[3].mxu1 }
 0x116   : > { %v988_v54 = vadd.f32 %v987_v50, %v986_v49 }
 0x117   : > { %v1184_v56 = vsel %vm921_vm1, %v1120_v51, 0.0 }
 0x118   : > { %v1185_v57 = vadd.f32 %v1184_v56, %v1183_v55  ;;  %v612_v58 = vpop.f32.mrb[4].mxu0  ;;  %v1934_v59 = vpop.f32.mrb[4].mxu1 }
 0x119   : > { %924 = vst.msk [vmem:[%s1914_s29 + $0x10] sm:$0xff] %vm921_vm1, %v612_v58  ;;  %v989_v60 = vsel %vm921_vm1, %v612_v58, 0.0  ;;  %v1121_v61 = vmul.f32 %v612_v58, %v612_v58  ;;  %v614_v62 = vpop.f32.mrb[5].mxu0  ;;  %956 = vst.msk [vmem:[%s1914_s29 + $0x110] sm:$0xff] %vm921_vm1, %v1934_v59  ;;  %v774_v63 = vpop.f32.mrb[5].mxu1 }
 0x11a   : > { %v990_v0 = vadd.f32 %v989_v60, %v988_v54 }
 0x11b   : > { %v1186_v1 = vsel %vm921_vm1, %v1121_v61, 0.0 }
 0x11c   : > { %v1187_v2 = vadd.f32 %v1186_v1, %v1185_v57  ;;  %v617_v3 = vpop.f32.mrb[6].mxu0  ;;  %v1943_v4 = vpop.f32.mrb[6].mxu1 }
 0x11d   : > { %925 = vst.msk [vmem:[%s1914_s29 + $0x18] sm:$0xff] %vm921_vm1, %v617_v3  ;;  %v991_v5 = vsel %vm921_vm1, %v617_v3, 0.0  ;;  %v1122_v6 = vmul.f32 %v617_v3, %v617_v3  ;;  %v619_v7 = vpop.f32.mrb[7].mxu0  ;;  %957 = vst.msk [vmem:[%s1914_s29 + $0x118] sm:$0xff] %vm921_vm1, %v1943_v4  ;;  %v779_v8 = vpop.f32.mrb[7].mxu1 }
 0x11e   : > { %v992_v9 = vadd.f32 %v991_v5, %v990_v0 }
 0x11f   : > { %v1188_v10 = vsel %vm921_vm1, %v1122_v6, 0.0 }
 0x120   : > { %v1189_v11 = vadd.f32 %v1188_v10, %v1187_v2  ;;  %v622_v12 = vpop.f32.mrb[8].mxu0  ;;  %v1952_v13 = vpop.f32.mrb[8].mxu1 }
 0x121   : > { %926 = vst.msk [vmem:[%s1914_s29 + $0x20] sm:$0xff] %vm921_vm1, %v622_v12  ;;  %v993_v14 = vsel %vm921_vm1, %v622_v12, 0.0  ;;  %v1123_v15 = vmul.f32 %v622_v12, %v622_v12  ;;  %v624_v16 = vpop.f32.mrb[9].mxu0  ;;  %958 = vst.msk [vmem:[%s1914_s29 + $0x120] sm:$0xff] %vm921_vm1, %v1952_v13  ;;  %v784_v17 = vpop.f32.mrb[9].mxu1 }
 0x122   : > { %v994_v18 = vadd.f32 %v993_v14, %v992_v9 }
 0x123   : > { %v1190_v19 = vsel %vm921_vm1, %v1123_v15, 0.0 }
 0x124   : > { %v1191_v20 = vadd.f32 %v1190_v19, %v1189_v11  ;;  %v627_v21 = vpop.f32.mrb[10].mxu0  ;;  %v1961_v22 = vpop.f32.mrb[10].mxu1 }
 0x125   : > { %927 = vst.msk [vmem:[%s1914_s29 + $0x28] sm:$0xff] %vm921_vm1, %v627_v21  ;;  %v995_v23 = vsel %vm921_vm1, %v627_v21, 0.0  ;;  %v1124_v24 = vmul.f32 %v627_v21, %v627_v21  ;;  %v629_v25 = vpop.f32.mrb[11].mxu0  ;;  %959 = vst.msk [vmem:[%s1914_s29 + $0x128] sm:$0xff] %vm921_vm1, %v1961_v22  ;;  %v789_v26 = vpop.f32.mrb[11].mxu1 }
 0x126   : > { %v996_v27 = vadd.f32 %v995_v23, %v994_v18 }
 0x127   : > { %v1192_v28 = vsel %vm921_vm1, %v1124_v24, 0.0 }
 0x128   : > { %v1193_v29 = vadd.f32 %v1192_v28, %v1191_v20  ;;  %v632_v30 = vpop.f32.mrb[12].mxu0  ;;  %v1970_v31 = vpop.f32.mrb[12].mxu1 }
 0x129   : > { %928 = vst.msk [vmem:[%s1914_s29 + $0x30] sm:$0xff] %vm921_vm1, %v632_v30  ;;  %v997_v32 = vsel %vm921_vm1, %v632_v30, 0.0  ;;  %v1125_v33 = vmul.f32 %v632_v30, %v632_v30  ;;  %v634_v34 = vpop.f32.mrb[13].mxu0  ;;  %960 = vst.msk [vmem:[%s1914_s29 + $0x130] sm:$0xff] %vm921_vm1, %v1970_v31  ;;  %v794_v35 = vpop.f32.mrb[13].mxu1 }
 0x12a   : > { %v998_v36 = vadd.f32 %v997_v32, %v996_v27 }
 0x12b   : > { %v1194_v37 = vsel %vm921_vm1, %v1125_v33, 0.0 }
 0x12c   : > { %v1195_v38 = vadd.f32 %v1194_v37, %v1193_v29  ;;  %v637_v39 = vpop.f32.mrb[14].mxu0  ;;  %v1979_v40 = vpop.f32.mrb[14].mxu1 }
 0x12d   : > { %929 = vst.msk [vmem:[%s1914_s29 + $0x38] sm:$0xff] %vm921_vm1, %v637_v39  ;;  %v999_v41 = vsel %vm921_vm1, %v637_v39, 0.0  ;;  %v1126_v42 = vmul.f32 %v637_v39, %v637_v39  ;;  %v639_v44 = vpop.f32.mrb[15].mxu0  ;;  %961 = vst.msk [vmem:[%s1914_s29 + $0x138] sm:$0xff] %vm921_vm1, %v1979_v40  ;;  %v799_v45 = vpop.f32.mrb[15].mxu1 }
 0x12e   : > { %v1000_v46 = vadd.f32 %v999_v41, %v998_v36 }
 0x12f   : > { %v1196_v47 = vsel %vm921_vm1, %v1126_v42, 0.0 }
 0x130   : > { %v1197_v49 = vadd.f32 %v1196_v47, %v1195_v38  ;;  %v642_v50 = vpop.f32.mrb[16].mxu0  ;;  %v1988_v51 = vpop.f32.mrb[16].mxu1 }
 0x131   : > { %930 = vst.msk [vmem:[%s1914_s29 + $0x40] sm:$0xff] %vm921_vm1, %v642_v50  ;;  %v1001_v52 = vsel %vm921_vm1, %v642_v50, 0.0  ;;  %v1127_v53 = vmul.f32 %v642_v50, %v642_v50  ;;  %v644_v54 = vpop.f32.mrb[17].mxu0  ;;  %962 = vst.msk [vmem:[%s1914_s29 + $0x140] sm:$0xff] %vm921_vm1, %v1988_v51  ;;  %v804_v55 = vpop.f32.mrb[17].mxu1 }
 0x132   : > { %v1002_v56 = vadd.f32 %v1001_v52, %v1000_v46 }
 0x133   : > { %v1198_v57 = vsel %vm921_vm1, %v1127_v53, 0.0 }
 0x134   : > { %v1199_v58 = vadd.f32 %v1198_v57, %v1197_v49  ;;  %v647_v60 = vpop.f32.mrb[18].mxu0  ;;  %v1997_v61 = vpop.f32.mrb[18].mxu1 }
 0x135   : > { %931 = vst.msk [vmem:[%s1914_s29 + $0x48] sm:$0xff] %vm921_vm1, %v647_v60  ;;  %v1003_v62 = vsel %vm921_vm1, %v647_v60, 0.0  ;;  %v1128_v63 = vmul.f32 %v647_v60, %v647_v60  ;;  %v649_v0 = vpop.f32.mrb[19].mxu0  ;;  %963 = vst.msk [vmem:[%s1914_s29 + $0x148] sm:$0xff] %vm921_vm1, %v1997_v61  ;;  %v809_v1 = vpop.f32.mrb[19].mxu1 }
 0x136   : > { %v1004_v2 = vadd.f32 %v1003_v62, %v1002_v56 }
 0x137   : > { %v1200_v3 = vsel %vm921_vm1, %v1128_v63, 0.0 }
 0x138   : > { %v1201_v5 = vadd.f32 %v1200_v3, %v1199_v58  ;;  %v652_v6 = vpop.f32.mrb[20].mxu0  ;;  %v2006_v7 = vpop.f32.mrb[20].mxu1 }
 0x139   : > { %932 = vst.msk [vmem:[%s1914_s29 + $0x50] sm:$0xff] %vm921_vm1, %v652_v6  ;;  %v1005_v8 = vsel %vm921_vm1, %v652_v6, 0.0  ;;  %v1129_v9 = vmul.f32 %v652_v6, %v652_v6  ;;  %v654_v10 = vpop.f32.mrb[21].mxu0  ;;  %964 = vst.msk [vmem:[%s1914_s29 + $0x150] sm:$0xff] %vm921_vm1, %v2006_v7  ;;  %v814_v11 = vpop.f32.mrb[21].mxu1 }
 0x13a   : > { %v1006_v12 = vadd.f32 %v1005_v8, %v1004_v2 }
 0x13b   : > { %v1202_v14 = vsel %vm921_vm1, %v1129_v9, 0.0 }
 0x13c   : > { %v1203_v15 = vadd.f32 %v1202_v14, %v1201_v5  ;;  %v657_v16 = vpop.f32.mrb[22].mxu0  ;;  %v2015_v17 = vpop.f32.mrb[22].mxu1 }
 0x13d   : > { %933 = vst.msk [vmem:[%s1914_s29 + $0x58] sm:$0xff] %vm921_vm1, %v657_v16  ;;  %v1007_v18 = vsel %vm921_vm1, %v657_v16, 0.0  ;;  %v1130_v19 = vmul.f32 %v657_v16, %v657_v16  ;;  %v659_v20 = vpop.f32.mrb[23].mxu0  ;;  %965 = vst.msk [vmem:[%s1914_s29 + $0x158] sm:$0xff] %vm921_vm1, %v2015_v17  ;;  %v819_v21 = vpop.f32.mrb[23].mxu1 }
 0x13e   : > { %v1008_v23 = vadd.f32 %v1007_v18, %v1006_v12 }
 0x13f   : > { %v1204_v24 = vsel %vm921_vm1, %v1130_v19, 0.0 }
 0x140   : > { %v1205_v25 = vadd.f32 %v1204_v24, %v1203_v15  ;;  %v662_v26 = vpop.f32.mrb[24].mxu0  ;;  %v2024_v27 = vpop.f32.mrb[24].mxu1 }
 0x141   : > { %934 = vst.msk [vmem:[%s1914_s29 + $0x60] sm:$0xff] %vm921_vm1, %v662_v26  ;;  %v1009_v28 = vsel %vm921_vm1, %v662_v26, 0.0  ;;  %v1131_v29 = vmul.f32 %v662_v26, %v662_v26  ;;  %v664_v30 = vpop.f32.mrb[25].mxu0  ;;  %966 = vst.msk [vmem:[%s1914_s29 + $0x160] sm:$0xff] %vm921_vm1, %v2024_v27  ;;  %v824_v32 = vpop.f32.mrb[25].mxu1 }
 0x142   : > { %v1010_v33 = vadd.f32 %v1009_v28, %v1008_v23 }
 0x143   : > { %v1206_v34 = vsel %vm921_vm1, %v1131_v29, 0.0 }
 0x144   : > { %v1207_v35 = vadd.f32 %v1206_v34, %v1205_v25  ;;  %v667_v36 = vpop.f32.mrb[26].mxu0  ;;  %v2033_v37 = vpop.f32.mrb[26].mxu1 }
 0x145   : > { %935 = vst.msk [vmem:[%s1914_s29 + $0x68] sm:$0xff] %vm921_vm1, %v667_v36  ;;  %v1011_v38 = vsel %vm921_vm1, %v667_v36, 0.0  ;;  %v1132_v39 = vmul.f32 %v667_v36, %v667_v36  ;;  %v669_v41 = vpop.f32.mrb[27].mxu0  ;;  %967 = vst.msk [vmem:[%s1914_s29 + $0x168] sm:$0xff] %vm921_vm1, %v2033_v37  ;;  %v829_v42 = vpop.f32.mrb[27].mxu1 }
 0x146   : > { %v1012_v44 = vadd.f32 %v1011_v38, %v1010_v33 }
 0x147   : > { %v1208_v45 = vsel %vm921_vm1, %v1132_v39, 0.0 }
 0x148   : > { %v1209_v46 = vadd.f32 %v1208_v45, %v1207_v35  ;;  %v672_v47 = vpop.f32.mrb[28].mxu0  ;;  %v2042_v49 = vpop.f32.mrb[28].mxu1 }
 0x149   : > { %936 = vst.msk [vmem:[%s1914_s29 + $0x70] sm:$0xff] %vm921_vm1, %v672_v47  ;;  %v1013_v50 = vsel %vm921_vm1, %v672_v47, 0.0  ;;  %v1133_v52 = vmul.f32 %v672_v47, %v672_v47  ;;  %v674_v53 = vpop.f32.mrb[29].mxu0  ;;  %968 = vst.msk [vmem:[%s1914_s29 + $0x170] sm:$0xff] %vm921_vm1, %v2042_v49  ;;  %v834_v54 = vpop.f32.mrb[29].mxu1 }
 0x14a   : > { %v1014_v55 = vadd.f32 %v1013_v50, %v1012_v44 }
 0x14b   : > { %v1210_v56 = vsel %vm921_vm1, %v1133_v52, 0.0 }
 0x14c   : > { %v1211_v57 = vadd.f32 %v1210_v56, %v1209_v46  ;;  %v677_v58 = vpop.f32.mrb[30].mxu0  ;;  %v2051_v60 = vpop.f32.mrb[30].mxu1 }
 0x14d   : > { %937 = vst.msk [vmem:[%s1914_s29 + $0x78] sm:$0xff] %vm921_vm1, %v677_v58  ;;  %v1015_v62 = vsel %vm921_vm1, %v677_v58, 0.0  ;;  %v1134_v63 = vmul.f32 %v677_v58, %v677_v58  ;;  %v679_v0 = vpop.f32.mrb[31].mxu0  ;;  %969 = vst.msk [vmem:[%s1914_s29 + $0x178] sm:$0xff] %vm921_vm1, %v2051_v60  ;;  %v839_v1 = vpop.f32.mrb[31].mxu1 }
 0x14e   : > { %v1016_v2 = vadd.f32 %v1015_v62, %v1014_v55 }
 0x14f   : > { %v1212_v3 = vsel %vm921_vm1, %v1134_v63, 0.0 }
 0x150   : > { %v1213_v5 = vadd.f32 %v1212_v3, %v1211_v57  ;;  %v682_v6 = vpop.f32.mrb[32].mxu0  ;;  %v2060_v8 = vpop.f32.mrb[32].mxu1 }
 0x151   : > { %938 = vst.msk [vmem:[%s1914_s29 + $0x80] sm:$0xff] %vm921_vm1, %v682_v6  ;;  %v1017_v9 = vsel %vm921_vm1, %v682_v6, 0.0  ;;  %v1135_v10 = vmul.f32 %v682_v6, %v682_v6  ;;  %v684_v11 = vpop.f32.mrb[33].mxu0  ;;  %970 = vst.msk [vmem:[%s1914_s29 + $0x180] sm:$0xff] %vm921_vm1, %v2060_v8  ;;  %v844_v12 = vpop.f32.mrb[33].mxu1 }
 0x152   : > { %v1018_v14 = vadd.f32 %v1017_v9, %v1016_v2 }
 0x153   : > { %v1214_v15 = vsel %vm921_vm1, %v1135_v10, 0.0 }
 0x154   : > { %v1215_v16 = vadd.f32 %v1214_v15, %v1213_v5  ;;  %v687_v18 = vpop.f32.mrb[34].mxu0  ;;  %v2069_v19 = vpop.f32.mrb[34].mxu1 }
 0x155   : > { %939 = vst.msk [vmem:[%s1914_s29 + $0x88] sm:$0xff] %vm921_vm1, %v687_v18  ;;  %v1019_v20 = vsel %vm921_vm1, %v687_v18, 0.0  ;;  %v1136_v21 = vmul.f32 %v687_v18, %v687_v18  ;;  %v689_v23 = vpop.f32.mrb[35].mxu0  ;;  %971 = vst.msk [vmem:[%s1914_s29 + $0x188] sm:$0xff] %vm921_vm1, %v2069_v19  ;;  %v849_v24 = vpop.f32.mrb[35].mxu1 }
 0x156   : > { %v1020_v25 = vadd.f32 %v1019_v20, %v1018_v14 }
 0x157   : > { %v1216_v26 = vsel %vm921_vm1, %v1136_v21, 0.0 }
 0x158   : > { %v1217_v28 = vadd.f32 %v1216_v26, %v1215_v16  ;;  %v692_v29 = vpop.f32.mrb[36].mxu0  ;;  %v2078_v30 = vpop.f32.mrb[36].mxu1 }
 0x159   : > { %940 = vst.msk [vmem:[%s1914_s29 + $0x90] sm:$0xff] %vm921_vm1, %v692_v29  ;;  %v1021_v32 = vsel %vm921_vm1, %v692_v29, 0.0  ;;  %v1137_v33 = vmul.f32 %v692_v29, %v692_v29  ;;  %v694_v34 = vpop.f32.mrb[37].mxu0  ;;  %972 = vst.msk [vmem:[%s1914_s29 + $0x190] sm:$0xff] %vm921_vm1, %v2078_v30  ;;  %v854_v35 = vpop.f32.mrb[37].mxu1 }
 0x15a   : > { %v1022_v36 = vadd.f32 %v1021_v32, %v1020_v25 }
 0x15b   : > { %v1218_v38 = vsel %vm921_vm1, %v1137_v33, 0.0 }
 0x15c   : > { %v1219_v39 = vadd.f32 %v1218_v38, %v1217_v28  ;;  %v697_v41 = vpop.f32.mrb[38].mxu0  ;;  %v2087_v42 = vpop.f32.mrb[38].mxu1 }
 0x15d   : > { %941 = vst.msk [vmem:[%s1914_s29 + $0x98] sm:$0xff] %vm921_vm1, %v697_v41  ;;  %v1023_v44 = vsel %vm921_vm1, %v697_v41, 0.0  ;;  %v1138_v45 = vmul.f32 %v697_v41, %v697_v41  ;;  %v699_v46 = vpop.f32.mrb[39].mxu0  ;;  %973 = vst.msk [vmem:[%s1914_s29 + $0x198] sm:$0xff] %vm921_vm1, %v2087_v42  ;;  %v859_v47 = vpop.f32.mrb[39].mxu1 }
 0x15e   : > { %v1024_v50 = vadd.f32 %v1023_v44, %v1022_v36 }
 0x15f   : > { %v1220_v52 = vsel %vm921_vm1, %v1138_v45, 0.0 }
 0x160   : > { %v1221_v53 = vadd.f32 %v1220_v52, %v1219_v39  ;;  %v702_v54 = vpop.f32.mrb[40].mxu0  ;;  %v2096_v55 = vpop.f32.mrb[40].mxu1 }
 0x161   : > { %942 = vst.msk [vmem:[%s1914_s29 + $0xa0] sm:$0xff] %vm921_vm1, %v702_v54  ;;  %v1025_v56 = vsel %vm921_vm1, %v702_v54, 0.0  ;;  %v1139_v57 = vmul.f32 %v702_v54, %v702_v54  ;;  %v704_v58 = vpop.f32.mrb[41].mxu0  ;;  %974 = vst.msk [vmem:[%s1914_s29 + $0x1a0] sm:$0xff] %vm921_vm1, %v2096_v55  ;;  %v864_v62 = vpop.f32.mrb[41].mxu1 }
 0x162   : > { %v1026_v63 = vadd.f32 %v1025_v56, %v1024_v50 }
 0x163   : > { %v1222_v0 = vsel %vm921_vm1, %v1139_v57, 0.0 }
 0x164   : > { %v1223_v1 = vadd.f32 %v1222_v0, %v1221_v53  ;;  %v707_v2 = vpop.f32.mrb[42].mxu0  ;;  %v2105_v3 = vpop.f32.mrb[42].mxu1 }
 0x165   : > { %943 = vst.msk [vmem:[%s1914_s29 + $0xa8] sm:$0xff] %vm921_vm1, %v707_v2  ;;  %v1027_v5 = vsel %vm921_vm1, %v707_v2, 0.0  ;;  %v1140_v6 = vmul.f32 %v707_v2, %v707_v2  ;;  %v709_v9 = vpop.f32.mrb[43].mxu0  ;;  %975 = vst.msk [vmem:[%s1914_s29 + $0x1a8] sm:$0xff] %vm921_vm1, %v2105_v3  ;;  %v869_v10 = vpop.f32.mrb[43].mxu1 }
 0x166   : > { %v1028_v11 = vadd.f32 %v1027_v5, %v1026_v63 }
 0x167   : > { %v1224_v12 = vsel %vm921_vm1, %v1140_v6, 0.0 }
 0x168   : > { %v1225_v14 = vadd.f32 %v1224_v12, %v1223_v1  ;;  %v712_v15 = vpop.f32.mrb[44].mxu0  ;;  %v2114_v16 = vpop.f32.mrb[44].mxu1 }
 0x169   : > { %944 = vst.msk [vmem:[%s1914_s29 + $0xb0] sm:$0xff] %vm921_vm1, %v712_v15  ;;  %v1029_v18 = vsel %vm921_vm1, %v712_v15, 0.0  ;;  %v1141_v20 = vmul.f32 %v712_v15, %v712_v15  ;;  %v714_v21 = vpop.f32.mrb[45].mxu0  ;;  %976 = vst.msk [vmem:[%s1914_s29 + $0x1b0] sm:$0xff] %vm921_vm1, %v2114_v16  ;;  %v874_v23 = vpop.f32.mrb[45].mxu1 }
 0x16a   : > { %v1030_v24 = vadd.f32 %v1029_v18, %v1028_v11 }
 0x16b   : > { %v1226_v25 = vsel %vm921_vm1, %v1141_v20, 0.0 }
 0x16c   : > { %v1227_v26 = vadd.f32 %v1226_v25, %v1225_v14  ;;  %v717_v28 = vpop.f32.mrb[46].mxu0  ;;  %v2123_v29 = vpop.f32.mrb[46].mxu1 }
 0x16d   : > { %945 = vst.msk [vmem:[%s1914_s29 + $0xb8] sm:$0xff] %vm921_vm1, %v717_v28  ;;  %v1031_v32 = vsel %vm921_vm1, %v717_v28, 0.0  ;;  %v1142_v33 = vmul.f32 %v717_v28, %v717_v28  ;;  %v719_v34 = vpop.f32.mrb[47].mxu0  ;;  %977 = vst.msk [vmem:[%s1914_s29 + $0x1b8] sm:$0xff] %vm921_vm1, %v2123_v29  ;;  %v879_v35 = vpop.f32.mrb[47].mxu1 }
 0x16e   : > { %v1032_v36 = vadd.f32 %v1031_v32, %v1030_v24 }
 0x16f   : > { %v1228_v38 = vsel %vm921_vm1, %v1142_v33, 0.0 }
 0x170   : > { %v1229_v39 = vadd.f32 %v1228_v38, %v1227_v26  ;;  %v722_v41 = vpop.f32.mrb[48].mxu0  ;;  %v2132_v44 = vpop.f32.mrb[48].mxu1 }
 0x171   : > { %946 = vst.msk [vmem:[%s1914_s29 + $0xc0] sm:$0xff] %vm921_vm1, %v722_v41  ;;  %v1033_v45 = vsel %vm921_vm1, %v722_v41, 0.0  ;;  %v1143_v46 = vmul.f32 %v722_v41, %v722_v41  ;;  %v724_v47 = vpop.f32.mrb[49].mxu0  ;;  %978 = vst.msk [vmem:[%s1914_s29 + $0x1c0] sm:$0xff] %vm921_vm1, %v2132_v44  ;;  %v884_v50 = vpop.f32.mrb[49].mxu1 }
 0x172   : > { %v1034_v52 = vadd.f32 %v1033_v45, %v1032_v36 }
 0x173   : > { %v1230_v53 = vsel %vm921_vm1, %v1143_v46, 0.0 }
 0x174   : > { %v1231_v54 = vadd.f32 %v1230_v53, %v1229_v39  ;;  %v727_v56 = vpop.f32.mrb[50].mxu0  ;;  %v2141_v57 = vpop.f32.mrb[50].mxu1 }
 0x175   : > { %947 = vst.msk [vmem:[%s1914_s29 + $0xc8] sm:$0xff] %vm921_vm1, %v727_v56  ;;  %v1035_v58 = vsel %vm921_vm1, %v727_v56, 0.0  ;;  %v1144_v62 = vmul.f32 %v727_v56, %v727_v56  ;;  %v729_v63 = vpop.f32.mrb[51].mxu0  ;;  %979 = vst.msk [vmem:[%s1914_s29 + $0x1c8] sm:$0xff] %vm921_vm1, %v2141_v57  ;;  %v889_v0 = vpop.f32.mrb[51].mxu1 }
 0x176   : > { %v1036_v1 = vadd.f32 %v1035_v58, %v1034_v52 }
 0x177   : > { %v1232_v2 = vsel %vm921_vm1, %v1144_v62, 0.0 }
 0x178   : > { %v1233_v5 = vadd.f32 %v1232_v2, %v1231_v54  ;;  %v732_v6 = vpop.f32.mrb[52].mxu0  ;;  %v2150_v9 = vpop.f32.mrb[52].mxu1 }
 0x179   : > { %948 = vst.msk [vmem:[%s1914_s29 + $0xd0] sm:$0xff] %vm921_vm1, %v732_v6  ;;  %v1037_v10 = vsel %vm921_vm1, %v732_v6, 0.0  ;;  %v1145_v11 = vmul.f32 %v732_v6, %v732_v6  ;;  %v734_v12 = vpop.f32.mrb[53].mxu0  ;;  %980 = vst.msk [vmem:[%s1914_s29 + $0x1d0] sm:$0xff] %vm921_vm1, %v2150_v9  ;;  %v894_v14 = vpop.f32.mrb[53].mxu1 }
 0x17a   : > { %v1038_v15 = vadd.f32 %v1037_v10, %v1036_v1 }
 0x17b   : > { %v1234_v18 = vsel %vm921_vm1, %v1145_v11, 0.0 }
 0x17c   : > { %v1235_v20 = vadd.f32 %v1234_v18, %v1233_v5  ;;  %v737_v21 = vpop.f32.mrb[54].mxu0  ;;  %v2159_v23 = vpop.f32.mrb[54].mxu1 }
 0x17d   : > { %949 = vst.msk [vmem:[%s1914_s29 + $0xd8] sm:$0xff] %vm921_vm1, %v737_v21  ;;  %v1039_v24 = vsel %vm921_vm1, %v737_v21, 0.0  ;;  %v1146_v25 = vmul.f32 %v737_v21, %v737_v21  ;;  %v739_v26 = vpop.f32.mrb[55].mxu0  ;;  %981 = vst.msk [vmem:[%s1914_s29 + $0x1d8] sm:$0xff] %vm921_vm1, %v2159_v23  ;;  %v899_v28 = vpop.f32.mrb[55].mxu1 }
 0x17e   : > { %v1040_v32 = vadd.f32 %v1039_v24, %v1038_v15  ;;  %v1151_v24 = vmul.f32 %v1916_v43, %v1916_v43 }
 0x17f   : > { %v1236_v33 = vsel %vm921_vm1, %v1146_v25, 0.0 }
 0x180   : > { %v1237_v34 = vadd.f32 %v1236_v33, %v1235_v20  ;;  %v742_v35 = vpop.f32.mrb[56].mxu0  ;;  %v2168_v36 = vpop.f32.mrb[56].mxu1 }
 0x181   : > { %950 = vst.msk [vmem:[%s1914_s29 + $0xe0] sm:$0xff] %vm921_vm1, %v742_v35  ;;  %v1041_v38 = vsel %vm921_vm1, %v742_v35, 0.0  ;;  %v1147_v39 = vmul.f32 %v742_v35, %v742_v35  ;;  %v744_v41 = vpop.f32.mrb[57].mxu0  ;;  %982 = vst.msk [vmem:[%s1914_s29 + $0x1e0] sm:$0xff] %vm921_vm1, %v2168_v36  ;;  %v904_v45 = vpop.f32.mrb[57].mxu1  ;;  %v1152_v35 = vmul.f32 %v1923_v48, %v1923_v48 }
 0x182   : > { %v1042_v46 = vadd.f32 %v1041_v38, %v1040_v32  ;;  %v1246_v45 = vsel %vm921_vm1, %v1151_v24, 0.0 }
 0x183   : > { %v1238_v47 = vsel %vm921_vm1, %v1147_v39, 0.0 }
 0x184   : > { %v1239_v50 = vadd.f32 %v1238_v47, %v1237_v34  ;;  %v747_v52 = vpop.f32.mrb[58].mxu0  ;;  %v2177_v53 = vpop.f32.mrb[58].mxu1  ;;  %v1049_v34 = vsel %vm921_vm1, %v1916_v43, 0.0  ;;  %v1153_v47 = vmul.f32 %v1934_v59, %v1934_v59  ;;  %v1053_v43 = vsel %vm921_vm1, %v1934_v59, 0.0 }
 0x185   : > { %951 = vst.msk [vmem:[%s1914_s29 + $0xe8] sm:$0xff] %vm921_vm1, %v747_v52  ;;  %v1043_v54 = vsel %vm921_vm1, %v747_v52, 0.0  ;;  %v1148_v56 = vmul.f32 %v747_v52, %v747_v52  ;;  %v749_v58 = vpop.f32.mrb[59].mxu0  ;;  %983 = vst.msk [vmem:[%s1914_s29 + $0x1e8] sm:$0xff] %vm921_vm1, %v2177_v53  ;;  %v909_v62 = vpop.f32.mrb[59].mxu1  ;;  %v1057_v59 = vsel %vm921_vm1, %v1952_v13, 0.0 }
 0x186   : > { %v1044_v63 = vadd.f32 %v1043_v54, %v1042_v46  ;;  %v1051_v46 = vsel %vm921_vm1, %v1923_v48, 0.0  ;;  %v1248_v54 = vsel %vm921_vm1, %v1152_v35, 0.0  ;;  %v1055_v48 = vsel %vm921_vm1, %v1943_v4, 0.0 }
 0x187   : > { %v1240_v0 = vsel %vm921_vm1, %v1148_v56, 0.0  ;;  %v1154_v56 = vmul.f32 %v1943_v4, %v1943_v4  ;;  %v1059_v4 = vsel %vm921_vm1, %v1961_v22, 0.0 }
 0x188   : > { %v1241_v1 = vadd.f32 %v1240_v0, %v1239_v50  ;;  %v752_v2 = vpop.f32.mrb[60].mxu0  ;;  %v2186_v5 = vpop.f32.mrb[60].mxu1  ;;  %v1155_v0 = vmul.f32 %v1952_v13, %v1952_v13  ;;  %v1061_v13 = vsel %vm921_vm1, %v1970_v31, 0.0 }
 0x189   : > { %952 = vst.msk [vmem:[%s1914_s29 + $0xf0] sm:$0xff] %vm921_vm1, %v752_v2  ;;  %v1045_v6 = vsel %vm921_vm1, %v752_v2, 0.0  ;;  %v1149_v10 = vmul.f32 %v752_v2, %v752_v2  ;;  %v754_v11 = vpop.f32.mrb[61].mxu0  ;;  %984 = vst.msk [vmem:[%s1914_s29 + $0x1f0] sm:$0xff] %vm921_vm1, %v2186_v5  ;;  %v914_v12 = vpop.f32.mrb[61].mxu1 }
 0x18a   : > { %v1046_v14 = vadd.f32 %v1045_v6, %v1044_v63  ;;  %v1250_v63 = vsel %vm921_vm1, %v1153_v47, 0.0  ;;  %v1252_v6 = vsel %vm921_vm1, %v1154_v56, 0.0  ;;  %v1161_v47 = vmul.f32 %v2006_v7, %v2006_v7 }
 0x18b   : > { %v1242_v15 = vsel %vm921_vm1, %v1149_v10, 0.0  ;;  %v1156_v10 = vmul.f32 %v1961_v22, %v1961_v22  ;;  %v1063_v22 = vsel %vm921_vm1, %v1979_v40, 0.0 }
 0x18c   : > { %v1243_v18 = vadd.f32 %v1242_v15, %v1241_v1  ;;  %v757_v20 = vpop.f32.mrb[62].mxu0  ;;  %v2195_v21 = vpop.f32.mrb[62].mxu1  ;;  %v1157_v15 = vmul.f32 %v1970_v31, %v1970_v31  ;;  %v1065_v31 = vsel %vm921_vm1, %v1988_v51, 0.0 }
 0x18d   : > { %953 = vst.msk [vmem:[%s1914_s29 + $0xf8] sm:$0xff] %vm921_vm1, %v757_v20  ;;  %v1047_v25 = vsel %vm921_vm1, %v757_v20, 0.0  ;;  %v1150_v26 = vmul.f32 %v757_v20, %v757_v20  ;;  %v759_v28 = vpop.f32.mrb[63].mxu0  ;;  %985 = vst.msk [vmem:[%s1914_s29 + $0x1f8] sm:$0xff] %vm921_vm1, %v2195_v21  ;;  %v919_v32 = vpop.f32.mrb[63].mxu1  ;;  %v1256_v24 = vsel %vm921_vm1, %v1156_v10, 0.0 }
 0x18e   : > { %v1048_v33 = vadd.f32 %v1047_v25, %v1046_v14  ;;  %v1254_v14 = vsel %vm921_vm1, %v1155_v0, 0.0  ;;  %v1158_v25 = vmul.f32 %v1979_v40, %v1979_v40  ;;  %v1258_v32 = vsel %vm921_vm1, %v1157_v15, 0.0 }
 0x18f   : > { %v1244_v38 = vsel %vm921_vm1, %v1150_v26, 0.0  ;;  %v1067_v40 = vsel %vm921_vm1, %v1997_v61, 0.0  ;;  %v1166_v15 = vmul.f32 %v2051_v60, %v2051_v60 }
 0x190   : > { %v1050_v39 = vadd.f32 %v1049_v34, %v1048_v33  ;;  %v1245_v41 = vadd.f32 %v1244_v38, %v1243_v18  ;;  %v1159_v33 = vmul.f32 %v1988_v51, %v1988_v51  ;;  %v1260_v38 = vsel %vm921_vm1, %v1158_v25, 0.0 }
 0x191   : > { %v1069_v51 = vsel %vm921_vm1, %v2006_v7, 0.0  ;;  %v1073_v7 = vsel %vm921_vm1, %v2024_v27, 0.0 }
 0x192   : > { %v1052_v50 = vadd.f32 %v1051_v46, %v1050_v39  ;;  %v1247_v52 = vadd.f32 %v1246_v45, %v1245_v41  ;;  %v1160_v39 = vmul.f32 %v1997_v61, %v1997_v61  ;;  %v1262_v46 = vsel %vm921_vm1, %v1159_v33, 0.0 }
 0x193   : > { %v1071_v61 = vsel %vm921_vm1, %v2015_v17, 0.0 }
 0x194   : > { %v1054_v58 = vadd.f32 %v1053_v43, %v1052_v50  ;;  %v1249_v62 = vadd.f32 %v1248_v54, %v1247_v52  ;;  %v1264_v54 = vsel %vm921_vm1, %v1160_v39, 0.0  ;;  %v1162_v43 = vmul.f32 %v2015_v17, %v2015_v17 }
 0x195   : > { %v1075_v17 = vsel %vm921_vm1, %v2033_v37, 0.0 }
 0x196   : > { %v1056_v1 = vadd.f32 %v1055_v48, %v1054_v58  ;;  %v1251_v2 = vadd.f32 %v1250_v63, %v1249_v62  ;;  %v1266_v62 = vsel %vm921_vm1, %v1161_v47, 0.0  ;;  %v1163_v63 = vmul.f32 %v2024_v27, %v2024_v27 }
 0x197   : > { %v1077_v27 = vsel %vm921_vm1, %v2042_v49, 0.0  ;;  %v1171_v47 = vmul.f32 %v2096_v55, %v2096_v55 }
 0x198   : > { %v1058_v11 = vadd.f32 %v1057_v59, %v1056_v1  ;;  %v1253_v12 = vadd.f32 %v1252_v6, %v1251_v2  ;;  %v1268_v1 = vsel %vm921_vm1, %v1162_v43, 0.0  ;;  %v1164_v2 = vmul.f32 %v2033_v37, %v2033_v37 }
 0x199   : > { %v1270_v10 = vsel %vm921_vm1, %v1163_v63, 0.0  ;;  %v1079_v37 = vsel %vm921_vm1, %v2051_v60, 0.0  ;;  %v1083_v60 = vsel %vm921_vm1, %v2069_v19, 0.0 }
 0x19a   : > { %v1060_v18 = vadd.f32 %v1059_v4, %v1058_v11  ;;  %v1255_v20 = vadd.f32 %v1254_v14, %v1253_v12  ;;  %v1165_v11 = vmul.f32 %v2042_v49, %v2042_v49  ;;  %v1272_v4 = vsel %vm921_vm1, %v1164_v2, 0.0 }
 0x19b   : > { %v1081_v49 = vsel %vm921_vm1, %v2060_v8, 0.0 }
 0x19c   : > { %v1062_v26 = vadd.f32 %v1061_v13, %v1060_v18  ;;  %v1257_v28 = vadd.f32 %v1256_v24, %v1255_v20  ;;  %v1274_v24 = vsel %vm921_vm1, %v1165_v11, 0.0  ;;  %v1167_v13 = vmul.f32 %v2060_v8, %v2060_v8 }
 0x19d   : > { %v1085_v8 = vsel %vm921_vm1, %v2078_v30, 0.0  ;;  %v1176_v11 = vmul.f32 %v2141_v57, %v2141_v57 }
 0x19e   : > { %v1064_v34 = vadd.f32 %v1063_v22, %v1062_v26  ;;  %v1259_v35 = vadd.f32 %v1258_v32, %v1257_v28  ;;  %v1276_v28 = vsel %vm921_vm1, %v1166_v15, 0.0  ;;  %v1168_v32 = vmul.f32 %v2069_v19, %v2069_v19 }
 0x19f   : > { %v1087_v19 = vsel %vm921_vm1, %v2087_v42, 0.0 }
 0x1a0   : > { %v1261_v41 = vadd.f32 %v1260_v38, %v1259_v35  ;;  %v1066_v45 = vadd.f32 %v1065_v31, %v1064_v34  ;;  %v1278_v34 = vsel %vm921_vm1, %v1167_v13, 0.0  ;;  %v1169_v35 = vmul.f32 %v2078_v30, %v2078_v30 }
 0x1a1   : > { %v1280_v39 = vsel %vm921_vm1, %v1168_v32, 0.0  ;;  %v1089_v30 = vsel %vm921_vm1, %v2096_v55, 0.0  ;;  %v1093_v55 = vsel %vm921_vm1, %v2114_v16, 0.0 }
 0x1a2   : > { %v1068_v50 = vadd.f32 %v1067_v40, %v1066_v45  ;;  %v1263_v52 = vadd.f32 %v1262_v46, %v1261_v41  ;;  %v1170_v41 = vmul.f32 %v2087_v42, %v2087_v42  ;;  %v1282_v40 = vsel %vm921_vm1, %v1169_v35, 0.0 }
 0x1a3   : > { %v1091_v42 = vsel %vm921_vm1, %v2105_v3, 0.0  ;;  %v1181_v35 = vmul.f32 %v2186_v5, %v2186_v5 }
 0x1a4   : > { %v1070_v56 = vadd.f32 %v1069_v51, %v1068_v50  ;;  %v1265_v58 = vadd.f32 %v1264_v54, %v1263_v52  ;;  %v1284_v54 = vsel %vm921_vm1, %v1170_v41, 0.0  ;;  %v1172_v51 = vmul.f32 %v2105_v3, %v2105_v3 }
 0x1a5   : > { %v1095_v3 = vsel %vm921_vm1, %v2123_v29, 0.0  ;;  %v1111_v41 = vsel %vm921_vm1, %v2195_v21, 0.0 }
 0x1a6   : > { %v1072_v48 = vadd.f32 %v1071_v61, %v1070_v56  ;;  %v1267_v0 = vadd.f32 %v1266_v62, %v1265_v58  ;;  %v1286_v58 = vsel %vm921_vm1, %v1171_v47, 0.0  ;;  %v1173_v62 = vmul.f32 %v2114_v16, %v2114_v16 }
 0x1a7   : > { %v1097_v16 = vsel %vm921_vm1, %v2132_v44, 0.0 }
 0x1a8   : > { %v1074_v6 = vadd.f32 %v1073_v7, %v1072_v48  ;;  %v1269_v59 = vadd.f32 %v1268_v1, %v1267_v0  ;;  %v1288_v48 = vsel %vm921_vm1, %v1172_v51, 0.0  ;;  %v1174_v0 = vmul.f32 %v2123_v29, %v2123_v29 }
 0x1a9   : > { %v1290_v2 = vsel %vm921_vm1, %v1173_v62, 0.0  ;;  %v1099_v29 = vsel %vm921_vm1, %v2141_v57, 0.0  ;;  %v1103_v57 = vsel %vm921_vm1, %v2159_v23, 0.0 }
 0x1aa   : > { %v1076_v12 = vadd.f32 %v1075_v17, %v1074_v6  ;;  %v1271_v14 = vadd.f32 %v1270_v10, %v1269_v59  ;;  %v1175_v6 = vmul.f32 %v2132_v44, %v2132_v44  ;;  %v1292_v17 = vsel %vm921_vm1, %v1174_v0, 0.0 }
 0x1ab   : > { %v1101_v44 = vsel %vm921_vm1, %v2150_v9, 0.0 }
 0x1ac   : > { %v1078_v18 = vadd.f32 %v1077_v27, %v1076_v12  ;;  %v1273_v20 = vadd.f32 %v1272_v4, %v1271_v14  ;;  %v1294_v4 = vsel %vm921_vm1, %v1175_v6, 0.0  ;;  %v1177_v27 = vmul.f32 %v2150_v9, %v2150_v9 }
 0x1ad   : > { %v1105_v9 = vsel %vm921_vm1, %v2168_v36, 0.0 }
 0x1ae   : > { %v1080_v25 = vadd.f32 %v1079_v37, %v1078_v18  ;;  %v1275_v26 = vadd.f32 %v1274_v24, %v1273_v20  ;;  %v1296_v20 = vsel %vm921_vm1, %v1176_v11, 0.0  ;;  %v1178_v24 = vmul.f32 %v2159_v23, %v2159_v23 }
 0x1af   : > { %v1107_v23 = vsel %vm921_vm1, %v2177_v53, 0.0 }
 0x1b0   : > { %v1082_v22 = vadd.f32 %v1081_v49, %v1080_v25  ;;  %v1277_v33 = vadd.f32 %v1276_v28, %v1275_v26  ;;  %v1298_v25 = vsel %vm921_vm1, %v1177_v27, 0.0  ;;  %v1179_v26 = vmul.f32 %v2168_v36, %v2168_v36 }
 0x1b1   : > { %v1300_v32 = vsel %vm921_vm1, %v1178_v24, 0.0 }
 0x1b2   : > { %v1279_v38 = vadd.f32 %v1278_v34, %v1277_v33  ;;  %v1084_v31 = vadd.f32 %v1083_v60, %v1082_v22  ;;  %v1180_v22 = vmul.f32 %v2177_v53, %v2177_v53  ;;  %v1302_v60 = vsel %vm921_vm1, %v1179_v26, 0.0 }
 0x1b4   : > { %v1281_v45 = vadd.f32 %v1280_v39, %v1279_v38  ;;  %v1086_v46 = vadd.f32 %v1085_v8, %v1084_v31  ;;  %v1182_v38 = vmul.f32 %v2195_v21, %v2195_v21  ;;  %v1304_v36 = vsel %vm921_vm1, %v1180_v22, 0.0 }
 0x1b5   : > { %v1109_v8 = vsel %vm921_vm1, %v2186_v5, 0.0 }
 0x1b6   : > { %v1283_v50 = vadd.f32 %v1282_v40, %v1281_v45  ;;  %v1088_v52 = vadd.f32 %v1087_v19, %v1086_v46  ;;  %v1306_v46 = vsel %vm921_vm1, %v1181_v35, 0.0  ;;  %v1308_v40 = vsel %vm921_vm1, %v1182_v38, 0.0 }
 0x1b8   : > { %v1285_v43 = vadd.f32 %v1284_v54, %v1283_v50  ;;  %v1090_v56 = vadd.f32 %v1089_v30, %v1088_v52 }
 0x1ba   : > { %v1287_v61 = vadd.f32 %v1286_v58, %v1285_v43  ;;  %v1092_v63 = vadd.f32 %v1091_v42, %v1090_v56 }
 0x1bc   : > { %v1289_v1 = vadd.f32 %v1288_v48, %v1287_v61  ;;  %v1094_v7 = vadd.f32 %v1093_v55, %v1092_v63 }
 0x1be   : > { %v1291_v59 = vadd.f32 %v1290_v2, %v1289_v1  ;;  %v1096_v10 = vadd.f32 %v1095_v3, %v1094_v7 }
 0x1c0   : > { %v1293_v12 = vadd.f32 %v1292_v17, %v1291_v59  ;;  %v1098_v14 = vadd.f32 %v1097_v16, %v1096_v10 }
 0x1c2   : > { %v1295_v15 = vadd.f32 %v1294_v4, %v1293_v12  ;;  %v1100_v18 = vadd.f32 %v1099_v29, %v1098_v14 }
 0x1c4   : > { %v1297_v37 = vadd.f32 %v1296_v20, %v1295_v15  ;;  %v1102_v13 = vadd.f32 %v1101_v44, %v1100_v18 }
 0x1c6   : > { %v1299_v28 = vadd.f32 %v1298_v25, %v1297_v37  ;;  %v1104_v49 = vadd.f32 %v1103_v57, %v1102_v13 }
 0x1c8   : > { %v1301_v33 = vadd.f32 %v1300_v32, %v1299_v28  ;;  %v1106_v34 = vadd.f32 %v1105_v9, %v1104_v49 }
 0x1ca   : > { %v1303_v31 = vadd.f32 %v1302_v60, %v1301_v33  ;;  %v1108_v39 = vadd.f32 %v1107_v23, %v1106_v34 }
 0x1cc   : > { %v1305_v45 = vadd.f32 %v1304_v36, %v1303_v31  ;;  %v1110_v53 = vadd.f32 %v1109_v8, %v1108_v39 }
 0x1ce   : > { %v1307_v19 = vadd.f32 %v1306_v46, %v1305_v45  ;;  %v1112_v47 = vadd.f32 %v1111_v41, %v1110_v53 }
 0x1d0   : > { %v1113_v50 = vrot.slane %v1112_v47, 4  ;;  %v1309_v52 = vadd.f32 %v1308_v40, %v1307_v19 }
 0x1d2   : > { %v1114_v54 = vadd.f32 %v1113_v50, %v1112_v47  ;;  %v1310_v30 = vrot.slane %v1309_v52, 4 }
 0x1d4   : > { %v1115_v51 = vrot.slane %v1114_v54, 2  ;;  %v1311_v43 = vadd.f32 %v1310_v30, %v1309_v52 }
 0x1d6   : > { %v1116_v5 = vadd.f32 %v1115_v51, %v1114_v54  ;;  %v1312_v56 = vrot.slane %v1311_v43, 2 }
 0x1d8   : > { %v1117_v58 = vrot.slane %v1116_v5, 1  ;;  %v1313_v21 = vadd.f32 %v1312_v56, %v1311_v43 }
 0x1da   : > { %v1314_v42 = vrot.slane %v1313_v21, 1  ;;  %v1118_v62 = vadd.f32 %v1117_v58, %v1116_v5 }
 0x1dc   : > { %v1315_v61 = vadd.f32 %v1314_v42, %v1313_v21 }
 0x1de   : > { %v1317_v63 = vsel %vm1316_vm2, %v1118_v62, %v1315_v61 }
 0x1df   : > { %1319 = vst.msk [vmem:[%s187_s5] sm:$0x3] %vm1318_vm3, %v1317_v63 }
 0x1e0 PF: > { %s14_s12 = sadd.s32 1, %s1568_s12  }
 0x1e1   : > { %p11_p5 = scmp.ge.s32.totalorder %s14_s12, 18  }
 0x1e3   :  { %13 = sbr.rel (!%p11_p5) target bundleno = 1 (0x1), region = 70 }

// kernel: tile.33
= control target key start
LH: loop header
LB: loop body
LE: loop exit
PB: predicated region body
PF: predicated region fallthrough
CT: control target
= control target key end

     0   :  { %s40_s0 = inlined_call_operand.vmem [shape: f32[4], index: 0, kind: input, shape index: {}]   ;;  %s41_s1 = inlined_call_operand.vmem [shape: f32[32,4], index: 1, kind: output, shape index: {}]  }
   0x1   :  { %v4_v0 = vld [vmem:[%s40_s0] ss:$0 sm:$0xff] }
   0x2   :  { %5 = vst [vmem:[%s41_s1] sm:$0xff] %v4_v0  ;;  %12 = vst [vmem:[%s41_s1 + $0x8] sm:$0xff] %v4_v0 }
   0x3   :  { %13 = vst [vmem:[%s41_s1 + $0x10] sm:$0xff] %v4_v0  ;;  %14 = vst [vmem:[%s41_s1 + $0x18] sm:$0xff] %v4_v0 }

// kernel: tile.34
= control target key start
LH: loop header
LB: loop body
LE: loop exit
PB: predicated region body
PF: predicated region fallthrough
CT: control target
= control target key end

     0   :  { %s259_s10 = smov 124   ;;  %s260_s11 = smov 116   ;;  %vm3_vm0 = vcmask 31744   ;;  %vm9_vm1 = vcmask 1048544   ;;  %vm15_vm2 = vcmask 1015744   ;;  %vm21_vm3 = vcmask 982944   ;;  %s399_s0 = inlined_call_operand.vmem [shape: f32[32,4], index: 0, kind: input, shape index: {}]   ;;  %s400_s1 = inlined_call_operand.vmem [shape: f32[1,128], index: 1, kind: output, shape index: {}]  }
   0x1   :  { %v197_v0 = vld [vmem:[%s399_s0 + $0x1f] sm:$0x1]   ;;  %v199_v1 = vld [vmem:[%s399_s0 + $0x1d] sm:$0x1]   ;;  %v198_v2 = vld [vmem:[%s399_s0 + $0x1e] sm:$0x1]  }
   0x2   :  { %7 = vrot.lane.b32.xlu0 %v197_v0, %s259_s10  ;;  %19 = vrot.lane.b32.xlu1 %v199_v1, %s260_s11  ;;  %v200_v3 = vld [vmem:[%s399_s0 + $0x1c] sm:$0x1]   ;;  %s261_s16 = smov 120   ;;  %s262_s17 = smov 112   ;;  %v201_v4 = vld [vmem:[%s399_s0 + $0x1b] sm:$0x1]  }
   0x3   :  { %v202_v5 = vld [vmem:[%s399_s0 + $0x1a] sm:$0x1]   ;;  %s263_s22 = smov 108   ;;  %s264_s23 = smov 104   ;;  %v203_v6 = vld [vmem:[%s399_s0 + $0x19] sm:$0x1]  }
   0x4   :  { %v204_v7 = vld [vmem:[%s399_s0 + $0x18] sm:$0x1]   ;;  %s265_s28 = smov 100   ;;  %s266_s29 = smov 96   ;;  %v205_v8 = vld [vmem:[%s399_s0 + $0x17] sm:$0x1]  }
   0x5   :  { %v206_v9 = vld [vmem:[%s399_s0 + $0x16] sm:$0x1]   ;;  %v2_v10 = vld [vmem:[%s399_s0] sm:$0x1]   ;;  %s267_s7 = smov 92   ;;  %s268_s8 = smov 88  }
   0x6   :  { %13 = vrot.lane.b32.xlu0 %v198_v2, %s261_s16  ;;  %25 = vrot.lane.b32.xlu1 %v200_v3, %s262_s17  ;;  %4 = vst.msk [vmem:[#allocation0] sm:$0x1] %vm3_vm0, %v2_v10   ;;  %v207_v11 = vld [vmem:[%s399_s0 + $0x15] sm:$0x1]   ;;  %v208_v12 = vld [vmem:[%s399_s0 + $0x14] sm:$0x1]  }
   0x7   :  { %s269_s13 = smov 84   ;;  %s270_s14 = smov 80   ;;  %v209_v13 = vld [vmem:[%s399_s0 + $0x13] sm:$0x1]   ;;  %v210_v14 = vld [vmem:[%s399_s0 + $0x12] sm:$0x1]  }
   0x8   :  { %s271_s19 = smov 76   ;;  %s272_s20 = smov 72   ;;  %v211_v15 = vld [vmem:[%s399_s0 + $0x11] sm:$0x1]   ;;  %v212_v16 = vld [vmem:[%s399_s0 + $0x10] sm:$0x1]  }
   0x9   :  { %s273_s25 = smov 68   ;;  %s274_s26 = smov 64   ;;  %v213_v17 = vld [vmem:[%s399_s0 + $0xf] sm:$0x1]   ;;  %v214_v18 = vld [vmem:[%s399_s0 + $0xe] sm:$0x1]  }
   0xa   :  { %31 = vrot.lane.b32.xlu0 %v201_v4, %s263_s22  ;;  %37 = vrot.lane.b32.xlu1 %v202_v5, %s264_s23  ;;  %s275_s2 = smov 60   ;;  %s276_s3 = smov 56   ;;  %v215_v19 = vld [vmem:[%s399_s0 + $0xd] sm:$0x1]   ;;  %v216_v20 = vld [vmem:[%s399_s0 + $0xc] sm:$0x1]  }
   0xb   :  { %s278_s9 = smov 48   ;;  %v217_v21 = vld [vmem:[%s399_s0 + $0xb] sm:$0x1]   ;;  %v218_v22 = vld [vmem:[%s399_s0 + $0xa] sm:$0x1]   ;;  %s280_s15 = smov 40  }
   0xc   :  { %v219_v23 = vld [vmem:[%s399_s0 + $0x9] sm:$0x1]   ;;  %v220_v24 = vld [vmem:[%s399_s0 + $0x8] sm:$0x1]   ;;  %s282_s21 = smov 32   ;;  %s284_s27 = smov 24  }
   0xd   :  { %v221_v25 = vld [vmem:[%s399_s0 + $0x7] sm:$0x1]   ;;  %v222_v26 = vld [vmem:[%s399_s0 + $0x6] sm:$0x1]   ;;  %v223_v27 = vld [vmem:[%s399_s0 + $0x5] sm:$0x1]  }
   0xe   :  { %43 = vrot.lane.b32.xlu0 %v203_v6, %s265_s28  ;;  %49 = vrot.lane.b32.xlu1 %v204_v7, %s266_s29  ;;  %v224_v28 = vld [vmem:[%s399_s0 + $0x4] sm:$0x1]   ;;  %s286_s4 = smov 16   ;;  %v225_v29 = vld [vmem:[%s399_s0 + $0x3] sm:$0x1]   ;;  %s288_s10 = smov 8  }
   0xf   :  { %v226_v30 = vld [vmem:[%s399_s0 + $0x2] sm:$0x1]   ;;  %v227_v31 = vld [vmem:[%s399_s0 + $0x1] sm:$0x1]   ;;  %s289_s0 = smov 4   ;;  %vm27_vm4 = vcmask 950144  }
  0x10   :  { %vm33_vm5 = vcmask 917344   ;;  %vm39_vm6 = vcmask 884544   ;;  %vm45_vm7 = vcmask 851744   ;;  %vm51_vm8 = vcmask 818944  }
  0x11   :  { %vm57_vm9 = vcmask 786144   ;;  %vm63_vm10 = vcmask 753344   ;;  %vm69_vm11 = vcmask 720544   ;;  %vm75_vm12 = vcmask 687744  }
  0x12   :  { %55 = vrot.lane.b32.xlu0 %v205_v8, %s267_s7  ;;  %61 = vrot.lane.b32.xlu1 %v206_v9, %s268_s8  ;;  %s277_s8 = smov 52   ;;  %vm81_vm13 = vcmask 654944   ;;  %vm87_vm14 = vcmask 622144   ;;  %vm93_vm15 = vcmask 589344   ;;  %vm99_vm0 = vcmask 556544  }
  0x16   :  { %67 = vrot.lane.b32.xlu0 %v207_v11, %s269_s13  ;;  %73 = vrot.lane.b32.xlu1 %v208_v12, %s270_s14  ;;  %s279_s14 = smov 44  }
  0x1a   :  { %79 = vrot.lane.b32.xlu0 %v209_v13, %s271_s19  ;;  %85 = vrot.lane.b32.xlu1 %v210_v14, %s272_s20  ;;  %s281_s20 = smov 36  }
  0x1e   :  { %91 = vrot.lane.b32.xlu0 %v211_v15, %s273_s25  ;;  %97 = vrot.lane.b32.xlu1 %v212_v16, %s274_s26  ;;  %s283_s26 = smov 28  }
  0x22   :  { %103 = vrot.lane.b32.xlu0 %v213_v17, %s275_s2  ;;  %109 = vrot.lane.b32.xlu1 %v214_v18, %s276_s3  ;;  %s285_s3 = smov 20  }
  0x26   :  { %115 = vrot.lane.b32.xlu0 %v215_v19, %s277_s8  ;;  %121 = vrot.lane.b32.xlu1 %v216_v20, %s278_s9  ;;  %s287_s9 = smov 12  }
  0x2a   :  { %127 = vrot.lane.b32.xlu0 %v217_v21, %s279_s14  ;;  %133 = vrot.lane.b32.xlu1 %v218_v22, %s280_s15 }
  0x2e   :  { %139 = vrot.lane.b32.xlu0 %v219_v23, %s281_s20  ;;  %145 = vrot.lane.b32.xlu1 %v220_v24, %s282_s21 }
  0x32   :  { %151 = vrot.lane.b32.xlu0 %v221_v25, %s283_s26  ;;  %157 = vrot.lane.b32.xlu1 %v222_v26, %s284_s27 }
  0x36   :  { %163 = vrot.lane.b32.xlu0 %v223_v27, %s285_s3  ;;  %169 = vrot.lane.b32.xlu1 %v224_v28, %s286_s4 }
  0x3a   :  { %175 = vrot.lane.b32.xlu0 %v225_v29, %s287_s9  ;;  %181 = vrot.lane.b32.xlu1 %v226_v30, %s288_s10 }
  0x3e   :  { %187 = vrot.lane.b32.xlu0 %v227_v31, %s289_s0 }
  0x74   :  { %v8_v32 = vpop.permute.xlu0 %7   ;;  %v20_v33 = vpop.permute.xlu1 %19  }
  0x75   :  { %10 = vst.msk [vmem:[#allocation0] sm:$0x1] %vm9_vm1, %v8_v32   ;;  %vm105_vm1 = vcmask 523744  }
  0x78   :  { %v14_v34 = vpop.permute.xlu0 %13   ;;  %v26_v35 = vpop.permute.xlu1 %25  }
  0x79   :  { %16 = vst.msk [vmem:[#allocation0] sm:$0x1] %vm15_vm2, %v14_v34   ;;  %vm111_vm2 = vcmask 490944  }
  0x7a   :  { %22 = vst.msk [vmem:[#allocation0] sm:$0x1] %vm21_vm3, %v20_v33   ;;  %vm117_vm3 = vcmask 458144  }
  0x7b   :  { %28 = vst.msk [vmem:[#allocation0] sm:$0x1] %vm27_vm4, %v26_v35   ;;  %vm123_vm4 = vcmask 425344  }
  0x7c   :  { %v32_v36 = vpop.permute.xlu0 %31   ;;  %v38_v37 = vpop.permute.xlu1 %37  }
  0x7d   :  { %34 = vst.msk [vmem:[#allocation0] sm:$0x1] %vm33_vm5, %v32_v36   ;;  %vm129_vm5 = vcmask 392544  }
  0x7e   :  { %40 = vst.msk [vmem:[#allocation0] sm:$0x1] %vm39_vm6, %v38_v37   ;;  %vm135_vm6 = vcmask 359744  }
  0x80   :  { %v44_v38 = vpop.permute.xlu0 %43   ;;  %v50_v39 = vpop.permute.xlu1 %49  }
  0x81   :  { %46 = vst.msk [vmem:[#allocation0] sm:$0x1] %vm45_vm7, %v44_v38   ;;  %vm141_vm7 = vcmask 326944  }
  0x82   :  { %52 = vst.msk [vmem:[#allocation0] sm:$0x1] %vm51_vm8, %v50_v39   ;;  %vm147_vm8 = vcmask 294144  }
  0x84   :  { %v56_v40 = vpop.permute.xlu0 %55   ;;  %v62_v41 = vpop.permute.xlu1 %61  }
  0x85   :  { %58 = vst.msk [vmem:[#allocation0] sm:$0x1] %vm57_vm9, %v56_v40   ;;  %vm153_vm9 = vcmask 261344  }
  0x86   :  { %64 = vst.msk [vmem:[#allocation0] sm:$0x1] %vm63_vm10, %v62_v41   ;;  %vm159_vm10 = vcmask 228544  }
  0x88   :  { %v68_v42 = vpop.permute.xlu0 %67   ;;  %v74_v43 = vpop.permute.xlu1 %73  }
  0x89   :  { %70 = vst.msk [vmem:[#allocation0] sm:$0x1] %vm69_vm11, %v68_v42   ;;  %vm165_vm11 = vcmask 195744  }
  0x8a   :  { %76 = vst.msk [vmem:[#allocation0] sm:$0x1] %vm75_vm12, %v74_v43   ;;  %vm171_vm12 = vcmask 162944  }
  0x8c   :  { %v80_v44 = vpop.permute.xlu0 %79   ;;  %v86_v45 = vpop.permute.xlu1 %85  }
  0x8d   :  { %82 = vst.msk [vmem:[#allocation0] sm:$0x1] %vm81_vm13, %v80_v44   ;;  %vm177_vm13 = vcmask 130144  }
  0x8e   :  { %88 = vst.msk [vmem:[#allocation0] sm:$0x1] %vm87_vm14, %v86_v45   ;;  %vm183_vm14 = vcmask 97344  }
  0x90   :  { %v92_v46 = vpop.permute.xlu0 %91   ;;  %v98_v47 = vpop.permute.xlu1 %97  }
  0x91   :  { %94 = vst.msk [vmem:[#allocation0] sm:$0x1] %vm93_vm15, %v92_v46   ;;  %vm189_vm15 = vcmask 64544  }
  0x92   :  { %100 = vst.msk [vmem:[#allocation0] sm:$0x1] %vm99_vm0, %v98_v47  }
  0x94   :  { %v104_v48 = vpop.permute.xlu0 %103   ;;  %v110_v49 = vpop.permute.xlu1 %109  }
  0x95   :  { %106 = vst.msk [vmem:[#allocation0] sm:$0x1] %vm105_vm1, %v104_v48  }
  0x96   :  { %112 = vst.msk [vmem:[#allocation0] sm:$0x1] %vm111_vm2, %v110_v49  }
  0x98   :  { %v116_v50 = vpop.permute.xlu0 %115   ;;  %v122_v51 = vpop.permute.xlu1 %121  }
  0x99   :  { %118 = vst.msk [vmem:[#allocation0] sm:$0x1] %vm117_vm3, %v116_v50  }
  0x9a   :  { %124 = vst.msk [vmem:[#allocation0] sm:$0x1] %vm123_vm4, %v122_v51  }
  0x9c   :  { %v128_v52 = vpop.permute.xlu0 %127   ;;  %v134_v53 = vpop.permute.xlu1 %133  }
  0x9d   :  { %130 = vst.msk [vmem:[#allocation0] sm:$0x1] %vm129_vm5, %v128_v52  }
  0x9e   :  { %136 = vst.msk [vmem:[#allocation0] sm:$0x1] %vm135_vm6, %v134_v53  }
  0xa0   :  { %v140_v54 = vpop.permute.xlu0 %139   ;;  %v146_v55 = vpop.permute.xlu1 %145  }
  0xa1   :  { %142 = vst.msk [vmem:[#allocation0] sm:$0x1] %vm141_vm7, %v140_v54  }
  0xa2   :  { %148 = vst.msk [vmem:[#allocation0] sm:$0x1] %vm147_vm8, %v146_v55  }
  0xa4   :  { %v152_v56 = vpop.permute.xlu0 %151   ;;  %v158_v57 = vpop.permute.xlu1 %157  }
  0xa5   :  { %154 = vst.msk [vmem:[#allocation0] sm:$0x1] %vm153_vm9, %v152_v56  }
  0xa6   :  { %160 = vst.msk [vmem:[#allocation0] sm:$0x1] %vm159_vm10, %v158_v57  }
  0xa8   :  { %v164_v58 = vpop.permute.xlu0 %163   ;;  %v170_v59 = vpop.permute.xlu1 %169  }
  0xa9   :  { %166 = vst.msk [vmem:[#allocation0] sm:$0x1] %vm165_vm11, %v164_v58  }
  0xaa   :  { %172 = vst.msk [vmem:[#allocation0] sm:$0x1] %vm171_vm12, %v170_v59  }
  0xac   :  { %v176_v60 = vpop.permute.xlu0 %175   ;;  %v182_v61 = vpop.permute.xlu1 %181  }
  0xad   :  { %178 = vst.msk [vmem:[#allocation0] sm:$0x1] %vm177_vm13, %v176_v60  }
  0xae   :  { %184 = vst.msk [vmem:[#allocation0] sm:$0x1] %vm183_vm14, %v182_v61  }
  0xb0   :  { %v188_v62 = vpop.permute.xlu0 %187  }
  0xb1   :  { %190 = vst.msk [vmem:[#allocation0] sm:$0x1] %vm189_vm15, %v188_v62  }
  0xb8   :  { %v194_v63 = vld [vmem:[#allocation0] sm:$0x1] }
  0xb9   :  { %196 = vst [vmem:[%s400_s1] sm:$0x1] %v194_v63 }

// kernel: up_forward.7
= control target key start
LH: loop header
LB: loop body
LE: loop exit
PB: predicated region body
PF: predicated region fallthrough
CT: control target
= control target key end

     0   :  { %s480_s0 = inlined_call_operand.vmem [shape: f32[256,128], index: 0, kind: input, shape index: {}]   ;;  %s481_s1 = inlined_call_operand.vmem [shape: f32[1,128], index: 1, kind: input, shape index: {}]   ;;  %s482_s2 = inlined_call_operand.vmem [shape: f32[1,128], index: 2, kind: input, shape index: {}]   ;;  %s483_s3 = inlined_call_operand.vmem [shape: f32[256,128], index: 3, kind: output, shape index: {}]  }
   0x1   :  { %v14_v0 = vld [vmem:[%s480_s0] sm:$0xff]  ;;  %v15_v4 = vld [vmem:[%s480_s0 + $0x8] sm:$0xff]  ;;  %v16_v5 = vld [vmem:[%s480_s0 + $0x10] sm:$0xff] }
   0x2   :  { %v220_v1 = vld [vmem:[%s481_s1] ss:$0 sm:$0xff]  ;;  %v17_v6 = vld [vmem:[%s480_s0 + $0x18] sm:$0xff]  ;;  %v19_v11 = vld [vmem:[%s480_s0 + $0x28] sm:$0xff] }
   0x3   :  { %v225_v2 = vld [vmem:[%s482_s2] ss:$0 sm:$0xff]  ;;  %v53_v3 = vmul.f32 %v220_v1, %v14_v0  ;;  %v54_v7 = vmul.f32 %v220_v1, %v15_v4  ;;  %v55_v8 = vmul.f32 %v220_v1, %v16_v5  ;;  %v56_v9 = vmul.f32 %v220_v1, %v17_v6  ;;  %v20_v12 = vld [vmem:[%s480_s0 + $0x30] sm:$0xff]  ;;  %v21_v17 = vld [vmem:[%s480_s0 + $0x38] sm:$0xff] }
   0x4   :  { %v18_v10 = vld [vmem:[%s480_s0 + $0x20] sm:$0xff]  ;;  %v58_v15 = vmul.f32 %v220_v1, %v19_v11  ;;  %v59_v16 = vmul.f32 %v220_v1, %v20_v12  ;;  %v60_v21 = vmul.f32 %v220_v1, %v21_v17  ;;  %v23_v27 = vld [vmem:[%s480_s0 + $0x48] sm:$0xff]  ;;  %v24_v28 = vld [vmem:[%s480_s0 + $0x50] sm:$0xff] }
   0x5   :  { %v92_v13 = vadd.f32 %v225_v2, %v53_v3  ;;  %v57_v14 = vmul.f32 %v220_v1, %v18_v10  ;;  %v93_v18 = vadd.f32 %v225_v2, %v54_v7  ;;  %v94_v19 = vadd.f32 %v225_v2, %v55_v8  ;;  %v22_v22 = vld [vmem:[%s480_s0 + $0x40] sm:$0xff]  ;;  %v25_v29 = vld [vmem:[%s480_s0 + $0x58] sm:$0xff]  ;;  %v27_v35 = vld [vmem:[%s480_s0 + $0x68] sm:$0xff] }
   0x6   :  { %v95_v20 = vadd.f32 %v225_v2, %v56_v9  ;;  %v97_v25 = vadd.f32 %v225_v2, %v58_v15  ;;  %v98_v26 = vadd.f32 %v225_v2, %v59_v16  ;;  %v99_v33 = vadd.f32 %v225_v2, %v60_v21  ;;  %v26_v34 = vld [vmem:[%s480_s0 + $0x60] sm:$0xff]  ;;  %v28_v36 = vld [vmem:[%s480_s0 + $0x70] sm:$0xff]  ;;  %v29_v41 = vld [vmem:[%s480_s0 + $0x78] sm:$0xff] }
   0x7   :  { %v124_v23 = vmax.f32 %v92_v13, 0.0  ;;  %v96_v24 = vadd.f32 %v225_v2, %v57_v14  ;;  %v125_v30 = vmax.f32 %v93_v18, 0.0  ;;  %v126_v31 = vmax.f32 %v94_v19, 0.0  ;;  %v30_v54 = vld [vmem:[%s480_s0 + $0x80] sm:$0xff]  ;;  %v31_v59 = vld [vmem:[%s480_s0 + $0x88] sm:$0xff]  ;;  %v32_v60 = vld [vmem:[%s480_s0 + $0x90] sm:$0xff] }
   0x8   :  { %v127_v32 = vmax.f32 %v95_v20, 0.0  ;;  %v129_v38 = vmax.f32 %v97_v25, 0.0  ;;  %v130_v39 = vmax.f32 %v98_v26, 0.0  ;;  %v61_v40 = vmul.f32 %v220_v1, %v22_v22  ;;  %v33_v61 = vld [vmem:[%s480_s0 + $0x98] sm:$0xff]  ;;  %v34_v4 = vld [vmem:[%s480_s0 + $0xa0] sm:$0xff]  ;;  %v35_v5 = vld [vmem:[%s480_s0 + $0xa8] sm:$0xff] }
   0x9   :  { %156 = vst [vmem:[%s483_s3] sm:$0xff] %v124_v23  ;;  %v128_v37 = vmax.f32 %v96_v24, 0.0  ;;  %157 = vst [vmem:[%s483_s3 + $0x8] sm:$0xff] %v125_v30  ;;  %v131_v42 = vmax.f32 %v99_v33, 0.0  ;;  %v62_v43 = vmul.f32 %v220_v1, %v23_v27  ;;  %v63_v44 = vmul.f32 %v220_v1, %v24_v28  ;;  %v36_v6 = vld [vmem:[%s480_s0 + $0xb0] sm:$0xff]  ;;  %v37_v11 = vld [vmem:[%s480_s0 + $0xb8] sm:$0xff] }
   0xa   :  { %158 = vst [vmem:[%s483_s3 + $0x10] sm:$0xff] %v126_v31  ;;  %159 = vst [vmem:[%s483_s3 + $0x18] sm:$0xff] %v127_v32  ;;  %v64_v45 = vmul.f32 %v220_v1, %v25_v29  ;;  %v100_v46 = vadd.f32 %v225_v2, %v61_v40  ;;  %v65_v47 = vmul.f32 %v220_v1, %v26_v34  ;;  %v38_v24 = vld [vmem:[%s480_s0 + $0xc0] sm:$0xff]  ;;  %v39_v29 = vld [vmem:[%s480_s0 + $0xc8] sm:$0xff] }
   0xb   :  { %160 = vst [vmem:[%s483_s3 + $0x20] sm:$0xff] %v128_v37  ;;  %161 = vst [vmem:[%s483_s3 + $0x28] sm:$0xff] %v129_v38  ;;  %v66_v48 = vmul.f32 %v220_v1, %v27_v35  ;;  %v67_v49 = vmul.f32 %v220_v1, %v28_v36  ;;  %v101_v50 = vadd.f32 %v225_v2, %v62_v43  ;;  %v40_v30 = vld [vmem:[%s480_s0 + $0xd0] sm:$0xff]  ;;  %v41_v31 = vld [vmem:[%s480_s0 + $0xd8] sm:$0xff] }
   0xc   :  { %162 = vst [vmem:[%s483_s3 + $0x30] sm:$0xff] %v130_v39  ;;  %163 = vst [vmem:[%s483_s3 + $0x38] sm:$0xff] %v131_v42  ;;  %v102_v51 = vadd.f32 %v225_v2, %v63_v44  ;;  %v103_v52 = vadd.f32 %v225_v2, %v64_v45  ;;  %v68_v53 = vmul.f32 %v220_v1, %v29_v41  ;;  %v132_v55 = vmax.f32 %v100_v46, 0.0  ;;  %v42_v36 = vld [vmem:[%s480_s0 + $0xe0] sm:$0xff]  ;;  %v43_v37 = vld [vmem:[%s480_s0 + $0xe8] sm:$0xff] }
   0xd   :  { %v104_v56 = vadd.f32 %v225_v2, %v65_v47  ;;  %v105_v57 = vadd.f32 %v225_v2, %v66_v48  ;;  %v106_v58 = vadd.f32 %v225_v2, %v67_v49  ;;  %v133_v62 = vmax.f32 %v101_v50, 0.0  ;;  %v44_v38 = vld [vmem:[%s480_s0 + $0xf0] sm:$0xff]  ;;  %v45_v43 = vld [vmem:[%s480_s0 + $0xf8] sm:$0xff] }
   0xe   :  { %v134_v63 = vmax.f32 %v102_v51, 0.0  ;;  %v135_v0 = vmax.f32 %v103_v52, 0.0  ;;  %v107_v3 = vadd.f32 %v225_v2, %v68_v53  ;;  %164 = vst [vmem:[%s483_s3 + $0x40] sm:$0xff] %v132_v55  ;;  %v69_v10 = vmul.f32 %v220_v1, %v30_v54 }
   0xf   :  { %v136_v7 = vmax.f32 %v104_v56, 0.0  ;;  %v137_v8 = vmax.f32 %v105_v57, 0.0  ;;  %v138_v9 = vmax.f32 %v106_v58, 0.0  ;;  %165 = vst [vmem:[%s483_s3 + $0x48] sm:$0xff] %v133_v62  ;;  %v70_v13 = vmul.f32 %v220_v1, %v31_v59 }
  0x10   :  { %166 = vst [vmem:[%s483_s3 + $0x50] sm:$0xff] %v134_v63  ;;  %167 = vst [vmem:[%s483_s3 + $0x58] sm:$0xff] %v135_v0  ;;  %v139_v12 = vmax.f32 %v107_v3, 0.0  ;;  %v71_v14 = vmul.f32 %v220_v1, %v32_v60  ;;  %v72_v15 = vmul.f32 %v220_v1, %v33_v61  ;;  %v108_v16 = vadd.f32 %v225_v2, %v69_v10 }
  0x11   :  { %168 = vst [vmem:[%s483_s3 + $0x60] sm:$0xff] %v136_v7  ;;  %169 = vst [vmem:[%s483_s3 + $0x68] sm:$0xff] %v137_v8  ;;  %v73_v17 = vmul.f32 %v220_v1, %v34_v4  ;;  %v74_v18 = vmul.f32 %v220_v1, %v35_v5  ;;  %v75_v19 = vmul.f32 %v220_v1, %v36_v6 }
  0x12   :  { %170 = vst [vmem:[%s483_s3 + $0x70] sm:$0xff] %v138_v9  ;;  %171 = vst [vmem:[%s483_s3 + $0x78] sm:$0xff] %v139_v12  ;;  %v109_v20 = vadd.f32 %v225_v2, %v70_v13  ;;  %v110_v21 = vadd.f32 %v225_v2, %v71_v14  ;;  %v111_v22 = vadd.f32 %v225_v2, %v72_v15  ;;  %v140_v25 = vmax.f32 %v108_v16, 0.0 }
  0x13   :  { %v76_v23 = vmul.f32 %v220_v1, %v37_v11  ;;  %v112_v26 = vadd.f32 %v225_v2, %v73_v17  ;;  %v113_v27 = vadd.f32 %v225_v2, %v74_v18  ;;  %v114_v28 = vadd.f32 %v225_v2, %v75_v19 }
  0x14   :  { %v141_v32 = vmax.f32 %v109_v20, 0.0  ;;  %v142_v33 = vmax.f32 %v110_v21, 0.0  ;;  %v143_v34 = vmax.f32 %v111_v22, 0.0  ;;  %172 = vst [vmem:[%s483_s3 + $0x80] sm:$0xff] %v140_v25  ;;  %v77_v42 = vmul.f32 %v220_v1, %v38_v24 }
  0x15   :  { %v115_v35 = vadd.f32 %v225_v2, %v76_v23  ;;  %v144_v39 = vmax.f32 %v112_v26, 0.0  ;;  %v145_v40 = vmax.f32 %v113_v27, 0.0  ;;  %v146_v41 = vmax.f32 %v114_v28, 0.0 }
  0x16   :  { %173 = vst [vmem:[%s483_s3 + $0x88] sm:$0xff] %v141_v32  ;;  %174 = vst [vmem:[%s483_s3 + $0x90] sm:$0xff] %v142_v33  ;;  %v78_v45 = vmul.f32 %v220_v1, %v39_v29  ;;  %v79_v46 = vmul.f32 %v220_v1, %v40_v30  ;;  %v80_v47 = vmul.f32 %v220_v1, %v41_v31 }
  0x17   :  { %175 = vst [vmem:[%s483_s3 + $0x98] sm:$0xff] %v143_v34  ;;  %v147_v44 = vmax.f32 %v115_v35, 0.0  ;;  %176 = vst [vmem:[%s483_s3 + $0xa0] sm:$0xff] %v144_v39  ;;  %v116_v48 = vadd.f32 %v225_v2, %v77_v42  ;;  %v81_v49 = vmul.f32 %v220_v1, %v42_v36  ;;  %v82_v50 = vmul.f32 %v220_v1, %v43_v37 }
  0x18   :  { %177 = vst [vmem:[%s483_s3 + $0xa8] sm:$0xff] %v145_v40  ;;  %178 = vst [vmem:[%s483_s3 + $0xb0] sm:$0xff] %v146_v41  ;;  %v83_v51 = vmul.f32 %v220_v1, %v44_v38  ;;  %v117_v52 = vadd.f32 %v225_v2, %v78_v45  ;;  %v118_v53 = vadd.f32 %v225_v2, %v79_v46 }
  0x19   :  { %179 = vst [vmem:[%s483_s3 + $0xb8] sm:$0xff] %v147_v44  ;;  %v119_v54 = vadd.f32 %v225_v2, %v80_v47  ;;  %v84_v55 = vmul.f32 %v220_v1, %v45_v43  ;;  %v148_v56 = vmax.f32 %v116_v48, 0.0  ;;  %v120_v57 = vadd.f32 %v225_v2, %v81_v49 }
  0x1a   :  { %v121_v58 = vadd.f32 %v225_v2, %v82_v50  ;;  %v122_v59 = vadd.f32 %v225_v2, %v83_v51  ;;  %v149_v60 = vmax.f32 %v117_v52, 0.0  ;;  %v150_v61 = vmax.f32 %v118_v53, 0.0 }
  0x1b   :  { %v151_v62 = vmax.f32 %v119_v54, 0.0  ;;  %v123_v63 = vadd.f32 %v225_v2, %v84_v55  ;;  %180 = vst [vmem:[%s483_s3 + $0xc0] sm:$0xff] %v148_v56  ;;  %v152_v0 = vmax.f32 %v120_v57, 0.0 }
  0x1c   :  { %v153_v3 = vmax.f32 %v121_v58, 0.0  ;;  %v154_v4 = vmax.f32 %v122_v59, 0.0  ;;  %181 = vst [vmem:[%s483_s3 + $0xc8] sm:$0xff] %v149_v60  ;;  %182 = vst [vmem:[%s483_s3 + $0xd0] sm:$0xff] %v150_v61 }
  0x1d   :  { %183 = vst [vmem:[%s483_s3 + $0xd8] sm:$0xff] %v151_v62  ;;  %v155_v1 = vmax.f32 %v123_v63, 0.0  ;;  %184 = vst [vmem:[%s483_s3 + $0xe0] sm:$0xff] %v152_v0 }
  0x1e   :  { %185 = vst [vmem:[%s483_s3 + $0xe8] sm:$0xff] %v153_v3  ;;  %186 = vst [vmem:[%s483_s3 + $0xf0] sm:$0xff] %v154_v4 }
  0x1f   :  { %187 = vst [vmem:[%s483_s3 + $0xf8] sm:$0xff] %v155_v1 }

// kernel: up_forward.8
= control target key start
LH: loop header
LB: loop body
LE: loop exit
PB: predicated region body
PF: predicated region fallthrough
CT: control target
= control target key end

     0   :  { %s1692_s12 = smov 0   ;;  %s2346_s0 = inlined_call_operand.vmem [shape: f32[8192,108], index: 0, kind: input, shape index: {}]   ;;  %s2347_s1 = inlined_call_operand.vmem [shape: f32[108,4], index: 1, kind: input, shape index: {}]   ;;  %s2348_s2 = inlined_call_operand.vmem [shape: f32[8192,4], index: 2, kind: output, shape index: {0}]   ;;  %s2349_s3 = inlined_call_operand.vmem [shape: f32[16,2,4], index: 3, kind: output, shape index: {1}]  }
   0x1 LB: > { %s1698_s13 = sadd.s32 4294967295, %s1669_s12   ;;  %p1335_p0 = scmp.ge.s32.totalorder %s1669_s12, 1  ;;  %s1669_s12 = sphi %s1692_s12, %s14_s12  }
   0x2   : > { %p141_p1 = scmp.lt.s32.totalorder %s1669_s12, 17 }
   0x4   : > { %p142_p2 = pnand %p1335_p0, %p141_p1 }
   0x5   : > { %v249_v0 = vld [vmem:[%s2347_s1] sm:$0xff] (!%p142_p2)  ;;  %v250_v1 = vld [vmem:[%s2347_s1 + $0x8] sm:$0xff] (!%p142_p2)  ;;  %v251_v2 = vld [vmem:[%s2347_s1 + $0x10] sm:$0xff] (!%p142_p2)  ;;  %s1336_s20 = sshll.u32 (!%p142_p2), %s1698_s13, 6  ;;  %vm263_vm0 = vcmask (!%p142_p2), 883712   ;;  %vm456_vm1 = vcmask (!%p142_p2), 1043456  }
   0x6   : > { %145 = sbr.rel (%p142_p2) target bundleno = 394 (0x18a), region = 28  ;;  %v1610_v3 = vpack.c.bf16 (!%p142_p2), %v250_v1, %v249_v0  ;;  %v252_v4 = vld [vmem:[%s2347_s1 + $0x18] sm:$0xff] (!%p142_p2)  ;;  %p170_p3 = scmp.lt.s32.totalorder (!%p142_p2), %s1336_s20, 1023  ;;  %v253_v6 = vld [vmem:[%s2347_s1 + $0x20] sm:$0xff] (!%p142_p2)  ;;  %v254_v7 = vld [vmem:[%s2347_s1 + $0x28] sm:$0xff] (!%p142_p2)  ;;  %vm1671_vm2 = vmmov (!%p142_p2), 1  }
   0x7   : > { %v1614_v5 = vpack.c.bf16 (!%p142_p2), %v252_v4, %v251_v2  ;;  %v1618_v8 = vpack.c.bf16 (!%p142_p2), %v254_v7, %v253_v6  ;;  %v255_v9 = vld [vmem:[%s2347_s1 + $0x30] sm:$0xff] (!%p142_p2)  ;;  %v256_v10 = vld [vmem:[%s2347_s1 + $0x38] sm:$0xff] (!%p142_p2)  ;;  %v257_v13 = vld [vmem:[%s2347_s1 + $0x40] sm:$0xff] (!%p142_p2)  ;;  %vm845_vm4 = vcmask (!%p142_p2), 31744   ;;  %p181_p4 = scmp.lt.s32.totalorder (!%p142_p2), %s1698_s13, 15  ;;  %vm1240_vm5 = vcmask (!%p142_p2), 1040384  }
   0x8   : > { %1611 = vmatprep.subr.bf16.mxu0 (!%p142_p2), %v1610_v3  ;;  %1640 = vmatprep.subr.bf16.mxu1 (!%p142_p2), %v1610_v3  ;;  %v1622_v12 = vpack.c.bf16 (!%p142_p2), %v256_v10, %v255_v9  ;;  %v258_v14 = vld [vmem:[%s2347_s1 + $0x48] sm:$0xff] (!%p142_p2)  ;;  %v259_v16 = vld [vmem:[%s2347_s1 + $0x50] sm:$0xff] (!%p142_p2)  ;;  %v260_v17 = vld [vmem:[%s2347_s1 + $0x58] sm:$0xff] (!%p142_p2)  ;;  %vm1242_vm6 = vcmask (!%p142_p2), 25600  }
   0x9   : > { %1613 = vmatpush3.bf16.msra.mxu0 (!%p142_p2), %v1610_v3  ;;  %1647 = vmatpush3.bf16.msra.mxu1 (!%p142_p2), %v1610_v3  ;;  %v1626_v15 = vpack.c.bf16 (!%p142_p2), %v258_v14, %v257_v13  ;;  %v1630_v18 = vpack.c.bf16 (!%p142_p2), %v260_v17, %v259_v16  ;;  %v261_v20 = vld [vmem:[%s2347_s1 + $0x60] sm:$0xff] (!%p142_p2)  ;;  %v262_v21 = vld [vmem:[%s2347_s1 + $0x68] sm:$0xf] (!%p142_p2)  ;;  %vm1635_vm3 = vmpackc.low (!%p142_p2), %vm456_vm1, %vm1671_vm2 }
   0xa   : > { %1615 = vmatprep.subr.bf16.mxu0 (!%p142_p2), %v1614_v5  ;;  %1641 = vmatprep.subr.bf16.mxu1 (!%p142_p2), %v1614_v5  ;;  %v1634_v22 = vpack.c.bf16 (!%p142_p2), %v262_v21, %v261_v20 }
   0xd   : > { %s2351_s20 = smov (!%p170_p3, %s1336_s20), 1023  ;;  %1617 = vmatpush3.bf16.msra.mxu0 %v1614_v5  ;;  %1648 = vmatpush3.bf16.msra.mxu1 %v1614_v5  ;;  %s2353_s13 = smov (!%p181_p4, %s1698_s13), 15 }
   0xe   : > { %s1337_s27 = sshll.u32 %s2351_s20, 3  ;;  %1619 = vmatprep.subr.bf16.mxu0 %v1618_v8  ;;  %1642 = vmatprep.subr.bf16.mxu1 %v1618_v8  ;;  %s1340_s20 = sshll.u32 %s2353_s13, 1 }
   0xf   : > { %s1735_s7 = scalar_lea.vmem %s2346_s0, %s1337_s27  ;;  %s1888_s25 = scalar_lea.vmem %s2348_s2, %s1337_s27 }
  0x10   : > { %v185_v11 = vld [vmem:[%s1735_s7] sm:$0xff]  ;;  %v186_v23 = vld [vmem:[%s1735_s7 + $0x8] sm:$0xff]  ;;  %v187_v24 = vld [vmem:[%s1735_s7 + $0x10] sm:$0xff]  ;;  %s184_s28 = scalar_lea.vmem %s2349_s3, %s1340_s20 }
  0x11   : > { %1514 = vmatprep.mubr.msk.f32.mxu0 %vm263_vm0, %v185_v11  ;;  %1621 = vmatpush3.bf16.msra.mxu0 %v1618_v8  ;;  %v217_v19 = vld [vmem:[%s1735_s7 + $0x100] sm:$0xff]  ;;  %v218_v25 = vld [vmem:[%s1735_s7 + $0x108] sm:$0xff]  ;;  %v219_v26 = vld [vmem:[%s1735_s7 + $0x110] sm:$0xff] }
  0x12   : > { %1623 = vmatprep.subr.bf16.mxu0 %v1622_v12  ;;  %1649 = vmatpush3.bf16.msra.mxu1 %v1618_v8  ;;  %v188_v27 = vld [vmem:[%s1735_s7 + $0x18] sm:$0xff]  ;;  %v189_v28 = vld [vmem:[%s1735_s7 + $0x20] sm:$0xff]  ;;  %v190_v31 = vld [vmem:[%s1735_s7 + $0x28] sm:$0xff] }
  0x13   : > { %1643 = vmatprep.subr.bf16.mxu1 %v1622_v12  ;;  %1562 = vmatprep.mubr.msk.f32.mxu1 %vm263_vm0, %v217_v19  ;;  %v220_v29 = vld [vmem:[%s1735_s7 + $0x118] sm:$0xff]  ;;  %v221_v30 = vld [vmem:[%s1735_s7 + $0x120] sm:$0xff]  ;;  %v191_v32 = vld [vmem:[%s1735_s7 + $0x30] sm:$0xff] }
  0x14   : > { %v222_v33 = vld [vmem:[%s1735_s7 + $0x128] sm:$0xff]  ;;  %v223_v34 = vld [vmem:[%s1735_s7 + $0x130] sm:$0xff]  ;;  %v192_v35 = vld [vmem:[%s1735_s7 + $0x38] sm:$0xff] }
  0x15   : > { %1625 = vmatpush3.bf16.msra.mxu0 %v1622_v12  ;;  %v193_v36 = vld [vmem:[%s1735_s7 + $0x40] sm:$0xff]  ;;  %v224_v37 = vld [vmem:[%s1735_s7 + $0x138] sm:$0xff]  ;;  %v194_v39 = vld [vmem:[%s1735_s7 + $0x48] sm:$0xff] }
  0x16   : > { %1627 = vmatprep.subr.bf16.mxu0 %v1626_v15  ;;  %1650 = vmatpush3.bf16.msra.mxu1 %v1622_v12  ;;  %v225_v38 = vld [vmem:[%s1735_s7 + $0x140] sm:$0xff]  ;;  %v195_v40 = vld [vmem:[%s1735_s7 + $0x50] sm:$0xff]  ;;  %v226_v41 = vld [vmem:[%s1735_s7 + $0x148] sm:$0xff] }
  0x17   : > { %1644 = vmatprep.subr.bf16.mxu1 %v1626_v15  ;;  %v227_v42 = vld [vmem:[%s1735_s7 + $0x150] sm:$0xff]  ;;  %v196_v43 = vld [vmem:[%s1735_s7 + $0x58] sm:$0xff]  ;;  %v197_v44 = vld [vmem:[%s1735_s7 + $0x60] sm:$0xff] }
  0x18   : > { %v228_v45 = vld [vmem:[%s1735_s7 + $0x158] sm:$0xff]  ;;  %v229_v46 = vld [vmem:[%s1735_s7 + $0x160] sm:$0xff]  ;;  %v198_v47 = vld [vmem:[%s1735_s7 + $0x68] sm:$0xff] }
  0x19   : > { %1629 = vmatpush3.bf16.msra.mxu0 %v1626_v15  ;;  %v199_v48 = vld [vmem:[%s1735_s7 + $0x70] sm:$0xff]  ;;  %v230_v49 = vld [vmem:[%s1735_s7 + $0x168] sm:$0xff]  ;;  %v200_v51 = vld [vmem:[%s1735_s7 + $0x78] sm:$0xff] }
  0x1a   : > { %1631 = vmatprep.subr.bf16.mxu0 %v1630_v18  ;;  %1651 = vmatpush3.bf16.msra.mxu1 %v1626_v15  ;;  %v231_v50 = vld [vmem:[%s1735_s7 + $0x170] sm:$0xff]  ;;  %v201_v52 = vld [vmem:[%s1735_s7 + $0x80] sm:$0xff]  ;;  %v232_v53 = vld [vmem:[%s1735_s7 + $0x178] sm:$0xff] }
  0x1b   : > { %1645 = vmatprep.subr.bf16.mxu1 %v1630_v18  ;;  %v233_v54 = vld [vmem:[%s1735_s7 + $0x180] sm:$0xff]  ;;  %v202_v55 = vld [vmem:[%s1735_s7 + $0x88] sm:$0xff]  ;;  %v203_v56 = vld [vmem:[%s1735_s7 + $0x90] sm:$0xff] }
  0x1c   : > { %v234_v57 = vld [vmem:[%s1735_s7 + $0x188] sm:$0xff]  ;;  %v235_v58 = vld [vmem:[%s1735_s7 + $0x190] sm:$0xff]  ;;  %v204_v59 = vld [vmem:[%s1735_s7 + $0x98] sm:$0xff] }
  0x1d   : > { %1633 = vmatpush3.bf16.msra.mxu0 %v1630_v18  ;;  %v205_v60 = vld [vmem:[%s1735_s7 + $0xa0] sm:$0xff]  ;;  %v236_v61 = vld [vmem:[%s1735_s7 + $0x198] sm:$0xff]  ;;  %v206_v63 = vld [vmem:[%s1735_s7 + $0xa8] sm:$0xff] }
  0x1e   : > { %1636 = vmatprep.subr.msk.bf16.mxu0 %vm1635_vm3, %v1634_v22  ;;  %1652 = vmatpush3.bf16.msra.mxu1 %v1630_v18  ;;  %v237_v62 = vld [vmem:[%s1735_s7 + $0x1a0] sm:$0xff]  ;;  %v207_v0 = vld [vmem:[%s1735_s7 + $0xb0] sm:$0xff]  ;;  %v238_v1 = vld [vmem:[%s1735_s7 + $0x1a8] sm:$0xff] }
  0x1f   : > { %1646 = vmatprep.subr.msk.bf16.mxu1 %vm1635_vm3, %v1634_v22  ;;  %v239_v2 = vld [vmem:[%s1735_s7 + $0x1b0] sm:$0xff]  ;;  %v208_v3 = vld [vmem:[%s1735_s7 + $0xb8] sm:$0xff]  ;;  %v209_v4 = vld [vmem:[%s1735_s7 + $0xc0] sm:$0xff] }
  0x20   : > { %v240_v5 = vld [vmem:[%s1735_s7 + $0x1b8] sm:$0xff]  ;;  %v241_v6 = vld [vmem:[%s1735_s7 + $0x1c0] sm:$0xff]  ;;  %v210_v7 = vld [vmem:[%s1735_s7 + $0xc8] sm:$0xff] }
  0x21   : > { %1639 = vmatpush3.bf16.msk.msra.mxu0 %vm1635_vm3, %v1634_v22  ;;  %v211_v8 = vld [vmem:[%s1735_s7 + $0xd0] sm:$0xff]  ;;  %v242_v9 = vld [vmem:[%s1735_s7 + $0x1c8] sm:$0xff]  ;;  %v212_v11 = vld [vmem:[%s1735_s7 + $0xd8] sm:$0xff] }
  0x22   : > { %1653 = vmatpush3.bf16.msk.msra.mxu1 %vm1635_vm3, %v1634_v22  ;;  %v243_v10 = vld [vmem:[%s1735_s7 + $0x1d0] sm:$0xff]  ;;  %v213_v12 = vld [vmem:[%s1735_s7 + $0xe0] sm:$0xff]  ;;  %v244_v13 = vld [vmem:[%s1735_s7 + $0x1d8] sm:$0xff] }
  0x23   : > { %v245_v14 = vld [vmem:[%s1735_s7 + $0x1e0] sm:$0xff]  ;;  %v214_v15 = vld [vmem:[%s1735_s7 + $0xe8] sm:$0xff]  ;;  %v215_v16 = vld [vmem:[%s1735_s7 + $0xf0] sm:$0xff] }
  0x24   : > { %1515 = vmatmul.mubr.msk.f32.vlgmr.msra.gmra.mrb[0].mxu0 %vm263_vm0, %v186_v23  ;;  %v246_v17 = vld [vmem:[%s1735_s7 + $0x1e8] sm:$0xff]  ;;  %v247_v18 = vld [vmem:[%s1735_s7 + $0x1f0] sm:$0xff]  ;;  %v216_v19 = vld [vmem:[%s1735_s7 + $0xf8] sm:$0xff] }
  0x25   : > { %1517 = vmatprep.mubr.msk.f32.mxu0 %vm263_vm0, %v187_v24  ;;  %1563 = vmatmul.mubr.msk.f32.vlgmr.msra.gmra.mrb[0].mxu1 %vm263_vm0, %v218_v25  ;;  %v248_v20 = vld [vmem:[%s1735_s7 + $0x1f8] sm:$0xff] }
  0x26   : > { %1565 = vmatprep.mubr.msk.f32.mxu1 %vm263_vm0, %v219_v26 }
  0x28   : > { %1518 = vmatmul.mubr.msk.f32.gmra.mrb[2].mxu0 %vm263_vm0, %v188_v27 }
  0x29   : > { %1520 = vmatprep.mubr.msk.f32.mxu0 %vm263_vm0, %v189_v28  ;;  %1566 = vmatmul.mubr.msk.f32.gmra.mrb[2].mxu1 %vm263_vm0, %v220_v29 }
  0x2a   : > { %1568 = vmatprep.mubr.msk.f32.mxu1 %vm263_vm0, %v221_v30 }
  0x2c   : > { %1521 = vmatmul.mubr.msk.f32.gmra.mrb[4].mxu0 %vm263_vm0, %v190_v31 }
  0x2d   : > { %1523 = vmatprep.mubr.msk.f32.mxu0 %vm263_vm0, %v191_v32  ;;  %1569 = vmatmul.mubr.msk.f32.gmra.mrb[4].mxu1 %vm263_vm0, %v222_v33 }
  0x2e   : > { %1571 = vmatprep.mubr.msk.f32.mxu1 %vm263_vm0, %v223_v34 }
  0x30   : > { %1524 = vmatmul.mubr.msk.f32.gmra.mrb[6].mxu0 %vm263_vm0, %v192_v35 }
  0x31   : > { %1526 = vmatprep.mubr.msk.f32.mxu0 %vm263_vm0, %v193_v36  ;;  %1572 = vmatmul.mubr.msk.f32.gmra.mrb[6].mxu1 %vm263_vm0, %v224_v37 }
  0x32   : > { %1574 = vmatprep.mubr.msk.f32.mxu1 %vm263_vm0, %v225_v38 }
  0x34   : > { %1527 = vmatmul.mubr.msk.f32.gmra.mrb[8].mxu0 %vm263_vm0, %v194_v39 }
  0x35   : > { %1529 = vmatprep.mubr.msk.f32.mxu0 %vm263_vm0, %v195_v40  ;;  %1575 = vmatmul.mubr.msk.f32.gmra.mrb[8].mxu1 %vm263_vm0, %v226_v41 }
  0x36   : > { %1577 = vmatprep.mubr.msk.f32.mxu1 %vm263_vm0, %v227_v42 }
  0x38   : > { %1530 = vmatmul.mubr.msk.f32.gmra.mrb[10].mxu0 %vm263_vm0, %v196_v43 }
  0x39   : > { %1532 = vmatprep.mubr.msk.f32.mxu0 %vm263_vm0, %v197_v44  ;;  %1578 = vmatmul.mubr.msk.f32.gmra.mrb[10].mxu1 %vm263_vm0, %v228_v45 }
  0x3a   : > { %1580 = vmatprep.mubr.msk.f32.mxu1 %vm263_vm0, %v229_v46 }
  0x3c   : > { %1533 = vmatmul.mubr.msk.f32.gmra.mrb[12].mxu0 %vm263_vm0, %v198_v47 }
  0x3d   : > { %1535 = vmatprep.mubr.msk.f32.mxu0 %vm263_vm0, %v199_v48  ;;  %1581 = vmatmul.mubr.msk.f32.gmra.mrb[12].mxu1 %vm263_vm0, %v230_v49 }
  0x3e   : > { %1583 = vmatprep.mubr.msk.f32.mxu1 %vm263_vm0, %v231_v50 }
  0x40   : > { %1536 = vmatmul.mubr.msk.f32.gmra.mrb[14].mxu0 %vm263_vm0, %v200_v51 }
  0x41   : > { %1538 = vmatprep.mubr.msk.f32.mxu0 %vm263_vm0, %v201_v52  ;;  %1584 = vmatmul.mubr.msk.f32.gmra.mrb[14].mxu1 %vm263_vm0, %v232_v53 }
  0x42   : > { %1586 = vmatprep.mubr.msk.f32.mxu1 %vm263_vm0, %v233_v54 }
  0x44   : > { %1539 = vmatmul.mubr.msk.f32.gmra.mrb[16].mxu0 %vm263_vm0, %v202_v55 }
  0x45   : > { %1541 = vmatprep.mubr.msk.f32.mxu0 %vm263_vm0, %v203_v56  ;;  %1587 = vmatmul.mubr.msk.f32.gmra.mrb[16].mxu1 %vm263_vm0, %v234_v57 }
  0x46   : > { %1589 = vmatprep.mubr.msk.f32.mxu1 %vm263_vm0, %v235_v58 }
  0x48   : > { %1542 = vmatmul.mubr.msk.f32.gmra.mrb[18].mxu0 %vm263_vm0, %v204_v59 }
  0x49   : > { %1544 = vmatprep.mubr.msk.f32.mxu0 %vm263_vm0, %v205_v60  ;;  %1590 = vmatmul.mubr.msk.f32.gmra.mrb[18].mxu1 %vm263_vm0, %v236_v61 }
  0x4a   : > { %1592 = vmatprep.mubr.msk.f32.mxu1 %vm263_vm0, %v237_v62 }
  0x4c   : > { %1545 = vmatmul.mubr.msk.f32.gmra.mrb[20].mxu0 %vm263_vm0, %v206_v63 }
  0x4d   : > { %1547 = vmatprep.mubr.msk.f32.mxu0 %vm263_vm0, %v207_v0  ;;  %1593 = vmatmul.mubr.msk.f32.gmra.mrb[20].mxu1 %vm263_vm0, %v238_v1 }
  0x4e   : > { %1595 = vmatprep.mubr.msk.f32.mxu1 %vm263_vm0, %v239_v2 }
  0x50   : > { %1548 = vmatmul.mubr.msk.f32.gmra.mrb[22].mxu0 %vm263_vm0, %v208_v3 }
  0x51   : > { %1550 = vmatprep.mubr.msk.f32.mxu0 %vm263_vm0, %v209_v4  ;;  %1596 = vmatmul.mubr.msk.f32.gmra.mrb[22].mxu1 %vm263_vm0, %v240_v5 }
  0x52   : > { %1598 = vmatprep.mubr.msk.f32.mxu1 %vm263_vm0, %v241_v6 }
  0x54   : > { %1551 = vmatmul.mubr.msk.f32.gmra.mrb[24].mxu0 %vm263_vm0, %v210_v7 }
  0x55   : > { %1553 = vmatprep.mubr.msk.f32.mxu0 %vm263_vm0, %v211_v8  ;;  %1599 = vmatmul.mubr.msk.f32.gmra.mrb[24].mxu1 %vm263_vm0, %v242_v9 }
  0x56   : > { %1601 = vmatprep.mubr.msk.f32.mxu1 %vm263_vm0, %v243_v10 }
  0x58   : > { %1554 = vmatmul.mubr.msk.f32.gmra.mrb[26].mxu0 %vm263_vm0, %v212_v11 }
  0x59   : > { %1556 = vmatprep.mubr.msk.f32.mxu0 %vm263_vm0, %v213_v12  ;;  %1602 = vmatmul.mubr.msk.f32.gmra.mrb[26].mxu1 %vm263_vm0, %v244_v13 }
  0x5a   : > { %1604 = vmatprep.mubr.msk.f32.mxu1 %vm263_vm0, %v245_v14 }
  0x5c   : > { %1557 = vmatmul.mubr.msk.f32.gmra.mrb[28].mxu0 %vm263_vm0, %v214_v15 }
  0x5d   : > { %1559 = vmatprep.mubr.msk.f32.mxu0 %vm263_vm0, %v215_v16  ;;  %1605 = vmatmul.mubr.msk.f32.gmra.mrb[28].mxu1 %vm263_vm0, %v246_v17 }
  0x5e   : > { %1607 = vmatprep.mubr.msk.f32.mxu1 %vm263_vm0, %v247_v18 }
  0x60   : > { %1560 = vmatmul.mubr.msk.f32.gmra.mrb[30].mxu0 %vm263_vm0, %v216_v19 }
  0x61   : > { %1608 = vmatmul.mubr.msk.f32.gmra.mrb[30].mxu1 %vm263_vm0, %v248_v20 }
  0xf7   : > { %v1516_v21 = vpop.f32.mrb[0].mxu0 }
  0xf8   : > { %847 = vst.msk [vmem:[%s1888_s25 + $0x8] sm:$0xff] %vm845_vm4, %v1516_v21  ;;  %v911_v22 = vsel %vm845_vm4, %v1516_v21, 0.0  ;;  %v1044_v23 = vmul.f32 %v1516_v21, %v1516_v21  ;;  %v526_v24 = vpop.f32.mrb[1].mxu0  ;;  %v1893_v25 = vpop.f32.mrb[0].mxu1 }
  0xf9   : > { %846 = vst.msk [vmem:[%s1888_s25] sm:$0xff] %vm845_vm4, %v526_v24  ;;  %v910_v26 = vsel %vm845_vm4, %v526_v24, 0.0  ;;  %v1043_v27 = vmul.f32 %v526_v24, %v526_v24  ;;  %879 = vst.msk [vmem:[%s1888_s25 + $0x108] sm:$0xff] %vm845_vm4, %v1893_v25  ;;  %v1901_v28 = vpop.f32.mrb[1].mxu1 }
  0xfa   : > { %v1108_v29 = vsel %vm845_vm4, %v1044_v23, 0.0  ;;  %v912_v30 = vadd.f32 %v911_v22, %v910_v26  ;;  %878 = vst.msk [vmem:[%s1888_s25 + $0x100] sm:$0xff] %vm845_vm4, %v1901_v28 }
  0xfb   : > { %v1107_v31 = vsel %vm845_vm4, %v1043_v27, 0.0  ;;  %v1519_v32 = vpop.f32.mrb[2].mxu0 }
  0xfc   : > { %v1109_v33 = vadd.f32 %v1108_v29, %v1107_v31  ;;  %849 = vst.msk [vmem:[%s1888_s25 + $0x18] sm:$0xff] %vm845_vm4, %v1519_v32  ;;  %v536_v34 = vpop.f32.mrb[3].mxu0  ;;  %v1910_v35 = vpop.f32.mrb[2].mxu1  ;;  %v1046_v36 = vmul.f32 %v1519_v32, %v1519_v32  ;;  %v915_v41 = vsel %vm845_vm4, %v1519_v32, 0.0 }
  0xfd   : > { %848 = vst.msk [vmem:[%s1888_s25 + $0x10] sm:$0xff] %vm845_vm4, %v536_v34  ;;  %v913_v37 = vsel %vm845_vm4, %v536_v34, 0.0  ;;  %v1045_v38 = vmul.f32 %v536_v34, %v536_v34  ;;  %881 = vst.msk [vmem:[%s1888_s25 + $0x118] sm:$0xff] %vm845_vm4, %v1910_v35  ;;  %v1918_v39 = vpop.f32.mrb[3].mxu1 }
  0xfe   : > { %v914_v40 = vadd.f32 %v913_v37, %v912_v30  ;;  %880 = vst.msk [vmem:[%s1888_s25 + $0x110] sm:$0xff] %vm845_vm4, %v1918_v39  ;;  %v1112_v48 = vsel %vm845_vm4, %v1046_v36, 0.0 }
  0xff   : > { %v1110_v42 = vsel %vm845_vm4, %v1045_v38, 0.0  ;;  %v1522_v43 = vpop.f32.mrb[4].mxu0 }
 0x100   : > { %v1111_v44 = vadd.f32 %v1110_v42, %v1109_v33  ;;  %851 = vst.msk [vmem:[%s1888_s25 + $0x28] sm:$0xff] %vm845_vm4, %v1522_v43  ;;  %v546_v45 = vpop.f32.mrb[5].mxu0  ;;  %v916_v46 = vadd.f32 %v915_v41, %v914_v40  ;;  %v1927_v47 = vpop.f32.mrb[4].mxu1  ;;  %v1048_v49 = vmul.f32 %v1522_v43, %v1522_v43  ;;  %v919_v55 = vsel %vm845_vm4, %v1522_v43, 0.0 }
 0x101   : > { %850 = vst.msk [vmem:[%s1888_s25 + $0x20] sm:$0xff] %vm845_vm4, %v546_v45  ;;  %v917_v50 = vsel %vm845_vm4, %v546_v45, 0.0  ;;  %v1047_v51 = vmul.f32 %v546_v45, %v546_v45  ;;  %883 = vst.msk [vmem:[%s1888_s25 + $0x128] sm:$0xff] %vm845_vm4, %v1927_v47  ;;  %v1936_v52 = vpop.f32.mrb[5].mxu1 }
 0x102   : > { %v918_v53 = vadd.f32 %v917_v50, %v916_v46  ;;  %v1113_v54 = vadd.f32 %v1112_v48, %v1111_v44  ;;  %882 = vst.msk [vmem:[%s1888_s25 + $0x120] sm:$0xff] %vm845_vm4, %v1936_v52  ;;  %v1116_v62 = vsel %vm845_vm4, %v1048_v49, 0.0 }
 0x103   : > { %v1114_v56 = vsel %vm845_vm4, %v1047_v51, 0.0  ;;  %v1525_v57 = vpop.f32.mrb[6].mxu0 }
 0x104   : > { %v1115_v58 = vadd.f32 %v1114_v56, %v1113_v54  ;;  %853 = vst.msk [vmem:[%s1888_s25 + $0x38] sm:$0xff] %vm845_vm4, %v1525_v57  ;;  %v556_v59 = vpop.f32.mrb[7].mxu0  ;;  %v920_v60 = vadd.f32 %v919_v55, %v918_v53  ;;  %v1945_v61 = vpop.f32.mrb[6].mxu1  ;;  %v1050_v63 = vmul.f32 %v1525_v57, %v1525_v57  ;;  %v923_v5 = vsel %vm845_vm4, %v1525_v57, 0.0 }
 0x105   : > { %852 = vst.msk [vmem:[%s1888_s25 + $0x30] sm:$0xff] %vm845_vm4, %v556_v59  ;;  %v921_v0 = vsel %vm845_vm4, %v556_v59, 0.0  ;;  %v1049_v1 = vmul.f32 %v556_v59, %v556_v59  ;;  %885 = vst.msk [vmem:[%s1888_s25 + $0x138] sm:$0xff] %vm845_vm4, %v1945_v61  ;;  %v1954_v2 = vpop.f32.mrb[7].mxu1 }
 0x106   : > { %v922_v3 = vadd.f32 %v921_v0, %v920_v60  ;;  %v1117_v4 = vadd.f32 %v1116_v62, %v1115_v58  ;;  %884 = vst.msk [vmem:[%s1888_s25 + $0x130] sm:$0xff] %vm845_vm4, %v1954_v2  ;;  %v1120_v12 = vsel %vm845_vm4, %v1050_v63, 0.0 }
 0x107   : > { %v1118_v6 = vsel %vm845_vm4, %v1049_v1, 0.0  ;;  %v1528_v7 = vpop.f32.mrb[8].mxu0 }
 0x108   : > { %v1119_v8 = vadd.f32 %v1118_v6, %v1117_v4  ;;  %855 = vst.msk [vmem:[%s1888_s25 + $0x48] sm:$0xff] %vm845_vm4, %v1528_v7  ;;  %v566_v9 = vpop.f32.mrb[9].mxu0  ;;  %v924_v10 = vadd.f32 %v923_v5, %v922_v3  ;;  %v1963_v11 = vpop.f32.mrb[8].mxu1  ;;  %v1052_v13 = vmul.f32 %v1528_v7, %v1528_v7  ;;  %v927_v19 = vsel %vm845_vm4, %v1528_v7, 0.0 }
 0x109   : > { %854 = vst.msk [vmem:[%s1888_s25 + $0x40] sm:$0xff] %vm845_vm4, %v566_v9  ;;  %v925_v14 = vsel %vm845_vm4, %v566_v9, 0.0  ;;  %v1051_v15 = vmul.f32 %v566_v9, %v566_v9  ;;  %887 = vst.msk [vmem:[%s1888_s25 + $0x148] sm:$0xff] %vm845_vm4, %v1963_v11  ;;  %v1972_v16 = vpop.f32.mrb[9].mxu1 }
 0x10a   : > { %v926_v17 = vadd.f32 %v925_v14, %v924_v10  ;;  %v1121_v18 = vadd.f32 %v1120_v12, %v1119_v8  ;;  %886 = vst.msk [vmem:[%s1888_s25 + $0x140] sm:$0xff] %vm845_vm4, %v1972_v16  ;;  %v1124_v27 = vsel %vm845_vm4, %v1052_v13, 0.0 }
 0x10b   : > { %v1122_v20 = vsel %vm845_vm4, %v1051_v15, 0.0  ;;  %v1531_v21 = vpop.f32.mrb[10].mxu0 }
 0x10c   : > { %v1123_v22 = vadd.f32 %v1122_v20, %v1121_v18  ;;  %857 = vst.msk [vmem:[%s1888_s25 + $0x58] sm:$0xff] %vm845_vm4, %v1531_v21  ;;  %v576_v23 = vpop.f32.mrb[11].mxu0  ;;  %v928_v24 = vadd.f32 %v927_v19, %v926_v17  ;;  %v1981_v26 = vpop.f32.mrb[10].mxu1  ;;  %v1054_v29 = vmul.f32 %v1531_v21, %v1531_v21  ;;  %v931_v36 = vsel %vm845_vm4, %v1531_v21, 0.0 }
 0x10d   : > { %856 = vst.msk [vmem:[%s1888_s25 + $0x50] sm:$0xff] %vm845_vm4, %v576_v23  ;;  %v929_v30 = vsel %vm845_vm4, %v576_v23, 0.0  ;;  %v1053_v31 = vmul.f32 %v576_v23, %v576_v23  ;;  %889 = vst.msk [vmem:[%s1888_s25 + $0x158] sm:$0xff] %vm845_vm4, %v1981_v26  ;;  %v1990_v32 = vpop.f32.mrb[11].mxu1 }
 0x10e   : > { %v930_v33 = vadd.f32 %v929_v30, %v928_v24  ;;  %v1125_v34 = vadd.f32 %v1124_v27, %v1123_v22  ;;  %888 = vst.msk [vmem:[%s1888_s25 + $0x150] sm:$0xff] %vm845_vm4, %v1990_v32  ;;  %v1128_v44 = vsel %vm845_vm4, %v1054_v29, 0.0 }
 0x10f   : > { %v1126_v37 = vsel %vm845_vm4, %v1053_v31, 0.0  ;;  %v1534_v38 = vpop.f32.mrb[12].mxu0 }
 0x110   : > { %v1127_v40 = vadd.f32 %v1126_v37, %v1125_v34  ;;  %859 = vst.msk [vmem:[%s1888_s25 + $0x68] sm:$0xff] %vm845_vm4, %v1534_v38  ;;  %v586_v41 = vpop.f32.mrb[13].mxu0  ;;  %v932_v42 = vadd.f32 %v931_v36, %v930_v33  ;;  %v1999_v43 = vpop.f32.mrb[12].mxu1  ;;  %v1056_v45 = vmul.f32 %v1534_v38, %v1534_v38  ;;  %v935_v53 = vsel %vm845_vm4, %v1534_v38, 0.0 }
 0x111   : > { %858 = vst.msk [vmem:[%s1888_s25 + $0x60] sm:$0xff] %vm845_vm4, %v586_v41  ;;  %v933_v46 = vsel %vm845_vm4, %v586_v41, 0.0  ;;  %v1055_v48 = vmul.f32 %v586_v41, %v586_v41  ;;  %891 = vst.msk [vmem:[%s1888_s25 + $0x168] sm:$0xff] %vm845_vm4, %v1999_v43  ;;  %v2008_v49 = vpop.f32.mrb[13].mxu1 }
 0x112   : > { %v934_v50 = vadd.f32 %v933_v46, %v932_v42  ;;  %v1129_v51 = vadd.f32 %v1128_v44, %v1127_v40  ;;  %890 = vst.msk [vmem:[%s1888_s25 + $0x160] sm:$0xff] %vm845_vm4, %v2008_v49  ;;  %v1132_v60 = vsel %vm845_vm4, %v1056_v45, 0.0 }
 0x113   : > { %v1130_v54 = vsel %vm845_vm4, %v1055_v48, 0.0  ;;  %v1537_v55 = vpop.f32.mrb[14].mxu0 }
 0x114   : > { %v1131_v56 = vadd.f32 %v1130_v54, %v1129_v51  ;;  %861 = vst.msk [vmem:[%s1888_s25 + $0x78] sm:$0xff] %vm845_vm4, %v1537_v55  ;;  %v596_v57 = vpop.f32.mrb[15].mxu0  ;;  %v936_v58 = vadd.f32 %v935_v53, %v934_v50  ;;  %v2017_v59 = vpop.f32.mrb[14].mxu1  ;;  %v1058_v62 = vmul.f32 %v1537_v55, %v1537_v55  ;;  %v939_v5 = vsel %vm845_vm4, %v1537_v55, 0.0 }
 0x115   : > { %860 = vst.msk [vmem:[%s1888_s25 + $0x70] sm:$0xff] %vm845_vm4, %v596_v57  ;;  %v937_v63 = vsel %vm845_vm4, %v596_v57, 0.0  ;;  %v1057_v0 = vmul.f32 %v596_v57, %v596_v57  ;;  %893 = vst.msk [vmem:[%s1888_s25 + $0x178] sm:$0xff] %vm845_vm4, %v2017_v59  ;;  %v2026_v1 = vpop.f32.mrb[15].mxu1 }
 0x116   : > { %v938_v3 = vadd.f32 %v937_v63, %v936_v58  ;;  %v1133_v4 = vadd.f32 %v1132_v60, %v1131_v56  ;;  %892 = vst.msk [vmem:[%s1888_s25 + $0x170] sm:$0xff] %vm845_vm4, %v2026_v1  ;;  %v1136_v13 = vsel %vm845_vm4, %v1058_v62, 0.0 }
 0x117   : > { %v1134_v6 = vsel %vm845_vm4, %v1057_v0, 0.0  ;;  %v1540_v7 = vpop.f32.mrb[16].mxu0 }
 0x118   : > { %v1135_v8 = vadd.f32 %v1134_v6, %v1133_v4  ;;  %863 = vst.msk [vmem:[%s1888_s25 + $0x88] sm:$0xff] %vm845_vm4, %v1540_v7  ;;  %v606_v9 = vpop.f32.mrb[17].mxu0  ;;  %v940_v10 = vadd.f32 %v939_v5, %v938_v3  ;;  %v2035_v12 = vpop.f32.mrb[16].mxu1  ;;  %v1060_v14 = vmul.f32 %v1540_v7, %v1540_v7  ;;  %v943_v21 = vsel %vm845_vm4, %v1540_v7, 0.0 }
 0x119   : > { %862 = vst.msk [vmem:[%s1888_s25 + $0x80] sm:$0xff] %vm845_vm4, %v606_v9  ;;  %v941_v15 = vsel %vm845_vm4, %v606_v9, 0.0  ;;  %v1059_v17 = vmul.f32 %v606_v9, %v606_v9  ;;  %895 = vst.msk [vmem:[%s1888_s25 + $0x188] sm:$0xff] %vm845_vm4, %v2035_v12  ;;  %v2044_v18 = vpop.f32.mrb[17].mxu1 }
 0x11a   : > { %v942_v19 = vadd.f32 %v941_v15, %v940_v10  ;;  %v1137_v20 = vadd.f32 %v1136_v13, %v1135_v8  ;;  %894 = vst.msk [vmem:[%s1888_s25 + $0x180] sm:$0xff] %vm845_vm4, %v2044_v18  ;;  %v1140_v31 = vsel %vm845_vm4, %v1060_v14, 0.0 }
 0x11b   : > { %v1138_v22 = vsel %vm845_vm4, %v1059_v17, 0.0  ;;  %v1543_v23 = vpop.f32.mrb[18].mxu0 }
 0x11c   : > { %v1139_v24 = vadd.f32 %v1138_v22, %v1137_v20  ;;  %865 = vst.msk [vmem:[%s1888_s25 + $0x98] sm:$0xff] %vm845_vm4, %v1543_v23  ;;  %v616_v27 = vpop.f32.mrb[19].mxu0  ;;  %v944_v29 = vadd.f32 %v943_v21, %v942_v19  ;;  %v2053_v30 = vpop.f32.mrb[18].mxu1  ;;  %v1062_v33 = vmul.f32 %v1543_v23, %v1543_v23  ;;  %v947_v41 = vsel %vm845_vm4, %v1543_v23, 0.0 }
 0x11d   : > { %864 = vst.msk [vmem:[%s1888_s25 + $0x90] sm:$0xff] %vm845_vm4, %v616_v27  ;;  %v945_v34 = vsel %vm845_vm4, %v616_v27, 0.0  ;;  %v1061_v36 = vmul.f32 %v616_v27, %v616_v27  ;;  %897 = vst.msk [vmem:[%s1888_s25 + $0x198] sm:$0xff] %vm845_vm4, %v2053_v30  ;;  %v2062_v37 = vpop.f32.mrb[19].mxu1 }
 0x11e   : > { %v946_v38 = vadd.f32 %v945_v34, %v944_v29  ;;  %v1141_v40 = vadd.f32 %v1140_v31, %v1139_v24  ;;  %896 = vst.msk [vmem:[%s1888_s25 + $0x190] sm:$0xff] %vm845_vm4, %v2062_v37  ;;  %v1144_v51 = vsel %vm845_vm4, %v1062_v33, 0.0 }
 0x11f   : > { %v1142_v42 = vsel %vm845_vm4, %v1061_v36, 0.0  ;;  %v1546_v44 = vpop.f32.mrb[20].mxu0 }
 0x120   : > { %v1143_v45 = vadd.f32 %v1142_v42, %v1141_v40  ;;  %867 = vst.msk [vmem:[%s1888_s25 + $0xa8] sm:$0xff] %vm845_vm4, %v1546_v44  ;;  %v626_v46 = vpop.f32.mrb[21].mxu0  ;;  %v948_v48 = vadd.f32 %v947_v41, %v946_v38  ;;  %v2071_v50 = vpop.f32.mrb[20].mxu1  ;;  %v1064_v53 = vmul.f32 %v1546_v44, %v1546_v44  ;;  %v951_v60 = vsel %vm845_vm4, %v1546_v44, 0.0 }
 0x121   : > { %866 = vst.msk [vmem:[%s1888_s25 + $0xa0] sm:$0xff] %vm845_vm4, %v626_v46  ;;  %v949_v54 = vsel %vm845_vm4, %v626_v46, 0.0  ;;  %v1063_v55 = vmul.f32 %v626_v46, %v626_v46  ;;  %899 = vst.msk [vmem:[%s1888_s25 + $0x1a8] sm:$0xff] %vm845_vm4, %v2071_v50  ;;  %v2080_v56 = vpop.f32.mrb[21].mxu1 }
 0x122   : > { %v950_v57 = vadd.f32 %v949_v54, %v948_v48  ;;  %v1145_v58 = vadd.f32 %v1144_v51, %v1143_v45  ;;  %898 = vst.msk [vmem:[%s1888_s25 + $0x1a0] sm:$0xff] %vm845_vm4, %v2080_v56  ;;  %v1148_v6 = vsel %vm845_vm4, %v1064_v53, 0.0 }
 0x123   : > { %v1146_v62 = vsel %vm845_vm4, %v1063_v55, 0.0  ;;  %v1549_v63 = vpop.f32.mrb[22].mxu0 }
 0x124   : > { %v1147_v0 = vadd.f32 %v1146_v62, %v1145_v58  ;;  %869 = vst.msk [vmem:[%s1888_s25 + $0xb8] sm:$0xff] %vm845_vm4, %v1549_v63  ;;  %v636_v3 = vpop.f32.mrb[23].mxu0  ;;  %v952_v4 = vadd.f32 %v951_v60, %v950_v57  ;;  %v2089_v5 = vpop.f32.mrb[22].mxu1  ;;  %v1066_v7 = vmul.f32 %v1549_v63, %v1549_v63  ;;  %v955_v15 = vsel %vm845_vm4, %v1549_v63, 0.0 }
 0x125   : > { %868 = vst.msk [vmem:[%s1888_s25 + $0xb0] sm:$0xff] %vm845_vm4, %v636_v3  ;;  %v953_v8 = vsel %vm845_vm4, %v636_v3, 0.0  ;;  %v1065_v9 = vmul.f32 %v636_v3, %v636_v3  ;;  %901 = vst.msk [vmem:[%s1888_s25 + $0x1b8] sm:$0xff] %vm845_vm4, %v2089_v5  ;;  %v2098_v10 = vpop.f32.mrb[23].mxu1 }
 0x126   : > { %v954_v13 = vadd.f32 %v953_v8, %v952_v4  ;;  %v1149_v14 = vadd.f32 %v1148_v6, %v1147_v0  ;;  %900 = vst.msk [vmem:[%s1888_s25 + $0x1b0] sm:$0xff] %vm845_vm4, %v2098_v10  ;;  %v1152_v24 = vsel %vm845_vm4, %v1066_v7, 0.0 }
 0x127   : > { %v1150_v17 = vsel %vm845_vm4, %v1065_v9, 0.0  ;;  %v1552_v19 = vpop.f32.mrb[24].mxu0 }
 0x128   : > { %v1151_v20 = vadd.f32 %v1150_v17, %v1149_v14  ;;  %871 = vst.msk [vmem:[%s1888_s25 + $0xc8] sm:$0xff] %vm845_vm4, %v1552_v19  ;;  %v646_v21 = vpop.f32.mrb[25].mxu0  ;;  %v956_v22 = vadd.f32 %v955_v15, %v954_v13  ;;  %v2107_v23 = vpop.f32.mrb[24].mxu1  ;;  %v1068_v27 = vmul.f32 %v1552_v19, %v1552_v19  ;;  %v959_v38 = vsel %vm845_vm4, %v1552_v19, 0.0 }
 0x129   : > { %870 = vst.msk [vmem:[%s1888_s25 + $0xc0] sm:$0xff] %vm845_vm4, %v646_v21  ;;  %v957_v29 = vsel %vm845_vm4, %v646_v21, 0.0  ;;  %v1067_v31 = vmul.f32 %v646_v21, %v646_v21  ;;  %903 = vst.msk [vmem:[%s1888_s25 + $0x1c8] sm:$0xff] %vm845_vm4, %v2107_v23  ;;  %v2116_v33 = vpop.f32.mrb[25].mxu1 }
 0x12a   : > { %v958_v34 = vadd.f32 %v957_v29, %v956_v22  ;;  %v1153_v36 = vadd.f32 %v1152_v24, %v1151_v20  ;;  %902 = vst.msk [vmem:[%s1888_s25 + $0x1c0] sm:$0xff] %vm845_vm4, %v2116_v33  ;;  %v1156_v48 = vsel %vm845_vm4, %v1068_v27, 0.0  ;;  %v1075_v29 = vmul.f32 %v1901_v28, %v1901_v28 }
 0x12b   : > { %v1154_v40 = vsel %vm845_vm4, %v1067_v31, 0.0  ;;  %v1555_v41 = vpop.f32.mrb[26].mxu0 }
 0x12c   : > { %v1155_v42 = vadd.f32 %v1154_v40, %v1153_v36  ;;  %873 = vst.msk [vmem:[%s1888_s25 + $0xd8] sm:$0xff] %vm845_vm4, %v1555_v41  ;;  %v656_v44 = vpop.f32.mrb[27].mxu0  ;;  %v960_v45 = vadd.f32 %v959_v38, %v958_v34  ;;  %v2125_v46 = vpop.f32.mrb[26].mxu1  ;;  %v1070_v51 = vmul.f32 %v1555_v41, %v1555_v41  ;;  %v963_v60 = vsel %vm845_vm4, %v1555_v41, 0.0 }
 0x12d   : > { %872 = vst.msk [vmem:[%s1888_s25 + $0xd0] sm:$0xff] %vm845_vm4, %v656_v44  ;;  %v961_v53 = vsel %vm845_vm4, %v656_v44, 0.0  ;;  %v1069_v54 = vmul.f32 %v656_v44, %v656_v44  ;;  %905 = vst.msk [vmem:[%s1888_s25 + $0x1d8] sm:$0xff] %vm845_vm4, %v2125_v46  ;;  %v2134_v55 = vpop.f32.mrb[27].mxu1 }
 0x12e   : > { %v962_v57 = vadd.f32 %v961_v53, %v960_v45  ;;  %v1157_v58 = vadd.f32 %v1156_v48, %v1155_v42  ;;  %904 = vst.msk [vmem:[%s1888_s25 + $0x1d0] sm:$0xff] %vm845_vm4, %v2134_v55  ;;  %v1160_v7 = vsel %vm845_vm4, %v1070_v51, 0.0  ;;  %v973_v51 = vsel %vm845_vm4, %v1901_v28, 0.0 }
 0x12f   : > { %v1158_v62 = vsel %vm845_vm4, %v1069_v54, 0.0  ;;  %v1558_v63 = vpop.f32.mrb[28].mxu0  ;;  %v977_v28 = vsel %vm845_vm4, %v1918_v39, 0.0 }
 0x130   : > { %v1159_v0 = vadd.f32 %v1158_v62, %v1157_v58  ;;  %875 = vst.msk [vmem:[%s1888_s25 + $0xe8] sm:$0xff] %vm845_vm4, %v1558_v63  ;;  %v666_v3 = vpop.f32.mrb[29].mxu0  ;;  %v964_v4 = vadd.f32 %v963_v60, %v962_v57  ;;  %v2143_v6 = vpop.f32.mrb[28].mxu1  ;;  %v1072_v8 = vmul.f32 %v1558_v63, %v1558_v63  ;;  %v967_v19 = vsel %vm845_vm4, %v1558_v63, 0.0 }
 0x131   : > { %874 = vst.msk [vmem:[%s1888_s25 + $0xe0] sm:$0xff] %vm845_vm4, %v666_v3  ;;  %v965_v9 = vsel %vm845_vm4, %v666_v3, 0.0  ;;  %v1071_v13 = vmul.f32 %v666_v3, %v666_v3  ;;  %907 = vst.msk [vmem:[%s1888_s25 + $0x1e8] sm:$0xff] %vm845_vm4, %v2143_v6  ;;  %v2152_v14 = vpop.f32.mrb[29].mxu1  ;;  %v1076_v58 = vmul.f32 %v1893_v25, %v1893_v25  ;;  %v1170_v60 = vsel %vm845_vm4, %v1075_v29, 0.0 }
 0x132   : > { %v966_v15 = vadd.f32 %v965_v9, %v964_v4  ;;  %v1161_v17 = vadd.f32 %v1160_v7, %v1159_v0  ;;  %906 = vst.msk [vmem:[%s1888_s25 + $0x1e0] sm:$0xff] %vm845_vm4, %v2152_v14  ;;  %v1164_v34 = vsel %vm845_vm4, %v1072_v8, 0.0  ;;  %v1077_v62 = vmul.f32 %v1918_v39, %v1918_v39 }
 0x133   : > { %v1162_v20 = vsel %vm845_vm4, %v1071_v13, 0.0  ;;  %v1561_v21 = vpop.f32.mrb[30].mxu0  ;;  %v975_v3 = vsel %vm845_vm4, %v1893_v25, 0.0  ;;  %v1172_v8 = vsel %vm845_vm4, %v1076_v58, 0.0  ;;  %v1078_v9 = vmul.f32 %v1910_v35, %v1910_v35 }
 0x134   : > { %v1163_v22 = vadd.f32 %v1162_v20, %v1161_v17  ;;  %877 = vst.msk [vmem:[%s1888_s25 + $0xf8] sm:$0xff] %vm845_vm4, %v1561_v21  ;;  %v676_v24 = vpop.f32.mrb[31].mxu0  ;;  %v968_v27 = vadd.f32 %v967_v19, %v966_v15  ;;  %v2163_v31 = vpop.f32.mrb[30].mxu1  ;;  %v1074_v36 = vmul.f32 %v1561_v21, %v1561_v21  ;;  %v971_v45 = vsel %vm845_vm4, %v1561_v21, 0.0 }
 0x135   : > { %876 = vst.msk [vmem:[%s1888_s25 + $0xf0] sm:$0xff] %vm845_vm4, %v676_v24  ;;  %v969_v38 = vsel %vm845_vm4, %v676_v24, 0.0  ;;  %v1073_v40 = vmul.f32 %v676_v24, %v676_v24  ;;  %909 = vst.msk [vmem:[%s1888_s25 + $0x1f8] sm:$0xff] %vm845_vm4, %v2163_v31  ;;  %v2172_v41 = vpop.f32.mrb[31].mxu1  ;;  %v1174_v13 = vsel %vm845_vm4, %v1077_v62, 0.0  ;;  %v1079_v15 = vmul.f32 %v1936_v52, %v1936_v52 }
 0x136   : > { %v970_v42 = vadd.f32 %v969_v38, %v968_v27  ;;  %v1165_v44 = vadd.f32 %v1164_v34, %v1163_v22  ;;  %908 = vst.msk [vmem:[%s1888_s25 + $0x1f0] sm:$0xff] %vm845_vm4, %v2172_v41  ;;  %v1168_v57 = vsel %vm845_vm4, %v1074_v36, 0.0  ;;  %v979_v25 = vsel %vm845_vm4, %v1910_v35, 0.0 }
 0x137   : > { %v1166_v48 = vsel %vm845_vm4, %v1073_v40, 0.0  ;;  %v981_v39 = vsel %vm845_vm4, %v1936_v52, 0.0  ;;  %v1176_v22 = vsel %vm845_vm4, %v1078_v9, 0.0  ;;  %v1080_v24 = vmul.f32 %v1927_v47, %v1927_v47 }
 0x138   : > { %v972_v53 = vadd.f32 %v971_v45, %v970_v42  ;;  %v1167_v54 = vadd.f32 %v1166_v48, %v1165_v44  ;;  %v1178_v27 = vsel %vm845_vm4, %v1079_v15, 0.0  ;;  %v1081_v29 = vmul.f32 %v1954_v2, %v1954_v2 }
 0x139   : > { %v983_v35 = vsel %vm845_vm4, %v1927_v47, 0.0  ;;  %v985_v52 = vsel %vm845_vm4, %v1954_v2, 0.0  ;;  %v1180_v42 = vsel %vm845_vm4, %v1080_v24, 0.0  ;;  %v1082_v44 = vmul.f32 %v1945_v61, %v1945_v61 }
 0x13a   : > { %v1169_v63 = vadd.f32 %v1168_v57, %v1167_v54  ;;  %v974_v0 = vadd.f32 %v973_v51, %v972_v53  ;;  %v1182_v45 = vsel %vm845_vm4, %v1081_v29, 0.0  ;;  %v1083_v48 = vmul.f32 %v1972_v16, %v1972_v16 }
 0x13b   : > { %v987_v47 = vsel %vm845_vm4, %v1945_v61, 0.0  ;;  %v989_v2 = vsel %vm845_vm4, %v1972_v16, 0.0  ;;  %v1184_v58 = vsel %vm845_vm4, %v1082_v44, 0.0  ;;  %v991_v61 = vsel %vm845_vm4, %v1963_v11, 0.0 }
 0x13c   : > { %v1171_v4 = vadd.f32 %v1170_v60, %v1169_v63  ;;  %v976_v7 = vadd.f32 %v975_v3, %v974_v0  ;;  %v1084_v60 = vmul.f32 %v1963_v11, %v1963_v11  ;;  %v1186_v62 = vsel %vm845_vm4, %v1083_v48, 0.0 }
 0x13d   : > { %v1085_v63 = vmul.f32 %v1990_v32, %v1990_v32  ;;  %v993_v16 = vsel %vm845_vm4, %v1990_v32, 0.0  ;;  %v995_v11 = vsel %vm845_vm4, %v1981_v26, 0.0  ;;  %v997_v32 = vsel %vm845_vm4, %v2008_v49, 0.0 }
 0x13e   : > { %v978_v17 = vadd.f32 %v977_v28, %v976_v7  ;;  %v1173_v19 = vadd.f32 %v1172_v8, %v1171_v4  ;;  %v1188_v7 = vsel %vm845_vm4, %v1084_v60, 0.0  ;;  %v1086_v8 = vmul.f32 %v1981_v26, %v1981_v26 }
 0x13f   : > { %v1190_v9 = vsel %vm845_vm4, %v1085_v63, 0.0  ;;  %v999_v26 = vsel %vm845_vm4, %v1999_v43, 0.0 }
 0x140   : > { %v1175_v20 = vadd.f32 %v1174_v13, %v1173_v19  ;;  %v980_v21 = vadd.f32 %v979_v25, %v978_v17  ;;  %v1087_v13 = vmul.f32 %v2008_v49, %v2008_v49  ;;  %v1001_v49 = vsel %vm845_vm4, %v2026_v1, 0.0 }
 0x142   : > { %v982_v34 = vadd.f32 %v981_v39, %v980_v21  ;;  %v1177_v36 = vadd.f32 %v1176_v22, %v1175_v20  ;;  %v1192_v39 = vsel %vm845_vm4, %v1086_v8, 0.0  ;;  %v1088_v20 = vmul.f32 %v1999_v43, %v1999_v43 }
 0x143   : > { %v1194_v21 = vsel %vm845_vm4, %v1087_v13, 0.0  ;;  %v1089_v22 = vmul.f32 %v2026_v1, %v2026_v1  ;;  %v1003_v43 = vsel %vm845_vm4, %v2017_v59, 0.0  ;;  %v1005_v1 = vsel %vm845_vm4, %v2044_v18, 0.0 }
 0x144   : > { %v1179_v38 = vadd.f32 %v1178_v27, %v1177_v36  ;;  %v984_v40 = vadd.f32 %v983_v35, %v982_v34  ;;  %v1196_v36 = vsel %vm845_vm4, %v1088_v20, 0.0  ;;  %v1090_v35 = vmul.f32 %v2017_v59, %v2017_v59 }
 0x145   : > { %v1007_v59 = vsel %vm845_vm4, %v2035_v12, 0.0 }
 0x146   : > { %v986_v51 = vadd.f32 %v985_v52, %v984_v40  ;;  %v1181_v53 = vadd.f32 %v1180_v42, %v1179_v38  ;;  %v1198_v52 = vsel %vm845_vm4, %v1089_v22, 0.0  ;;  %v1091_v38 = vmul.f32 %v2044_v18, %v2044_v18 }
 0x147   : > { %v1200_v48 = vsel %vm845_vm4, %v1090_v35, 0.0  ;;  %v1009_v18 = vsel %vm845_vm4, %v2062_v37, 0.0 }
 0x148   : > { %v1183_v54 = vadd.f32 %v1182_v45, %v1181_v53  ;;  %v988_v57 = vadd.f32 %v987_v47, %v986_v51  ;;  %v1092_v51 = vmul.f32 %v2035_v12, %v2035_v12  ;;  %v1202_v53 = vsel %vm845_vm4, %v1091_v38, 0.0 }
 0x149   : > { %v1093_v47 = vmul.f32 %v2062_v37, %v2062_v37  ;;  %v1011_v12 = vsel %vm845_vm4, %v2053_v30, 0.0  ;;  %v1013_v37 = vsel %vm845_vm4, %v2080_v56, 0.0 }
 0x14a   : > { %v990_v0 = vadd.f32 %v989_v2, %v988_v57  ;;  %v1185_v3 = vadd.f32 %v1184_v58, %v1183_v54  ;;  %v1204_v60 = vsel %vm845_vm4, %v1092_v51, 0.0 }
 0x14b   : > { %v1206_v63 = vsel %vm845_vm4, %v1093_v47, 0.0 }
 0x14c   : > { %v1187_v28 = vadd.f32 %v1186_v62, %v1185_v3  ;;  %v992_v4 = vadd.f32 %v991_v61, %v990_v0  ;;  %v1094_v62 = vmul.f32 %v2053_v30, %v2053_v30  ;;  %v1095_v0 = vmul.f32 %v2080_v56, %v2080_v56 }
 0x14d   : > { %v1015_v30 = vsel %vm845_vm4, %v2071_v50, 0.0  ;;  %v1017_v56 = vsel %vm845_vm4, %v2098_v10, 0.0 }
 0x14e   : > { %v994_v15 = vadd.f32 %v993_v16, %v992_v4  ;;  %v1189_v17 = vadd.f32 %v1188_v7, %v1187_v28  ;;  %v1208_v4 = vsel %vm845_vm4, %v1094_v62, 0.0  ;;  %v1096_v7 = vmul.f32 %v2071_v50, %v2071_v50 }
 0x14f   : > { %v1210_v8 = vsel %vm845_vm4, %v1095_v0, 0.0  ;;  %v1019_v50 = vsel %vm845_vm4, %v2089_v5, 0.0 }
 0x150   : > { %v1191_v19 = vadd.f32 %v1190_v9, %v1189_v17  ;;  %v996_v25 = vadd.f32 %v995_v11, %v994_v15  ;;  %v1097_v9 = vmul.f32 %v2098_v10, %v2098_v10  ;;  %v1021_v10 = vsel %vm845_vm4, %v2116_v33, 0.0 }
 0x152   : > { %v998_v24 = vadd.f32 %v997_v32, %v996_v25  ;;  %v1193_v27 = vadd.f32 %v1192_v39, %v1191_v19  ;;  %v1212_v32 = vsel %vm845_vm4, %v1096_v7, 0.0  ;;  %v1098_v19 = vmul.f32 %v2089_v5, %v2089_v5 }
 0x153   : > { %v1214_v25 = vsel %vm845_vm4, %v1097_v9, 0.0  ;;  %v1099_v39 = vmul.f32 %v2116_v33, %v2116_v33  ;;  %v1023_v5 = vsel %vm845_vm4, %v2107_v23, 0.0  ;;  %v1025_v33 = vsel %vm845_vm4, %v2134_v55, 0.0 }
 0x154   : > { %v1195_v29 = vadd.f32 %v1194_v21, %v1193_v27  ;;  %v1000_v34 = vadd.f32 %v999_v26, %v998_v24  ;;  %v1216_v27 = vsel %vm845_vm4, %v1098_v19, 0.0  ;;  %v1100_v26 = vmul.f32 %v2107_v23, %v2107_v23 }
 0x155   : > { %v1027_v23 = vsel %vm845_vm4, %v2125_v46, 0.0 }
 0x156   : > { %v1002_v40 = vadd.f32 %v1001_v49, %v1000_v34  ;;  %v1197_v42 = vadd.f32 %v1196_v36, %v1195_v29  ;;  %v1218_v49 = vsel %vm845_vm4, %v1099_v39, 0.0  ;;  %v1101_v29 = vmul.f32 %v2134_v55, %v2134_v55 }
 0x157   : > { %v1220_v38 = vsel %vm845_vm4, %v1100_v26, 0.0  ;;  %v1029_v55 = vsel %vm845_vm4, %v2152_v14, 0.0 }
 0x158   : > { %v1199_v44 = vadd.f32 %v1198_v52, %v1197_v42  ;;  %v1004_v45 = vadd.f32 %v1003_v43, %v1002_v40  ;;  %v1102_v40 = vmul.f32 %v2125_v46, %v2125_v46  ;;  %v1222_v42 = vsel %vm845_vm4, %v1101_v29, 0.0 }
 0x159   : > { %v1103_v43 = vmul.f32 %v2152_v14, %v2152_v14  ;;  %v1031_v46 = vsel %vm845_vm4, %v2143_v6, 0.0  ;;  %v1033_v14 = vsel %vm845_vm4, %v2172_v41, 0.0 }
 0x15a   : > { %v1006_v2 = vadd.f32 %v1005_v1, %v1004_v45  ;;  %v1201_v54 = vadd.f32 %v1200_v48, %v1199_v44  ;;  %v1224_v51 = vsel %vm845_vm4, %v1102_v40, 0.0 }
 0x15b   : > { %v1226_v47 = vsel %vm845_vm4, %v1103_v43, 0.0 }
 0x15c   : > { %v1203_v57 = vadd.f32 %v1202_v53, %v1201_v54  ;;  %v1008_v58 = vadd.f32 %v1007_v59, %v1006_v2  ;;  %v1104_v53 = vmul.f32 %v2143_v6, %v2143_v6  ;;  %v1105_v2 = vmul.f32 %v2172_v41, %v2172_v41 }
 0x15e   : > { %v1010_v3 = vadd.f32 %v1009_v18, %v1008_v58  ;;  %v1205_v61 = vadd.f32 %v1204_v60, %v1203_v57  ;;  %v1228_v58 = vsel %vm845_vm4, %v1104_v53, 0.0  ;;  %v1106_v60 = vmul.f32 %v2163_v31, %v2163_v31 }
 0x15f   : > { %v1230_v62 = vsel %vm845_vm4, %v1105_v2, 0.0 }
 0x160   : > { %v1207_v16 = vadd.f32 %v1206_v63, %v1205_v61  ;;  %v1012_v28 = vadd.f32 %v1011_v12, %v1010_v3  ;;  %v1035_v3 = vsel %vm845_vm4, %v2163_v31, 0.0  ;;  %v1232_v12 = vsel %vm845_vm4, %v1106_v60, 0.0 }
 0x162   : > { %v1014_v13 = vadd.f32 %v1013_v37, %v1012_v28  ;;  %v1209_v15 = vadd.f32 %v1208_v4, %v1207_v16 }
 0x164   : > { %v1211_v17 = vadd.f32 %v1210_v8, %v1209_v15  ;;  %v1016_v11 = vadd.f32 %v1015_v30, %v1014_v13 }
 0x166   : > { %v1018_v20 = vadd.f32 %v1017_v56, %v1016_v11  ;;  %v1213_v21 = vadd.f32 %v1212_v32, %v1211_v17 }
 0x168   : > { %v1215_v22 = vadd.f32 %v1214_v25, %v1213_v21  ;;  %v1020_v24 = vadd.f32 %v1019_v50, %v1018_v20 }
 0x16a   : > { %v1022_v34 = vadd.f32 %v1021_v10, %v1020_v24  ;;  %v1217_v36 = vadd.f32 %v1216_v27, %v1215_v22 }
 0x16c   : > { %v1219_v35 = vadd.f32 %v1218_v49, %v1217_v36  ;;  %v1024_v52 = vadd.f32 %v1023_v5, %v1022_v34 }
 0x16e   : > { %v1026_v1 = vadd.f32 %v1025_v33, %v1024_v52  ;;  %v1221_v44 = vadd.f32 %v1220_v38, %v1219_v35 }
 0x170   : > { %v1223_v45 = vadd.f32 %v1222_v42, %v1221_v44  ;;  %v1028_v48 = vadd.f32 %v1027_v23, %v1026_v1 }
 0x172   : > { %v1030_v54 = vadd.f32 %v1029_v55, %v1028_v48  ;;  %v1225_v59 = vadd.f32 %v1224_v51, %v1223_v45 }
 0x174   : > { %v1227_v18 = vadd.f32 %v1226_v47, %v1225_v59  ;;  %v1032_v57 = vadd.f32 %v1031_v46, %v1030_v54 }
 0x176   : > { %v1034_v63 = vadd.f32 %v1033_v14, %v1032_v57  ;;  %v1229_v0 = vadd.f32 %v1228_v58, %v1227_v18 }
 0x178   : > { %v1036_v61 = vadd.f32 %v1035_v3, %v1034_v63  ;;  %v1231_v6 = vadd.f32 %v1230_v62, %v1229_v0 }
 0x17a   : > { %v1037_v41 = vrot.slane %v1036_v61, 4  ;;  %v1233_v37 = vadd.f32 %v1232_v12, %v1231_v6 }
 0x17c   : > { %v1038_v16 = vadd.f32 %v1037_v41, %v1036_v61  ;;  %v1234_v28 = vrot.slane %v1233_v37, 4 }
 0x17e   : > { %v1039_v4 = vrot.slane %v1038_v16, 2  ;;  %v1235_v7 = vadd.f32 %v1234_v28, %v1233_v37 }
 0x180   : > { %v1040_v8 = vadd.f32 %v1039_v4, %v1038_v16  ;;  %v1236_v9 = vrot.slane %v1235_v7, 2 }
 0x182   : > { %v1041_v13 = vrot.slane %v1040_v8, 1  ;;  %v1237_v15 = vadd.f32 %v1236_v9, %v1235_v7 }
 0x184   : > { %v1238_v30 = vrot.slane %v1237_v15, 1  ;;  %v1042_v31 = vadd.f32 %v1041_v13, %v1040_v8 }
 0x186   : > { %v1239_v56 = vadd.f32 %v1238_v30, %v1237_v15 }
 0x188   : > { %v1241_v17 = vsel %vm1240_vm5, %v1042_v31, %v1239_v56 }
 0x189   : > { %1243 = vst.msk [vmem:[%s184_s28] sm:$0x3] %vm1242_vm6, %v1241_v17 }
 0x18a PF: > { %s14_s12 = sadd.s32 1, %s1669_s12  }
 0x18b   : > { %p11_p5 = scmp.ge.s32.totalorder %s14_s12, 18  }
 0x18d   :  { %13 = sbr.rel (!%p11_p5) target bundleno = 1 (0x1), region = 70 }

</bundles_post_ra>
